<compile_context>
chip_gen: v5e
topology: v5e:2x2
jax: 0.10.0
libtpu: 0.0.40
codegen_flags: <defaults>
</compile_context>

<pallas_src>
import jax
import jax.numpy as jnp
from jax import lax
from jax.experimental import pallas as pl
from jax.experimental.pallas import tpu as pltpu

# ---------------------------------------------------------------- config
B = 2        # batch
T = 8        # decoder sequence length
H = 32       # args.hsz
NE = 6       # number of entities == number of graph nodes (proxy)
L_ENT = 4    # tokens per entity (entity-encoder proxy)
V_TGT = 40   # args.target_vocab_size
V_OUT = 50   # args.output_vocab_size (embedding table)
NHEAD = 4    # MultiHeadAttention h=4
DH = H // NHEAD
NEG = -1e9
ROWS = B * T           # decoder rows, time-major: row = t*B + b


# ---------------------------------------------------------------- fused kernel
def _fused_kernel(out_tok_ref, ent_tok_ref, ent_num_ref, embed_ref, w_graph_ref,
                  w_ih_c_ref, w_ih_e_ref, w_hh_ref, b_lstm_ref,
                  wq_ref, wk_ref, wv_ref, wo_ref, segb_ref,
                  w_sw_h_ref, w_sw_c_ref, b_sw_ref,
                  w_out_h_ref, w_out_c_ref, b_out_ref,
                  w_qm_h_ref, w_qm_c_ref,
                  logp_ref, z_ref,
                  hx_all, ctx_all):
    f32 = jnp.float32
    embed = embed_ref[...]                                          # (V_OUT, H)

    # ---------------- fused preamble (was separate XLA ops) ----------------
    # decoder-input embeddings via one-hot matmul; the LSTM input-gate matmul
    # is hoisted out of the recurrence (single full-M MXU op).
    tok = out_tok_ref[...]                                          # (ROWS, 1) i32
    oh = (tok == lax.broadcasted_iota(jnp.int32, (ROWS, V_OUT), 1)).astype(f32)
    e_flat = jnp.dot(oh, embed, preferred_element_type=f32)         # (ROWS, H)
    e_gates = jnp.dot(e_flat, w_ih_e_ref[...],
                      preferred_element_type=f32)                   # (ROWS, 4H)

    # entity-encoder proxy: mean-pool token embeddings (pool folded into onehot)
    etok = ent_tok_ref[...]                                         # (B*NE, L_ENT)
    iota_v = lax.broadcasted_iota(jnp.int32, (B * NE, V_OUT), 1)
    pool = jnp.zeros((B * NE, V_OUT), f32)
    for l in range(L_ENT):                                          # static, tiny
        pool = pool + (etok[:, l:l + 1] == iota_v).astype(f32)
    pool = pool * (1.0 / L_ENT)
    ents_flat = jnp.dot(pool, embed, preferred_element_type=f32)    # (B*NE, H)

    # graph-encoder proxy: node projection + masked-mean global vector
    nodes_flat = jnp.dot(ents_flat, w_graph_ref[...],
                         preferred_element_type=f32)                # (B*NE, H)
    nodes = nodes_flat.reshape(B, NE, H)

    n_list = [ent_num_ref[b] for b in range(B)]                     # SMEM scalars

    def valid(shape, b_axis, n_axis):
        iota_b = lax.broadcasted_iota(jnp.int32, shape, b_axis)
        iota_n = lax.broadcasted_iota(jnp.int32, shape, n_axis)
        limit = jnp.zeros(shape, jnp.int32)
        for b in range(B):
            limit = jnp.where(iota_b == b, n_list[b], limit)
        return iota_n < limit

    valid3 = valid((B, NE, H), 0, 1)
    nmask3 = jnp.where(valid3, 0.0, NEG).astype(f32)                # additive mask
    vmask3 = jnp.where(valid3, 1.0, 0.0).astype(f32)
    denom = jnp.maximum(jnp.sum(vmask3[:, :, 0:1], axis=1), 1.0)    # (B, 1)
    glob = jnp.sum(nodes * vmask3, axis=1) / denom                  # (B, H)

    # graph-attention K/V projections hoisted out of the time loop
    k3 = jnp.einsum('bnd,de->bne', nodes, wk_ref[...],
                    preferred_element_type=f32)                     # (B, NE, H)
    v3 = jnp.einsum('bnd,de->bne', nodes, wv_ref[...],
                    preferred_element_type=f32)                     # (B, NE, H)

    w_ih_c = w_ih_c_ref[...]
    w_hh = w_hh_ref[...]
    b_lstm = b_lstm_ref[...]
    wq = wq_ref[...]                                                # 1/sqrt(dh) folded
    wo = wo_ref[...]
    segb = segb_ref[...]                                            # block-diag head matrix

    # ---------------- recurrent decoder, fully unrolled (T = 8) ----------------
    hx = glob                                                       # hx = glob
    cx = glob                                                       # cx = hx.clone()
    ctx = jnp.zeros_like(glob)                                      # context = 0
    for t in range(T):
        # nn.LSTMCell with prev = cat(context, k_t); input-gate matmul hoisted.
        gates = (jnp.dot(ctx, w_ih_c, preferred_element_type=f32)
                 + jnp.dot(hx, w_hh, preferred_element_type=f32)
                 + e_gates[t * B:(t + 1) * B, :] + b_lstm)          # (B, 4H)
        sg = jax.nn.sigmoid(gates)                                  # one EUP launch
        th = jnp.tanh(gates)                                        # one EUP launch
        i_g = sg[:, 0 * H:1 * H]
        f_g = sg[:, 1 * H:2 * H]
        g_g = th[:, 2 * H:3 * H]
        o_g = sg[:, 3 * H:4 * H]
        cx = f_g * cx + i_g * g_g
        hx = o_g * jnp.tanh(cx)

        # 4-head graph attention; block-diagonal head matrix yields already
        # head-expanded scores (one small matmul, no segT expansion matmul).
        q = jnp.dot(hx, wq, preferred_element_type=f32)             # (B, H)
        qk = q[:, None, :] * k3                                     # (B, NE, H)
        scores = jnp.einsum('bnh,hk->bnk', qk, segb,
                            preferred_element_type=f32) + nmask3    # (B, NE, H)
        m = jnp.max(scores, axis=1, keepdims=True)
        es = jnp.exp(scores - m)
        attn = es * pl.reciprocal(jnp.sum(es, axis=1, keepdims=True), approx=True)
        ctx = jnp.dot(jnp.sum(attn * v3, axis=1), wo,
                      preferred_element_type=f32)                   # (B, H)

        # time-major stash: one contiguous 2-sublane store per array per step
        hx_all[t * B:(t + 1) * B, :] = hx
        ctx_all[t * B:(t + 1) * B, :] = ctx

    # ---------------- fused output head over all B*T (time-major) rows ----------------
    hxm = hx_all[...]                                               # (ROWS, H)
    ctxm = ctx_all[...]                                             # (ROWS, H)

    # switch: sigmoid([hx|ctx] @ Wsw + b); N==1 -> VPU multiply + lane reduce
    s = jax.nn.sigmoid(
        jnp.sum(hxm * w_sw_h_ref[...], axis=-1, keepdims=True)
        + jnp.sum(ctxm * w_sw_c_ref[...], axis=-1, keepdims=True)
        + b_sw_ref[...])                                            # (ROWS, 1)

    # vocab distribution
    logits = (jnp.dot(hxm, w_out_h_ref[...], preferred_element_type=f32)
              + jnp.dot(ctxm, w_out_c_ref[...], preferred_element_type=f32)
              + b_out_ref[...])                                     # (ROWS, V_TGT)
    lm = jnp.max(logits, axis=-1, keepdims=True)
    le = jnp.exp(logits - lm)
    pvocab = s * (le * pl.reciprocal(jnp.sum(le, axis=-1, keepdims=True),
                                     approx=True))                  # (ROWS, V_TGT)

    # copy attention, batched over all rows (1/sqrt(H) pre-folded into weights)
    qm = (jnp.dot(hxm, w_qm_h_ref[...], preferred_element_type=f32)
          + jnp.dot(ctxm, w_qm_c_ref[...], preferred_element_type=f32))  # (ROWS, H)
    sc_all = lax.dot_general(qm, ents_flat, (((1,), (1,)), ((), ())),
                             preferred_element_type=f32)            # (ROWS, B*NE)
    row_b = lax.broadcasted_iota(jnp.int32, (ROWS, NE), 0) % B      # batch of each row
    sc = sc_all[:, 0:NE]
    for b in range(1, B):
        sc = jnp.where(row_b == b, sc_all[:, b * NE:(b + 1) * NE], sc)
    limit = jnp.zeros((ROWS, NE), jnp.int32)
    for b in range(B):
        limit = jnp.where(row_b == b, n_list[b], limit)
    sc = jnp.where(lax.broadcasted_iota(jnp.int32, (ROWS, NE), 1) < limit, sc, NEG)
    cm = jnp.max(sc, axis=-1, keepdims=True)
    ce = jnp.exp(sc - cm)
    z = (1.0 - s) * (ce * pl.reciprocal(jnp.sum(ce, axis=-1, keepdims=True),
                                        approx=True))               # (ROWS, NE)

    # de-concatenated output writes (two lane-range stores, no lane concat)
    logp_ref[:, 0:V_TGT] = jnp.log(pvocab + 1e-6)
    logp_ref[:, V_TGT:] = jnp.log(z + 1e-6)
    z_ref[...] = z


def fused_forward(out_tok_tm, ent_tok, ent_num, p):
    vmem = pl.BlockSpec(memory_space=pltpu.MemorySpace.VMEM)
    smem = pl.BlockSpec(memory_space=pltpu.MemorySpace.SMEM)
    weights = (p['embed'], p['w_graph'],
               p['w_ih_c'], p['w_ih_e'], p['w_hh'], p['b_lstm'],
               p['wq_s'], p['wk'], p['wv'], p['wo'], p['seg_block'],
               p['w_sw_h'], p['w_sw_c'], p['b_sw'],
               p['w_out_h'], p['w_out_c'], p['b_out'],
               p['w_qm_h_s'], p['w_qm_c_s'])
    cost = pl.CostEstimate(flops=2_500_000, transcendentals=6_000,
                           bytes_accessed=220_000)
    return pl.pallas_call(
        _fused_kernel,
        out_shape=(jax.ShapeDtypeStruct((ROWS, V_TGT + NE), jnp.float32),
                   jax.ShapeDtypeStruct((ROWS, NE), jnp.float32)),
        in_specs=[vmem, vmem, smem] + [vmem] * len(weights),
        out_specs=(vmem, vmem),
        scratch_shapes=[pltpu.VMEM((ROWS, H), jnp.float32),    # hx history (time-major)
                        pltpu.VMEM((ROWS, H), jnp.float32)],   # ctx history (time-major)
        cost_estimate=cost,
    )(out_tok_tm, ent_tok, ent_num, *weights)


# ---------------------------------------------------------------- full forward
def model_forward(out_tokens, ent_tokens, ent_num_list, params):
    # Only index plumbing stays in the wrapper; all math is in the kernel.
    out_tok_tm = out_tokens.astype(jnp.int32).T.reshape(ROWS, 1)      # row = t*B + b
    ent_tok = ent_tokens.astype(jnp.int32).reshape(B * NE, L_ENT)
    ent_num = ent_num_list.astype(jnp.int32)

    logp2d, z2d = fused_forward(out_tok_tm, ent_tok, ent_num, params)

    logp = logp2d.reshape(T, B, V_TGT + NE).transpose(1, 0, 2)        # (B, T, V_TGT+NE)
    z = z2d.reshape(T, B, NE).transpose(1, 0, 2)                      # (B, T, NE)
    return logp, z


# ---------------------------------------------------------------- params
def init_params(key):
    ks = jax.random.split(key, 20)

    def w(k, shape, scale=0.1):
        return (scale * jax.random.normal(k, shape)).astype(jnp.float32)

    # head-selector matrix: seg[d, h] = 1 iff lane d belongs to head h
    seg = jnp.repeat(jnp.eye(NHEAD, dtype=jnp.float32), DH, axis=0)   # (H, NHEAD)

    return {
        'embed':     w(ks[0], (V_OUT, H)),
        # graph-encoder proxy
        'w_graph':   w(ks[1], (H, H)),
        # LSTMCell, input = cat(context, embed): W_ih split into two (H,4H) halves,
        # biases pre-summed (b_ih + b_hh); gates in (i, f, g, o) order.
        'w_ih_c':    w(ks[2], (H, 4 * H)),
        'w_ih_e':    w(ks[3], (H, 4 * H)),
        'w_hh':      w(ks[4], (H, 4 * H)),
        'b_lstm':    w(ks[5], (1, 4 * H)),
        # MultiHeadAttention (graph), h=4; 1/sqrt(dh) folded into Wq.
        'wq_s':      w(ks[6], (H, H)) / jnp.sqrt(jnp.float32(DH)),
        'wk':        w(ks[7], (H, H)),
        'wv':        w(ks[8], (H, H)),
        'wo':        w(ks[9], (H, H)),
        # block-diagonal head matrix (seg @ seg.T): one matmul produces
        # already head-expanded attention scores.
        'seg_block': jnp.dot(seg, seg.T),
        # switch / out / mat_attention, each split into hx- and ctx-halves
        'w_sw_h':    w(ks[10], (1, H)),
        'w_sw_c':    w(ks[11], (1, H)),
        'b_sw':      w(ks[12], (1, 1)),
        'w_out_h':   w(ks[13], (H, V_TGT)),
        'w_out_c':   w(ks[14], (H, V_TGT)),
        'b_out':     w(ks[15], (1, V_TGT)),
        # copy-attention query weights; 1/sqrt(H) folded in.
        'w_qm_h_s':  w(ks[16], (H, H)) / jnp.sqrt(jnp.float32(H)),
        'w_qm_c_s':  w(ks[17], (H, H)) / jnp.sqrt(jnp.float32(H)),
    }


# ---------------------------------------------------------------- main
if __name__ == "__main__":
    key = jax.random.PRNGKey(0)
    k_param, k_tok, k_ent = jax.random.split(key, 3)

    params = init_params(k_param)

    out_tokens = jax.random.randint(k_tok, (B, T), 0, V_OUT)              # batch.out[0]
    ent_tokens = jax.random.randint(k_ent, (B, NE, L_ENT), 0, V_OUT)      # batch.ent tokens
    ent_num_list = jnp.array([NE, NE - 2], dtype=jnp.int32)               # batch.ent[2]

    logp, z = jax.jit(model_forward)(out_tokens, ent_tokens, ent_num_list, params)
    jax.block_until_ready((logp, z))

    assert logp.shape == (B, T, V_TGT + NE)
    assert z.shape == (B, T, NE)
    assert bool(jnp.all(jnp.isfinite(logp)))
    print("KERNEL_OK")
</pallas_src>

<mosaic_0001>
module attributes {stable_mosaic.version = 11 : i64} {
  func.func @_fused_kernel(%arg0: memref<16x1xi32, #tpu.memory_space<vmem>>, %arg1: memref<12x4xi32, #tpu.memory_space<vmem>>, %arg2: memref<2xi32, #tpu.memory_space<smem>>, %arg3: memref<50x32xf32, #tpu.memory_space<vmem>>, %arg4: memref<32x32xf32, #tpu.memory_space<vmem>>, %arg5: memref<32x128xf32, #tpu.memory_space<vmem>>, %arg6: memref<32x128xf32, #tpu.memory_space<vmem>>, %arg7: memref<32x128xf32, #tpu.memory_space<vmem>>, %arg8: memref<1x128xf32, #tpu.memory_space<vmem>>, %arg9: memref<32x32xf32, #tpu.memory_space<vmem>>, %arg10: memref<32x32xf32, #tpu.memory_space<vmem>>, %arg11: memref<32x32xf32, #tpu.memory_space<vmem>>, %arg12: memref<32x32xf32, #tpu.memory_space<vmem>>, %arg13: memref<32x32xf32, #tpu.memory_space<vmem>>, %arg14: memref<1x32xf32, #tpu.memory_space<vmem>>, %arg15: memref<1x32xf32, #tpu.memory_space<vmem>>, %arg16: memref<1x1xf32, #tpu.memory_space<vmem>>, %arg17: memref<32x40xf32, #tpu.memory_space<vmem>>, %arg18: memref<32x40xf32, #tpu.memory_space<vmem>>, %arg19: memref<1x40xf32, #tpu.memory_space<vmem>>, %arg20: memref<32x32xf32, #tpu.memory_space<vmem>>, %arg21: memref<32x32xf32, #tpu.memory_space<vmem>>, %arg22: memref<16x46xf32, #tpu.memory_space<vmem>>, %arg23: memref<16x6xf32, #tpu.memory_space<vmem>>, %arg24: memref<16x32xf32, #tpu.memory_space<vmem>>, %arg25: memref<16x32xf32, #tpu.memory_space<vmem>>) attributes {dimension_semantics = [], scalar_prefetch = 0 : i64, scratch_operands = 2 : i64, tpu.core_type = #tpu.core_type<tc>} {
    %c0 = arith.constant 0 : index
    %c0_0 = arith.constant 0 : index
    %0 = vector.load %arg3[%c0, %c0_0] : memref<50x32xf32, #tpu.memory_space<vmem>>, vector<50x32xf32>
    %c0_1 = arith.constant 0 : index
    %c0_2 = arith.constant 0 : index
    %1 = vector.load %arg0[%c0_1, %c0_2] : memref<16x1xi32, #tpu.memory_space<vmem>>, vector<16x1xi32>
    %2 = tpu.iota {dimensions = array<i32: 1>} : vector<16x50xi32>
    %3 = vector.broadcast %1 : vector<16x1xi32> to vector<16x50xi32>
    %4 = arith.cmpi eq, %3, %2 : vector<16x50xi32>
    %5 = arith.extui %4 : vector<16x50xi1> to vector<16x50xi32>
    %6 = arith.sitofp %5 : vector<16x50xi32> to vector<16x50xf32>
    %cst = arith.constant dense<0.000000e+00> : vector<16x32xf32>
    %7 = tpu.matmul %6, %0, %cst {dimension_numbers = #tpu.dot_dimension_numbers<[1], [0], [0], [1], [0, 0, 1, 1], [], []>} : vector<16x50xf32>, vector<50x32xf32>, vector<16x32xf32> -> vector<16x32xf32>
    %c0_3 = arith.constant 0 : index
    %c0_4 = arith.constant 0 : index
    %8 = vector.load %arg6[%c0_3, %c0_4] : memref<32x128xf32, #tpu.memory_space<vmem>>, vector<32x128xf32>
    %cst_5 = arith.constant dense<0.000000e+00> : vector<16x128xf32>
    %9 = tpu.matmul %7, %8, %cst_5 {dimension_numbers = #tpu.dot_dimension_numbers<[1], [0], [0], [1], [0, 0, 1, 1], [], []>} : vector<16x32xf32>, vector<32x128xf32>, vector<16x128xf32> -> vector<16x128xf32>
    %c0_6 = arith.constant 0 : index
    %c0_7 = arith.constant 0 : index
    %10 = vector.load %arg1[%c0_6, %c0_7] : memref<12x4xi32, #tpu.memory_space<vmem>>, vector<12x4xi32>
    %11 = tpu.iota {dimensions = array<i32: 1>} : vector<12x50xi32>
    %cst_8 = arith.constant 0.000000e+00 : f32
    %12 = vector.broadcast %cst_8 : f32 to vector<12x50xf32>
    %13 = vector.extract_strided_slice %10 {offsets = [0, 0], sizes = [12, 1], strides = [1, 1]} : vector<12x4xi32> to vector<12x1xi32>
    %14 = vector.broadcast %13 : vector<12x1xi32> to vector<12x50xi32>
    %15 = arith.cmpi eq, %14, %11 : vector<12x50xi32>
    %16 = arith.extui %15 : vector<12x50xi1> to vector<12x50xi32>
    %17 = arith.sitofp %16 : vector<12x50xi32> to vector<12x50xf32>
    %18 = arith.addf %12, %17 : vector<12x50xf32>
    %19 = vector.extract_strided_slice %10 {offsets = [0, 1], sizes = [12, 1], strides = [1, 1]} : vector<12x4xi32> to vector<12x1xi32>
    %20 = vector.broadcast %19 : vector<12x1xi32> to vector<12x50xi32>
    %21 = arith.cmpi eq, %20, %11 : vector<12x50xi32>
    %22 = arith.extui %21 : vector<12x50xi1> to vector<12x50xi32>
    %23 = arith.sitofp %22 : vector<12x50xi32> to vector<12x50xf32>
    %24 = arith.addf %18, %23 : vector<12x50xf32>
    %25 = vector.extract_strided_slice %10 {offsets = [0, 2], sizes = [12, 1], strides = [1, 1]} : vector<12x4xi32> to vector<12x1xi32>
    %26 = vector.broadcast %25 : vector<12x1xi32> to vector<12x50xi32>
    %27 = arith.cmpi eq, %26, %11 : vector<12x50xi32>
    %28 = arith.extui %27 : vector<12x50xi1> to vector<12x50xi32>
    %29 = arith.sitofp %28 : vector<12x50xi32> to vector<12x50xf32>
    %30 = arith.addf %24, %29 : vector<12x50xf32>
    %31 = vector.extract_strided_slice %10 {offsets = [0, 3], sizes = [12, 1], strides = [1, 1]} : vector<12x4xi32> to vector<12x1xi32>
    %32 = vector.broadcast %31 : vector<12x1xi32> to vector<12x50xi32>
    %33 = arith.cmpi eq, %32, %11 : vector<12x50xi32>
    %34 = arith.extui %33 : vector<12x50xi1> to vector<12x50xi32>
    %35 = arith.sitofp %34 : vector<12x50xi32> to vector<12x50xf32>
    %36 = arith.addf %30, %35 : vector<12x50xf32>
    %cst_9 = arith.constant 2.500000e-01 : f32
    %37 = vector.broadcast %cst_9 : f32 to vector<12x50xf32>
    %38 = arith.mulf %36, %37 : vector<12x50xf32>
    %cst_10 = arith.constant dense<0.000000e+00> : vector<12x32xf32>
    %39 = tpu.matmul %38, %0, %cst_10 {dimension_numbers = #tpu.dot_dimension_numbers<[1], [0], [0], [1], [0, 0, 1, 1], [], []>} : vector<12x50xf32>, vector<50x32xf32>, vector<12x32xf32> -> vector<12x32xf32>
    %c0_11 = arith.constant 0 : index
    %c0_12 = arith.constant 0 : index
    %40 = vector.load %arg4[%c0_11, %c0_12] : memref<32x32xf32, #tpu.memory_space<vmem>>, vector<32x32xf32>
    %cst_13 = arith.constant dense<0.000000e+00> : vector<12x32xf32>
    %41 = tpu.matmul %39, %40, %cst_13 {dimension_numbers = #tpu.dot_dimension_numbers<[1], [0], [0], [1], [0, 0, 1, 1], [], []>} : vector<12x32xf32>, vector<32x32xf32>, vector<12x32xf32> -> vector<12x32xf32>
    %42 = vector.shape_cast %41 : vector<12x32xf32> to vector<2x6x32xf32>
    %c0_14 = arith.constant 0 : index
    %43 = memref.load %arg2[%c0_14] : memref<2xi32, #tpu.memory_space<smem>>
    %c1 = arith.constant 1 : index
    %44 = memref.load %arg2[%c1] : memref<2xi32, #tpu.memory_space<smem>>
    %45 = tpu.iota {dimensions = array<i32: 0>} : vector<2x6x32xi32>
    %46 = tpu.iota {dimensions = array<i32: 1>} : vector<2x6x32xi32>
    %c0_i32 = arith.constant 0 : i32
    %47 = vector.broadcast %c0_i32 : i32 to vector<2x6x32xi32>
    %c0_i32_15 = arith.constant 0 : i32
    %48 = vector.broadcast %c0_i32_15 : i32 to vector<2x6x32xi32>
    %49 = arith.cmpi eq, %45, %48 : vector<2x6x32xi32>
    %50 = vector.broadcast %43 : i32 to vector<2x6x32xi32>
    %51 = arith.select %49, %50, %47 : vector<2x6x32xi1>, vector<2x6x32xi32>
    %c1_i32 = arith.constant 1 : i32
    %52 = vector.broadcast %c1_i32 : i32 to vector<2x6x32xi32>
    %53 = arith.cmpi eq, %45, %52 : vector<2x6x32xi32>
    %54 = vector.broadcast %44 : i32 to vector<2x6x32xi32>
    %55 = arith.select %53, %54, %51 : vector<2x6x32xi1>, vector<2x6x32xi32>
    %56 = arith.cmpi slt, %46, %55 : vector<2x6x32xi32>
    %cst_16 = arith.constant 0.000000e+00 : f32
    %cst_17 = arith.constant -1.000000e+09 : f32
    %57 = vector.broadcast %cst_16 : f32 to vector<2x6x32xf32>
    %58 = vector.broadcast %cst_17 : f32 to vector<2x6x32xf32>
    %59 = arith.select %56, %57, %58 : vector<2x6x32xi1>, vector<2x6x32xf32>
    %cst_18 = arith.constant 1.000000e+00 : f32
    %cst_19 = arith.constant 0.000000e+00 : f32
    %60 = vector.broadcast %cst_18 : f32 to vector<2x6x32xf32>
    %61 = vector.broadcast %cst_19 : f32 to vector<2x6x32xf32>
    %62 = arith.select %56, %60, %61 : vector<2x6x32xi1>, vector<2x6x32xf32>
    %63 = vector.extract_strided_slice %62 {offsets = [0, 0, 0], sizes = [2, 6, 1], strides = [1, 1, 1]} : vector<2x6x32xf32> to vector<2x6x1xf32>
    %cst_20 = arith.constant dense<0.000000e+00> : vector<2x1xf32>
    %64 = vector.multi_reduction <add>, %63, %cst_20 [1] : vector<2x6x1xf32> to vector<2x1xf32>
    %cst_21 = arith.constant 1.000000e+00 : f32
    %65 = vector.broadcast %cst_21 : f32 to vector<2x1xf32>
    %66 = arith.maximumf %64, %65 : vector<2x1xf32>
    %67 = arith.mulf %42, %62 : vector<2x6x32xf32>
    %cst_22 = arith.constant dense<0.000000e+00> : vector<2x32xf32>
    %68 = vector.multi_reduction <add>, %67, %cst_22 [1] : vector<2x6x32xf32> to vector<2x32xf32>
    %69 = vector.broadcast %66 : vector<2x1xf32> to vector<2x32xf32>
    %70 = arith.divf %68, %69 : vector<2x32xf32>
    %c0_23 = arith.constant 0 : index
    %c0_24 = arith.constant 0 : index
    %71 = vector.load %arg10[%c0_23, %c0_24] : memref<32x32xf32, #tpu.memory_space<vmem>>, vector<32x32xf32>
    "tpu.trace_start"() <{level = 10 : i32, message = "bnd,de->bne"}> : () -> ()
    %cst_25 = arith.constant dense<0.000000e+00> : vector<2x6x32xf32>
    %72 = tpu.matmul %42, %71, %cst_25 {dimension_numbers = #tpu.dot_dimension_numbers<[2], [0], [0, 1], [1], [0, 0, 0, 1, 1, 1], [], []>} : vector<2x6x32xf32>, vector<32x32xf32>, vector<2x6x32xf32> -> vector<2x6x32xf32>
    "tpu.trace_stop"() : () -> ()
    %c0_26 = arith.constant 0 : index
    %c0_27 = arith.constant 0 : index
    %73 = vector.load %arg11[%c0_26, %c0_27] : memref<32x32xf32, #tpu.memory_space<vmem>>, vector<32x32xf32>
    "tpu.trace_start"() <{level = 10 : i32, message = "bnd,de->bne"}> : () -> ()
    %cst_28 = arith.constant dense<0.000000e+00> : vector<2x6x32xf32>
    %74 = tpu.matmul %42, %73, %cst_28 {dimension_numbers = #tpu.dot_dimension_numbers<[2], [0], [0, 1], [1], [0, 0, 0, 1, 1, 1], [], []>} : vector<2x6x32xf32>, vector<32x32xf32>, vector<2x6x32xf32> -> vector<2x6x32xf32>
    "tpu.trace_stop"() : () -> ()
    %c0_29 = arith.constant 0 : index
    %c0_30 = arith.constant 0 : index
    %75 = vector.load %arg5[%c0_29, %c0_30] : memref<32x128xf32, #tpu.memory_space<vmem>>, vector<32x128xf32>
    %c0_31 = arith.constant 0 : index
    %c0_32 = arith.constant 0 : index
    %76 = vector.load %arg7[%c0_31, %c0_32] : memref<32x128xf32, #tpu.memory_space<vmem>>, vector<32x128xf32>
    %c0_33 = arith.constant 0 : index
    %c0_34 = arith.constant 0 : index
    %77 = vector.load %arg8[%c0_33, %c0_34] : memref<1x128xf32, #tpu.memory_space<vmem>>, vector<1x128xf32>
    %c0_35 = arith.constant 0 : index
    %c0_36 = arith.constant 0 : index
    %78 = vector.load %arg9[%c0_35, %c0_36] : memref<32x32xf32, #tpu.memory_space<vmem>>, vector<32x32xf32>
    %c0_37 = arith.constant 0 : index
    %c0_38 = arith.constant 0 : index
    %79 = vector.load %arg12[%c0_37, %c0_38] : memref<32x32xf32, #tpu.memory_space<vmem>>, vector<32x32xf32>
    %c0_39 = arith.constant 0 : index
    %c0_40 = arith.constant 0 : index
    %80 = vector.load %arg13[%c0_39, %c0_40] : memref<32x32xf32, #tpu.memory_space<vmem>>, vector<32x32xf32>
    %cst_41 = arith.constant 0.000000e+00 : f32
    %81 = vector.broadcast %cst_41 : f32 to vector<2x32xf32>
    %cst_42 = arith.constant dense<0.000000e+00> : vector<2x128xf32>
    %82 = tpu.matmul %81, %75, %cst_42 {dimension_numbers = #tpu.dot_dimension_numbers<[1], [0], [0], [1], [0, 0, 1, 1], [], []>} : vector<2x32xf32>, vector<32x128xf32>, vector<2x128xf32> -> vector<2x128xf32>
    %cst_43 = arith.constant dense<0.000000e+00> : vector<2x128xf32>
    %83 = tpu.matmul %70, %76, %cst_43 {dimension_numbers = #tpu.dot_dimension_numbers<[1], [0], [0], [1], [0, 0, 1, 1], [], []>} : vector<2x32xf32>, vector<32x128xf32>, vector<2x128xf32> -> vector<2x128xf32>
    %84 = arith.addf %82, %83 : vector<2x128xf32>
    %85 = vector.extract_strided_slice %9 {offsets = [0, 0], sizes = [2, 128], strides = [1, 1]} : vector<16x128xf32> to vector<2x128xf32>
    %86 = arith.addf %84, %85 : vector<2x128xf32>
    %87 = vector.broadcast %77 : vector<1x128xf32> to vector<2x128xf32>
    %88 = arith.addf %86, %87 : vector<2x128xf32>
    %89 = arith.negf %88 : vector<2x128xf32>
    %90 = math.exp %89 : vector<2x128xf32>
    %cst_44 = arith.constant 1.000000e+00 : f32
    %91 = vector.broadcast %cst_44 : f32 to vector<2x128xf32>
    %92 = arith.addf %91, %90 : vector<2x128xf32>
    %93 = arith.divf %91, %92 : vector<2x128xf32>
    %94 = math.tanh %88 : vector<2x128xf32>
    %95 = vector.extract_strided_slice %93 {offsets = [0, 0], sizes = [2, 32], strides = [1, 1]} : vector<2x128xf32> to vector<2x32xf32>
    %96 = vector.extract_strided_slice %93 {offsets = [0, 32], sizes = [2, 32], strides = [1, 1]} : vector<2x128xf32> to vector<2x32xf32>
    %97 = vector.extract_strided_slice %94 {offsets = [0, 64], sizes = [2, 32], strides = [1, 1]} : vector<2x128xf32> to vector<2x32xf32>
    %98 = vector.extract_strided_slice %93 {offsets = [0, 96], sizes = [2, 32], strides = [1, 1]} : vector<2x128xf32> to vector<2x32xf32>
    %99 = arith.mulf %96, %70 : vector<2x32xf32>
    %100 = arith.mulf %95, %97 : vector<2x32xf32>
    %101 = arith.addf %99, %100 : vector<2x32xf32>
    %102 = math.tanh %101 : vector<2x32xf32>
    %103 = arith.mulf %98, %102 : vector<2x32xf32>
    %cst_45 = arith.constant dense<0.000000e+00> : vector<2x32xf32>
    %104 = tpu.matmul %103, %78, %cst_45 {dimension_numbers = #tpu.dot_dimension_numbers<[1], [0], [0], [1], [0, 0, 1, 1], [], []>} : vector<2x32xf32>, vector<32x32xf32>, vector<2x32xf32> -> vector<2x32xf32>
    %105 = vector.shape_cast %104 : vector<2x32xf32> to vector<2x1x32xf32>
    %106 = vector.broadcast %105 : vector<2x1x32xf32> to vector<2x6x32xf32>
    %107 = arith.mulf %106, %72 : vector<2x6x32xf32>
    "tpu.trace_start"() <{level = 10 : i32, message = "bnh,hk->bnk"}> : () -> ()
    %cst_46 = arith.constant dense<0.000000e+00> : vector<2x6x32xf32>
    %108 = tpu.matmul %107, %80, %cst_46 {dimension_numbers = #tpu.dot_dimension_numbers<[2], [0], [0, 1], [1], [0, 0, 0, 1, 1, 1], [], []>} : vector<2x6x32xf32>, vector<32x32xf32>, vector<2x6x32xf32> -> vector<2x6x32xf32>
    "tpu.trace_stop"() : () -> ()
    %109 = arith.addf %108, %59 : vector<2x6x32xf32>
    %cst_47 = arith.constant dense<0xFF800000> : vector<2x32xf32>
    %110 = vector.multi_reduction <maximumf>, %109, %cst_47 [1] : vector<2x6x32xf32> to vector<2x32xf32>
    %111 = vector.shape_cast %110 : vector<2x32xf32> to vector<2x1x32xf32>
    %112 = vector.broadcast %111 : vector<2x1x32xf32> to vector<2x6x32xf32>
    %113 = arith.subf %109, %112 : vector<2x6x32xf32>
    %114 = math.exp %113 : vector<2x6x32xf32>
    %cst_48 = arith.constant dense<0.000000e+00> : vector<2x32xf32>
    %115 = vector.multi_reduction <add>, %114, %cst_48 [1] : vector<2x6x32xf32> to vector<2x32xf32>
    %116 = vector.shape_cast %115 : vector<2x32xf32> to vector<2x1x32xf32>
    %117 = tpu.reciprocal %116 {approx = true} : vector<2x1x32xf32> -> vector<2x1x32xf32>
    %118 = vector.broadcast %117 : vector<2x1x32xf32> to vector<2x6x32xf32>
    %119 = arith.mulf %114, %118 : vector<2x6x32xf32>
    %120 = arith.mulf %119, %74 : vector<2x6x32xf32>
    %cst_49 = arith.constant dense<0.000000e+00> : vector<2x32xf32>
    %121 = vector.multi_reduction <add>, %120, %cst_49 [1] : vector<2x6x32xf32> to vector<2x32xf32>
    %cst_50 = arith.constant dense<0.000000e+00> : vector<2x32xf32>
    %122 = tpu.matmul %121, %79, %cst_50 {dimension_numbers = #tpu.dot_dimension_numbers<[1], [0], [0], [1], [0, 0, 1, 1], [], []>} : vector<2x32xf32>, vector<32x32xf32>, vector<2x32xf32> -> vector<2x32xf32>
    %c0_51 = arith.constant 0 : index
    %c0_52 = arith.constant 0 : index
    %123 = vector.load %arg24[%c0_51, %c0_52] : memref<16x32xf32, #tpu.memory_space<vmem>>, vector<2x32xf32>
    tpu.vector_store %arg24[%c0_51, %c0_52], %103 {strides = array<i32>} : memref<16x32xf32, #tpu.memory_space<vmem>>, vector<2x32xf32>,
    %c0_53 = arith.constant 0 : index
    %c0_54 = arith.constant 0 : index
    %124 = vector.load %arg25[%c0_53, %c0_54] : memref<16x32xf32, #tpu.memory_space<vmem>>, vector<2x32xf32>
    tpu.vector_store %arg25[%c0_53, %c0_54], %122 {strides = array<i32>} : memref<16x32xf32, #tpu.memory_space<vmem>>, vector<2x32xf32>,
    %cst_55 = arith.constant dense<0.000000e+00> : vector<2x128xf32>
    %125 = tpu.matmul %122, %75, %cst_55 {dimension_numbers = #tpu.dot_dimension_numbers<[1], [0], [0], [1], [0, 0, 1, 1], [], []>} : vector<2x32xf32>, vector<32x128xf32>, vector<2x128xf32> -> vector<2x128xf32>
    %cst_56 = arith.constant dense<0.000000e+00> : vector<2x128xf32>
    %126 = tpu.matmul %103, %76, %cst_56 {dimension_numbers = #tpu.dot_dimension_numbers<[1], [0], [0], [1], [0, 0, 1, 1], [], []>} : vector<2x32xf32>, vector<32x128xf32>, vector<2x128xf32> -> vector<2x128xf32>
    %127 = arith.addf %125, %126 : vector<2x128xf32>
    %128 = vector.extract_strided_slice %9 {offsets = [2, 0], sizes = [2, 128], strides = [1, 1]} : vector<16x128xf32> to vector<2x128xf32>
    %129 = arith.addf %127, %128 : vector<2x128xf32>
    %130 = vector.broadcast %77 : vector<1x128xf32> to vector<2x128xf32>
    %131 = arith.addf %129, %130 : vector<2x128xf32>
    %132 = arith.negf %131 : vector<2x128xf32>
    %133 = math.exp %132 : vector<2x128xf32>
    %cst_57 = arith.constant 1.000000e+00 : f32
    %134 = vector.broadcast %cst_57 : f32 to vector<2x128xf32>
    %135 = arith.addf %134, %133 : vector<2x128xf32>
    %136 = arith.divf %134, %135 : vector<2x128xf32>
    %137 = math.tanh %131 : vector<2x128xf32>
    %138 = vector.extract_strided_slice %136 {offsets = [0, 0], sizes = [2, 32], strides = [1, 1]} : vector<2x128xf32> to vector<2x32xf32>
    %139 = vector.extract_strided_slice %136 {offsets = [0, 32], sizes = [2, 32], strides = [1, 1]} : vector<2x128xf32> to vector<2x32xf32>
    %140 = vector.extract_strided_slice %137 {offsets = [0, 64], sizes = [2, 32], strides = [1, 1]} : vector<2x128xf32> to vector<2x32xf32>
    %141 = vector.extract_strided_slice %136 {offsets = [0, 96], sizes = [2, 32], strides = [1, 1]} : vector<2x128xf32> to vector<2x32xf32>
    %142 = arith.mulf %139, %101 : vector<2x32xf32>
    %143 = arith.mulf %138, %140 : vector<2x32xf32>
    %144 = arith.addf %142, %143 : vector<2x32xf32>
    %145 = math.tanh %144 : vector<2x32xf32>
    %146 = arith.mulf %141, %145 : vector<2x32xf32>
    %cst_58 = arith.constant dense<0.000000e+00> : vector<2x32xf32>
    %147 = tpu.matmul %146, %78, %cst_58 {dimension_numbers = #tpu.dot_dimension_numbers<[1], [0], [0], [1], [0, 0, 1, 1], [], []>} : vector<2x32xf32>, vector<32x32xf32>, vector<2x32xf32> -> vector<2x32xf32>
    %148 = vector.shape_cast %147 : vector<2x32xf32> to vector<2x1x32xf32>
    %149 = vector.broadcast %148 : vector<2x1x32xf32> to vector<2x6x32xf32>
    %150 = arith.mulf %149, %72 : vector<2x6x32xf32>
    "tpu.trace_start"() <{level = 10 : i32, message = "bnh,hk->bnk"}> : () -> ()
    %cst_59 = arith.constant dense<0.000000e+00> : vector<2x6x32xf32>
    %151 = tpu.matmul %150, %80, %cst_59 {dimension_numbers = #tpu.dot_dimension_numbers<[2], [0], [0, 1], [1], [0, 0, 0, 1, 1, 1], [], []>} : vector<2x6x32xf32>, vector<32x32xf32>, vector<2x6x32xf32> -> vector<2x6x32xf32>
    "tpu.trace_stop"() : () -> ()
    %152 = arith.addf %151, %59 : vector<2x6x32xf32>
    %cst_60 = arith.constant dense<0xFF800000> : vector<2x32xf32>
    %153 = vector.multi_reduction <maximumf>, %152, %cst_60 [1] : vector<2x6x32xf32> to vector<2x32xf32>
    %154 = vector.shape_cast %153 : vector<2x32xf32> to vector<2x1x32xf32>
    %155 = vector.broadcast %154 : vector<2x1x32xf32> to vector<2x6x32xf32>
    %156 = arith.subf %152, %155 : vector<2x6x32xf32>
    %157 = math.exp %156 : vector<2x6x32xf32>
    %cst_61 = arith.constant dense<0.000000e+00> : vector<2x32xf32>
    %158 = vector.multi_reduction <add>, %157, %cst_61 [1] : vector<2x6x32xf32> to vector<2x32xf32>
    %159 = vector.shape_cast %158 : vector<2x32xf32> to vector<2x1x32xf32>
    %160 = tpu.reciprocal %159 {approx = true} : vector<2x1x32xf32> -> vector<2x1x32xf32>
    %161 = vector.broadcast %160 : vector<2x1x32xf32> to vector<2x6x32xf32>
    %162 = arith.mulf %157, %161 : vector<2x6x32xf32>
    %163 = arith.mulf %162, %74 : vector<2x6x32xf32>
    %cst_62 = arith.constant dense<0.000000e+00> : vector<2x32xf32>
    %164 = vector.multi_reduction <add>, %163, %cst_62 [1] : vector<2x6x32xf32> to vector<2x32xf32>
    %cst_63 = arith.constant dense<0.000000e+00> : vector<2x32xf32>
    %165 = tpu.matmul %164, %79, %cst_63 {dimension_numbers = #tpu.dot_dimension_numbers<[1], [0], [0], [1], [0, 0, 1, 1], [], []>} : vector<2x32xf32>, vector<32x32xf32>, vector<2x32xf32> -> vector<2x32xf32>
    %c2 = arith.constant 2 : index
    %c0_64 = arith.constant 0 : index
    %166 = vector.load %arg24[%c2, %c0_64] : memref<16x32xf32, #tpu.memory_space<vmem>>, vector<2x32xf32>
    tpu.vector_store %arg24[%c2, %c0_64], %146 {strides = array<i32>} : memref<16x32xf32, #tpu.memory_space<vmem>>, vector<2x32xf32>,
    %c2_65 = arith.constant 2 : index
    %c0_66 = arith.constant 0 : index
    %167 = vector.load %arg25[%c2_65, %c0_66] : memref<16x32xf32, #tpu.memory_space<vmem>>, vector<2x32xf32>
    tpu.vector_store %arg25[%c2_65, %c0_66], %165 {strides = array<i32>} : memref<16x32xf32, #tpu.memory_space<vmem>>, vector<2x32xf32>,
    %cst_67 = arith.constant dense<0.000000e+00> : vector<2x128xf32>
    %168 = tpu.matmul %165, %75, %cst_67 {dimension_numbers = #tpu.dot_dimension_numbers<[1], [0], [0], [1], [0, 0, 1, 1], [], []>} : vector<2x32xf32>, vector<32x128xf32>, vector<2x128xf32> -> vector<2x128xf32>
    %cst_68 = arith.constant dense<0.000000e+00> : vector<2x128xf32>
    %169 = tpu.matmul %146, %76, %cst_68 {dimension_numbers = #tpu.dot_dimension_numbers<[1], [0], [0], [1], [0, 0, 1, 1], [], []>} : vector<2x32xf32>, vector<32x128xf32>, vector<2x128xf32> -> vector<2x128xf32>
    %170 = arith.addf %168, %169 : vector<2x128xf32>
    %171 = vector.extract_strided_slice %9 {offsets = [4, 0], sizes = [2, 128], strides = [1, 1]} : vector<16x128xf32> to vector<2x128xf32>
    %172 = arith.addf %170, %171 : vector<2x128xf32>
    %173 = vector.broadcast %77 : vector<1x128xf32> to vector<2x128xf32>
    %174 = arith.addf %172, %173 : vector<2x128xf32>
    %175 = arith.negf %174 : vector<2x128xf32>
    %176 = math.exp %175 : vector<2x128xf32>
    %cst_69 = arith.constant 1.000000e+00 : f32
    %177 = vector.broadcast %cst_69 : f32 to vector<2x128xf32>
    %178 = arith.addf %177, %176 : vector<2x128xf32>
    %179 = arith.divf %177, %178 : vector<2x128xf32>
    %180 = math.tanh %174 : vector<2x128xf32>
    %181 = vector.extract_strided_slice %179 {offsets = [0, 0], sizes = [2, 32], strides = [1, 1]} : vector<2x128xf32> to vector<2x32xf32>
    %182 = vector.extract_strided_slice %179 {offsets = [0, 32], sizes = [2, 32], strides = [1, 1]} : vector<2x128xf32> to vector<2x32xf32>
    %183 = vector.extract_strided_slice %180 {offsets = [0, 64], sizes = [2, 32], strides = [1, 1]} : vector<2x128xf32> to vector<2x32xf32>
    %184 = vector.extract_strided_slice %179 {offsets = [0, 96], sizes = [2, 32], strides = [1, 1]} : vector<2x128xf32> to vector<2x32xf32>
    %185 = arith.mulf %182, %144 : vector<2x32xf32>
    %186 = arith.mulf %181, %183 : vector<2x32xf32>
    %187 = arith.addf %185, %186 : vector<2x32xf32>
    %188 = math.tanh %187 : vector<2x32xf32>
    %189 = arith.mulf %184, %188 : vector<2x32xf32>
    %cst_70 = arith.constant dense<0.000000e+00> : vector<2x32xf32>
    %190 = tpu.matmul %189, %78, %cst_70 {dimension_numbers = #tpu.dot_dimension_numbers<[1], [0], [0], [1], [0, 0, 1, 1], [], []>} : vector<2x32xf32>, vector<32x32xf32>, vector<2x32xf32> -> vector<2x32xf32>
    %191 = vector.shape_cast %190 : vector<2x32xf32> to vector<2x1x32xf32>
    %192 = vector.broadcast %191 : vector<2x1x32xf32> to vector<2x6x32xf32>
    %193 = arith.mulf %192, %72 : vector<2x6x32xf32>
    "tpu.trace_start"() <{level = 10 : i32, message = "bnh,hk->bnk"}> : () -> ()
    %cst_71 = arith.constant dense<0.000000e+00> : vector<2x6x32xf32>
    %194 = tpu.matmul %193, %80, %cst_71 {dimension_numbers = #tpu.dot_dimension_numbers<[2], [0], [0, 1], [1], [0, 0, 0, 1, 1, 1], [], []>} : vector<2x6x32xf32>, vector<32x32xf32>, vector<2x6x32xf32> -> vector<2x6x32xf32>
    "tpu.trace_stop"() : () -> ()
    %195 = arith.addf %194, %59 : vector<2x6x32xf32>
    %cst_72 = arith.constant dense<0xFF800000> : vector<2x32xf32>
    %196 = vector.multi_reduction <maximumf>, %195, %cst_72 [1] : vector<2x6x32xf32> to vector<2x32xf32>
    %197 = vector.shape_cast %196 : vector<2x32xf32> to vector<2x1x32xf32>
    %198 = vector.broadcast %197 : vector<2x1x32xf32> to vector<2x6x32xf32>
    %199 = arith.subf %195, %198 : vector<2x6x32xf32>
    %200 = math.exp %199 : vector<2x6x32xf32>
    %cst_73 = arith.constant dense<0.000000e+00> : vector<2x32xf32>
    %201 = vector.multi_reduction <add>, %200, %cst_73 [1] : vector<2x6x32xf32> to vector<2x32xf32>
    %202 = vector.shape_cast %201 : vector<2x32xf32> to vector<2x1x32xf32>
    %203 = tpu.reciprocal %202 {approx = true} : vector<2x1x32xf32> -> vector<2x1x32xf32>
    %204 = vector.broadcast %203 : vector<2x1x32xf32> to vector<2x6x32xf32>
    %205 = arith.mulf %200, %204 : vector<2x6x32xf32>
    %206 = arith.mulf %205, %74 : vector<2x6x32xf32>
    %cst_74 = arith.constant dense<0.000000e+00> : vector<2x32xf32>
    %207 = vector.multi_reduction <add>, %206, %cst_74 [1] : vector<2x6x32xf32> to vector<2x32xf32>
    %cst_75 = arith.constant dense<0.000000e+00> : vector<2x32xf32>
    %208 = tpu.matmul %207, %79, %cst_75 {dimension_numbers = #tpu.dot_dimension_numbers<[1], [0], [0], [1], [0, 0, 1, 1], [], []>} : vector<2x32xf32>, vector<32x32xf32>, vector<2x32xf32> -> vector<2x32xf32>
    %c4 = arith.constant 4 : index
    %c0_76 = arith.constant 0 : index
    %209 = vector.load %arg24[%c4, %c0_76] : memref<16x32xf32, #tpu.memory_space<vmem>>, vector<2x32xf32>
    tpu.vector_store %arg24[%c4, %c0_76], %189 {strides = array<i32>} : memref<16x32xf32, #tpu.memory_space<vmem>>, vector<2x32xf32>,
    %c4_77 = arith.constant 4 : index
    %c0_78 = arith.constant 0 : index
    %210 = vector.load %arg25[%c4_77, %c0_78] : memref<16x32xf32, #tpu.memory_space<vmem>>, vector<2x32xf32>
    tpu.vector_store %arg25[%c4_77, %c0_78], %208 {strides = array<i32>} : memref<16x32xf32, #tpu.memory_space<vmem>>, vector<2x32xf32>,
    %cst_79 = arith.constant dense<0.000000e+00> : vector<2x128xf32>
    %211 = tpu.matmul %208, %75, %cst_79 {dimension_numbers = #tpu.dot_dimension_numbers<[1], [0], [0], [1], [0, 0, 1, 1], [], []>} : vector<2x32xf32>, vector<32x128xf32>, vector<2x128xf32> -> vector<2x128xf32>
    %cst_80 = arith.constant dense<0.000000e+00> : vector<2x128xf32>
    %212 = tpu.matmul %189, %76, %cst_80 {dimension_numbers = #tpu.dot_dimension_numbers<[1], [0], [0], [1], [0, 0, 1, 1], [], []>} : vector<2x32xf32>, vector<32x128xf32>, vector<2x128xf32> -> vector<2x128xf32>
    %213 = arith.addf %211, %212 : vector<2x128xf32>
    %214 = vector.extract_strided_slice %9 {offsets = [6, 0], sizes = [2, 128], strides = [1, 1]} : vector<16x128xf32> to vector<2x128xf32>
    %215 = arith.addf %213, %214 : vector<2x128xf32>
    %216 = vector.broadcast %77 : vector<1x128xf32> to vector<2x128xf32>
    %217 = arith.addf %215, %216 : vector<2x128xf32>
    %218 = arith.negf %217 : vector<2x128xf32>
    %219 = math.exp %218 : vector<2x128xf32>
    %cst_81 = arith.constant 1.000000e+00 : f32
    %220 = vector.broadcast %cst_81 : f32 to vector<2x128xf32>
    %221 = arith.addf %220, %219 : vector<2x128xf32>
    %222 = arith.divf %220, %221 : vector<2x128xf32>
    %223 = math.tanh %217 : vector<2x128xf32>
    %224 = vector.extract_strided_slice %222 {offsets = [0, 0], sizes = [2, 32], strides = [1, 1]} : vector<2x128xf32> to vector<2x32xf32>
    %225 = vector.extract_strided_slice %222 {offsets = [0, 32], sizes = [2, 32], strides = [1, 1]} : vector<2x128xf32> to vector<2x32xf32>
    %226 = vector.extract_strided_slice %223 {offsets = [0, 64], sizes = [2, 32], strides = [1, 1]} : vector<2x128xf32> to vector<2x32xf32>
    %227 = vector.extract_strided_slice %222 {offsets = [0, 96], sizes = [2, 32], strides = [1, 1]} : vector<2x128xf32> to vector<2x32xf32>
    %228 = arith.mulf %225, %187 : vector<2x32xf32>
    %229 = arith.mulf %224, %226 : vector<2x32xf32>
    %230 = arith.addf %228, %229 : vector<2x32xf32>
    %231 = math.tanh %230 : vector<2x32xf32>
    %232 = arith.mulf %227, %231 : vector<2x32xf32>
    %cst_82 = arith.constant dense<0.000000e+00> : vector<2x32xf32>
    %233 = tpu.matmul %232, %78, %cst_82 {dimension_numbers = #tpu.dot_dimension_numbers<[1], [0], [0], [1], [0, 0, 1, 1], [], []>} : vector<2x32xf32>, vector<32x32xf32>, vector<2x32xf32> -> vector<2x32xf32>
    %234 = vector.shape_cast %233 : vector<2x32xf32> to vector<2x1x32xf32>
    %235 = vector.broadcast %234 : vector<2x1x32xf32> to vector<2x6x32xf32>
    %236 = arith.mulf %235, %72 : vector<2x6x32xf32>
    "tpu.trace_start"() <{level = 10 : i32, message = "bnh,hk->bnk"}> : () -> ()
    %cst_83 = arith.constant dense<0.000000e+00> : vector<2x6x32xf32>
    %237 = tpu.matmul %236, %80, %cst_83 {dimension_numbers = #tpu.dot_dimension_numbers<[2], [0], [0, 1], [1], [0, 0, 0, 1, 1, 1], [], []>} : vector<2x6x32xf32>, vector<32x32xf32>, vector<2x6x32xf32> -> vector<2x6x32xf32>
    "tpu.trace_stop"() : () -> ()
    %238 = arith.addf %237, %59 : vector<2x6x32xf32>
    %cst_84 = arith.constant dense<0xFF800000> : vector<2x32xf32>
    %239 = vector.multi_reduction <maximumf>, %238, %cst_84 [1] : vector<2x6x32xf32> to vector<2x32xf32>
    %240 = vector.shape_cast %239 : vector<2x32xf32> to vector<2x1x32xf32>
    %241 = vector.broadcast %240 : vector<2x1x32xf32> to vector<2x6x32xf32>
    %242 = arith.subf %238, %241 : vector<2x6x32xf32>
    %243 = math.exp %242 : vector<2x6x32xf32>
    %cst_85 = arith.constant dense<0.000000e+00> : vector<2x32xf32>
    %244 = vector.multi_reduction <add>, %243, %cst_85 [1] : vector<2x6x32xf32> to vector<2x32xf32>
    %245 = vector.shape_cast %244 : vector<2x32xf32> to vector<2x1x32xf32>
    %246 = tpu.reciprocal %245 {approx = true} : vector<2x1x32xf32> -> vector<2x1x32xf32>
    %247 = vector.broadcast %246 : vector<2x1x32xf32> to vector<2x6x32xf32>
    %248 = arith.mulf %243, %247 : vector<2x6x32xf32>
    %249 = arith.mulf %248, %74 : vector<2x6x32xf32>
    %cst_86 = arith.constant dense<0.000000e+00> : vector<2x32xf32>
    %250 = vector.multi_reduction <add>, %249, %cst_86 [1] : vector<2x6x32xf32> to vector<2x32xf32>
    %cst_87 = arith.constant dense<0.000000e+00> : vector<2x32xf32>
    %251 = tpu.matmul %250, %79, %cst_87 {dimension_numbers = #tpu.dot_dimension_numbers<[1], [0], [0], [1], [0, 0, 1, 1], [], []>} : vector<2x32xf32>, vector<32x32xf32>, vector<2x32xf32> -> vector<2x32xf32>
    %c6 = arith.constant 6 : index
    %c0_88 = arith.constant 0 : index
    %252 = vector.load %arg24[%c6, %c0_88] : memref<16x32xf32, #tpu.memory_space<vmem>>, vector<2x32xf32>
    tpu.vector_store %arg24[%c6, %c0_88], %232 {strides = array<i32>} : memref<16x32xf32, #tpu.memory_space<vmem>>, vector<2x32xf32>,
    %c6_89 = arith.constant 6 : index
    %c0_90 = arith.constant 0 : index
    %253 = vector.load %arg25[%c6_89, %c0_90] : memref<16x32xf32, #tpu.memory_space<vmem>>, vector<2x32xf32>
    tpu.vector_store %arg25[%c6_89, %c0_90], %251 {strides = array<i32>} : memref<16x32xf32, #tpu.memory_space<vmem>>, vector<2x32xf32>,
    %cst_91 = arith.constant dense<0.000000e+00> : vector<2x128xf32>
    %254 = tpu.matmul %251, %75, %cst_91 {dimension_numbers = #tpu.dot_dimension_numbers<[1], [0], [0], [1], [0, 0, 1, 1], [], []>} : vector<2x32xf32>, vector<32x128xf32>, vector<2x128xf32> -> vector<2x128xf32>
    %cst_92 = arith.constant dense<0.000000e+00> : vector<2x128xf32>
    %255 = tpu.matmul %232, %76, %cst_92 {dimension_numbers = #tpu.dot_dimension_numbers<[1], [0], [0], [1], [0, 0, 1, 1], [], []>} : vector<2x32xf32>, vector<32x128xf32>, vector<2x128xf32> -> vector<2x128xf32>
    %256 = arith.addf %254, %255 : vector<2x128xf32>
    %257 = vector.extract_strided_slice %9 {offsets = [8, 0], sizes = [2, 128], strides = [1, 1]} : vector<16x128xf32> to vector<2x128xf32>
    %258 = arith.addf %256, %257 : vector<2x128xf32>
    %259 = vector.broadcast %77 : vector<1x128xf32> to vector<2x128xf32>
    %260 = arith.addf %258, %259 : vector<2x128xf32>
    %261 = arith.negf %260 : vector<2x128xf32>
    %262 = math.exp %261 : vector<2x128xf32>
    %cst_93 = arith.constant 1.000000e+00 : f32
    %263 = vector.broadcast %cst_93 : f32 to vector<2x128xf32>
    %264 = arith.addf %263, %262 : vector<2x128xf32>
    %265 = arith.divf %263, %264 : vector<2x128xf32>
    %266 = math.tanh %260 : vector<2x128xf32>
    %267 = vector.extract_strided_slice %265 {offsets = [0, 0], sizes = [2, 32], strides = [1, 1]} : vector<2x128xf32> to vector<2x32xf32>
    %268 = vector.extract_strided_slice %265 {offsets = [0, 32], sizes = [2, 32], strides = [1, 1]} : vector<2x128xf32> to vector<2x32xf32>
    %269 = vector.extract_strided_slice %266 {offsets = [0, 64], sizes = [2, 32], strides = [1, 1]} : vector<2x128xf32> to vector<2x32xf32>
    %270 = vector.extract_strided_slice %265 {offsets = [0, 96], sizes = [2, 32], strides = [1, 1]} : vector<2x128xf32> to vector<2x32xf32>
    %271 = arith.mulf %268, %230 : vector<2x32xf32>
    %272 = arith.mulf %267, %269 : vector<2x32xf32>
    %273 = arith.addf %271, %272 : vector<2x32xf32>
    %274 = math.tanh %273 : vector<2x32xf32>
    %275 = arith.mulf %270, %274 : vector<2x32xf32>
    %cst_94 = arith.constant dense<0.000000e+00> : vector<2x32xf32>
    %276 = tpu.matmul %275, %78, %cst_94 {dimension_numbers = #tpu.dot_dimension_numbers<[1], [0], [0], [1], [0, 0, 1, 1], [], []>} : vector<2x32xf32>, vector<32x32xf32>, vector<2x32xf32> -> vector<2x32xf32>
    %277 = vector.shape_cast %276 : vector<2x32xf32> to vector<2x1x32xf32>
    %278 = vector.broadcast %277 : vector<2x1x32xf32> to vector<2x6x32xf32>
    %279 = arith.mulf %278, %72 : vector<2x6x32xf32>
    "tpu.trace_start"() <{level = 10 : i32, message = "bnh,hk->bnk"}> : () -> ()
    %cst_95 = arith.constant dense<0.000000e+00> : vector<2x6x32xf32>
    %280 = tpu.matmul %279, %80, %cst_95 {dimension_numbers = #tpu.dot_dimension_numbers<[2], [0], [0, 1], [1], [0, 0, 0, 1, 1, 1], [], []>} : vector<2x6x32xf32>, vector<32x32xf32>, vector<2x6x32xf32> -> vector<2x6x32xf32>
    "tpu.trace_stop"() : () -> ()
    %281 = arith.addf %280, %59 : vector<2x6x32xf32>
    %cst_96 = arith.constant dense<0xFF800000> : vector<2x32xf32>
    %282 = vector.multi_reduction <maximumf>, %281, %cst_96 [1] : vector<2x6x32xf32> to vector<2x32xf32>
    %283 = vector.shape_cast %282 : vector<2x32xf32> to vector<2x1x32xf32>
    %284 = vector.broadcast %283 : vector<2x1x32xf32> to vector<2x6x32xf32>
    %285 = arith.subf %281, %284 : vector<2x6x32xf32>
    %286 = math.exp %285 : vector<2x6x32xf32>
    %cst_97 = arith.constant dense<0.000000e+00> : vector<2x32xf32>
    %287 = vector.multi_reduction <add>, %286, %cst_97 [1] : vector<2x6x32xf32> to vector<2x32xf32>
    %288 = vector.shape_cast %287 : vector<2x32xf32> to vector<2x1x32xf32>
    %289 = tpu.reciprocal %288 {approx = true} : vector<2x1x32xf32> -> vector<2x1x32xf32>
    %290 = vector.broadcast %289 : vector<2x1x32xf32> to vector<2x6x32xf32>
    %291 = arith.mulf %286, %290 : vector<2x6x32xf32>
    %292 = arith.mulf %291, %74 : vector<2x6x32xf32>
    %cst_98 = arith.constant dense<0.000000e+00> : vector<2x32xf32>
    %293 = vector.multi_reduction <add>, %292, %cst_98 [1] : vector<2x6x32xf32> to vector<2x32xf32>
    %cst_99 = arith.constant dense<0.000000e+00> : vector<2x32xf32>
    %294 = tpu.matmul %293, %79, %cst_99 {dimension_numbers = #tpu.dot_dimension_numbers<[1], [0], [0], [1], [0, 0, 1, 1], [], []>} : vector<2x32xf32>, vector<32x32xf32>, vector<2x32xf32> -> vector<2x32xf32>
    %c8 = arith.constant 8 : index
    %c0_100 = arith.constant 0 : index
    %295 = vector.load %arg24[%c8, %c0_100] : memref<16x32xf32, #tpu.memory_space<vmem>>, vector<2x32xf32>
    tpu.vector_store %arg24[%c8, %c0_100], %275 {strides = array<i32>} : memref<16x32xf32, #tpu.memory_space<vmem>>, vector<2x32xf32>,
    %c8_101 = arith.constant 8 : index
    %c0_102 = arith.constant 0 : index
    %296 = vector.load %arg25[%c8_101, %c0_102] : memref<16x32xf32, #tpu.memory_space<vmem>>, vector<2x32xf32>
    tpu.vector_store %arg25[%c8_101, %c0_102], %294 {strides = array<i32>} : memref<16x32xf32, #tpu.memory_space<vmem>>, vector<2x32xf32>,
    %cst_103 = arith.constant dense<0.000000e+00> : vector<2x128xf32>
    %297 = tpu.matmul %294, %75, %cst_103 {dimension_numbers = #tpu.dot_dimension_numbers<[1], [0], [0], [1], [0, 0, 1, 1], [], []>} : vector<2x32xf32>, vector<32x128xf32>, vector<2x128xf32> -> vector<2x128xf32>
    %cst_104 = arith.constant dense<0.000000e+00> : vector<2x128xf32>
    %298 = tpu.matmul %275, %76, %cst_104 {dimension_numbers = #tpu.dot_dimension_numbers<[1], [0], [0], [1], [0, 0, 1, 1], [], []>} : vector<2x32xf32>, vector<32x128xf32>, vector<2x128xf32> -> vector<2x128xf32>
    %299 = arith.addf %297, %298 : vector<2x128xf32>
    %300 = vector.extract_strided_slice %9 {offsets = [10, 0], sizes = [2, 128], strides = [1, 1]} : vector<16x128xf32> to vector<2x128xf32>
    %301 = arith.addf %299, %300 : vector<2x128xf32>
    %302 = vector.broadcast %77 : vector<1x128xf32> to vector<2x128xf32>
    %303 = arith.addf %301, %302 : vector<2x128xf32>
    %304 = arith.negf %303 : vector<2x128xf32>
    %305 = math.exp %304 : vector<2x128xf32>
    %cst_105 = arith.constant 1.000000e+00 : f32
    %306 = vector.broadcast %cst_105 : f32 to vector<2x128xf32>
    %307 = arith.addf %306, %305 : vector<2x128xf32>
    %308 = arith.divf %306, %307 : vector<2x128xf32>
    %309 = math.tanh %303 : vector<2x128xf32>
    %310 = vector.extract_strided_slice %308 {offsets = [0, 0], sizes = [2, 32], strides = [1, 1]} : vector<2x128xf32> to vector<2x32xf32>
    %311 = vector.extract_strided_slice %308 {offsets = [0, 32], sizes = [2, 32], strides = [1, 1]} : vector<2x128xf32> to vector<2x32xf32>
    %312 = vector.extract_strided_slice %309 {offsets = [0, 64], sizes = [2, 32], strides = [1, 1]} : vector<2x128xf32> to vector<2x32xf32>
    %313 = vector.extract_strided_slice %308 {offsets = [0, 96], sizes = [2, 32], strides = [1, 1]} : vector<2x128xf32> to vector<2x32xf32>
    %314 = arith.mulf %311, %273 : vector<2x32xf32>
    %315 = arith.mulf %310, %312 : vector<2x32xf32>
    %316 = arith.addf %314, %315 : vector<2x32xf32>
    %317 = math.tanh %316 : vector<2x32xf32>
    %318 = arith.mulf %313, %317 : vector<2x32xf32>
    %cst_106 = arith.constant dense<0.000000e+00> : vector<2x32xf32>
    %319 = tpu.matmul %318, %78, %cst_106 {dimension_numbers = #tpu.dot_dimension_numbers<[1], [0], [0], [1], [0, 0, 1, 1], [], []>} : vector<2x32xf32>, vector<32x32xf32>, vector<2x32xf32> -> vector<2x32xf32>
    %320 = vector.shape_cast %319 : vector<2x32xf32> to vector<2x1x32xf32>
    %321 = vector.broadcast %320 : vector<2x1x32xf32> to vector<2x6x32xf32>
    %322 = arith.mulf %321, %72 : vector<2x6x32xf32>
    "tpu.trace_start"() <{level = 10 : i32, message = "bnh,hk->bnk"}> : () -> ()
    %cst_107 = arith.constant dense<0.000000e+00> : vector<2x6x32xf32>
    %323 = tpu.matmul %322, %80, %cst_107 {dimension_numbers = #tpu.dot_dimension_numbers<[2], [0], [0, 1], [1], [0, 0, 0, 1, 1, 1], [], []>} : vector<2x6x32xf32>, vector<32x32xf32>, vector<2x6x32xf32> -> vector<2x6x32xf32>
    "tpu.trace_stop"() : () -> ()
    %324 = arith.addf %323, %59 : vector<2x6x32xf32>
    %cst_108 = arith.constant dense<0xFF800000> : vector<2x32xf32>
    %325 = vector.multi_reduction <maximumf>, %324, %cst_108 [1] : vector<2x6x32xf32> to vector<2x32xf32>
    %326 = vector.shape_cast %325 : vector<2x32xf32> to vector<2x1x32xf32>
    %327 = vector.broadcast %326 : vector<2x1x32xf32> to vector<2x6x32xf32>
    %328 = arith.subf %324, %327 : vector<2x6x32xf32>
    %329 = math.exp %328 : vector<2x6x32xf32>
    %cst_109 = arith.constant dense<0.000000e+00> : vector<2x32xf32>
    %330 = vector.multi_reduction <add>, %329, %cst_109 [1] : vector<2x6x32xf32> to vector<2x32xf32>
    %331 = vector.shape_cast %330 : vector<2x32xf32> to vector<2x1x32xf32>
    %332 = tpu.reciprocal %331 {approx = true} : vector<2x1x32xf32> -> vector<2x1x32xf32>
    %333 = vector.broadcast %332 : vector<2x1x32xf32> to vector<2x6x32xf32>
    %334 = arith.mulf %329, %333 : vector<2x6x32xf32>
    %335 = arith.mulf %334, %74 : vector<2x6x32xf32>
    %cst_110 = arith.constant dense<0.000000e+00> : vector<2x32xf32>
    %336 = vector.multi_reduction <add>, %335, %cst_110 [1] : vector<2x6x32xf32> to vector<2x32xf32>
    %cst_111 = arith.constant dense<0.000000e+00> : vector<2x32xf32>
    %337 = tpu.matmul %336, %79, %cst_111 {dimension_numbers = #tpu.dot_dimension_numbers<[1], [0], [0], [1], [0, 0, 1, 1], [], []>} : vector<2x32xf32>, vector<32x32xf32>, vector<2x32xf32> -> vector<2x32xf32>
    %c10 = arith.constant 10 : index
    %c0_112 = arith.constant 0 : index
    %338 = vector.load %arg24[%c10, %c0_112] : memref<16x32xf32, #tpu.memory_space<vmem>>, vector<2x32xf32>
    tpu.vector_store %arg24[%c10, %c0_112], %318 {strides = array<i32>} : memref<16x32xf32, #tpu.memory_space<vmem>>, vector<2x32xf32>,
    %c10_113 = arith.constant 10 : index
    %c0_114 = arith.constant 0 : index
    %339 = vector.load %arg25[%c10_113, %c0_114] : memref<16x32xf32, #tpu.memory_space<vmem>>, vector<2x32xf32>
    tpu.vector_store %arg25[%c10_113, %c0_114], %337 {strides = array<i32>} : memref<16x32xf32, #tpu.memory_space<vmem>>, vector<2x32xf32>,
    %cst_115 = arith.constant dense<0.000000e+00> : vector<2x128xf32>
    %340 = tpu.matmul %337, %75, %cst_115 {dimension_numbers = #tpu.dot_dimension_numbers<[1], [0], [0], [1], [0, 0, 1, 1], [], []>} : vector<2x32xf32>, vector<32x128xf32>, vector<2x128xf32> -> vector<2x128xf32>
    %cst_116 = arith.constant dense<0.000000e+00> : vector<2x128xf32>
    %341 = tpu.matmul %318, %76, %cst_116 {dimension_numbers = #tpu.dot_dimension_numbers<[1], [0], [0], [1], [0, 0, 1, 1], [], []>} : vector<2x32xf32>, vector<32x128xf32>, vector<2x128xf32> -> vector<2x128xf32>
    %342 = arith.addf %340, %341 : vector<2x128xf32>
    %343 = vector.extract_strided_slice %9 {offsets = [12, 0], sizes = [2, 128], strides = [1, 1]} : vector<16x128xf32> to vector<2x128xf32>
    %344 = arith.addf %342, %343 : vector<2x128xf32>
    %345 = vector.broadcast %77 : vector<1x128xf32> to vector<2x128xf32>
    %346 = arith.addf %344, %345 : vector<2x128xf32>
    %347 = arith.negf %346 : vector<2x128xf32>
    %348 = math.exp %347 : vector<2x128xf32>
    %cst_117 = arith.constant 1.000000e+00 : f32
    %349 = vector.broadcast %cst_117 : f32 to vector<2x128xf32>
    %350 = arith.addf %349, %348 : vector<2x128xf32>
    %351 = arith.divf %349, %350 : vector<2x128xf32>
    %352 = math.tanh %346 : vector<2x128xf32>
    %353 = vector.extract_strided_slice %351 {offsets = [0, 0], sizes = [2, 32], strides = [1, 1]} : vector<2x128xf32> to vector<2x32xf32>
    %354 = vector.extract_strided_slice %351 {offsets = [0, 32], sizes = [2, 32], strides = [1, 1]} : vector<2x128xf32> to vector<2x32xf32>
    %355 = vector.extract_strided_slice %352 {offsets = [0, 64], sizes = [2, 32], strides = [1, 1]} : vector<2x128xf32> to vector<2x32xf32>
    %356 = vector.extract_strided_slice %351 {offsets = [0, 96], sizes = [2, 32], strides = [1, 1]} : vector<2x128xf32> to vector<2x32xf32>
    %357 = arith.mulf %354, %316 : vector<2x32xf32>
    %358 = arith.mulf %353, %355 : vector<2x32xf32>
    %359 = arith.addf %357, %358 : vector<2x32xf32>
    %360 = math.tanh %359 : vector<2x32xf32>
    %361 = arith.mulf %356, %360 : vector<2x32xf32>
    %cst_118 = arith.constant dense<0.000000e+00> : vector<2x32xf32>
    %362 = tpu.matmul %361, %78, %cst_118 {dimension_numbers = #tpu.dot_dimension_numbers<[1], [0], [0], [1], [0, 0, 1, 1], [], []>} : vector<2x32xf32>, vector<32x32xf32>, vector<2x32xf32> -> vector<2x32xf32>
    %363 = vector.shape_cast %362 : vector<2x32xf32> to vector<2x1x32xf32>
    %364 = vector.broadcast %363 : vector<2x1x32xf32> to vector<2x6x32xf32>
    %365 = arith.mulf %364, %72 : vector<2x6x32xf32>
    "tpu.trace_start"() <{level = 10 : i32, message = "bnh,hk->bnk"}> : () -> ()
    %cst_119 = arith.constant dense<0.000000e+00> : vector<2x6x32xf32>
    %366 = tpu.matmul %365, %80, %cst_119 {dimension_numbers = #tpu.dot_dimension_numbers<[2], [0], [0, 1], [1], [0, 0, 0, 1, 1, 1], [], []>} : vector<2x6x32xf32>, vector<32x32xf32>, vector<2x6x32xf32> -> vector<2x6x32xf32>
    "tpu.trace_stop"() : () -> ()
    %367 = arith.addf %366, %59 : vector<2x6x32xf32>
    %cst_120 = arith.constant dense<0xFF800000> : vector<2x32xf32>
    %368 = vector.multi_reduction <maximumf>, %367, %cst_120 [1] : vector<2x6x32xf32> to vector<2x32xf32>
    %369 = vector.shape_cast %368 : vector<2x32xf32> to vector<2x1x32xf32>
    %370 = vector.broadcast %369 : vector<2x1x32xf32> to vector<2x6x32xf32>
    %371 = arith.subf %367, %370 : vector<2x6x32xf32>
    %372 = math.exp %371 : vector<2x6x32xf32>
    %cst_121 = arith.constant dense<0.000000e+00> : vector<2x32xf32>
    %373 = vector.multi_reduction <add>, %372, %cst_121 [1] : vector<2x6x32xf32> to vector<2x32xf32>
    %374 = vector.shape_cast %373 : vector<2x32xf32> to vector<2x1x32xf32>
    %375 = tpu.reciprocal %374 {approx = true} : vector<2x1x32xf32> -> vector<2x1x32xf32>
    %376 = vector.broadcast %375 : vector<2x1x32xf32> to vector<2x6x32xf32>
    %377 = arith.mulf %372, %376 : vector<2x6x32xf32>
    %378 = arith.mulf %377, %74 : vector<2x6x32xf32>
    %cst_122 = arith.constant dense<0.000000e+00> : vector<2x32xf32>
    %379 = vector.multi_reduction <add>, %378, %cst_122 [1] : vector<2x6x32xf32> to vector<2x32xf32>
    %cst_123 = arith.constant dense<0.000000e+00> : vector<2x32xf32>
    %380 = tpu.matmul %379, %79, %cst_123 {dimension_numbers = #tpu.dot_dimension_numbers<[1], [0], [0], [1], [0, 0, 1, 1], [], []>} : vector<2x32xf32>, vector<32x32xf32>, vector<2x32xf32> -> vector<2x32xf32>
    %c12 = arith.constant 12 : index
    %c0_124 = arith.constant 0 : index
    %381 = vector.load %arg24[%c12, %c0_124] : memref<16x32xf32, #tpu.memory_space<vmem>>, vector<2x32xf32>
    tpu.vector_store %arg24[%c12, %c0_124], %361 {strides = array<i32>} : memref<16x32xf32, #tpu.memory_space<vmem>>, vector<2x32xf32>,
    %c12_125 = arith.constant 12 : index
    %c0_126 = arith.constant 0 : index
    %382 = vector.load %arg25[%c12_125, %c0_126] : memref<16x32xf32, #tpu.memory_space<vmem>>, vector<2x32xf32>
    tpu.vector_store %arg25[%c12_125, %c0_126], %380 {strides = array<i32>} : memref<16x32xf32, #tpu.memory_space<vmem>>, vector<2x32xf32>,
    %cst_127 = arith.constant dense<0.000000e+00> : vector<2x128xf32>
    %383 = tpu.matmul %380, %75, %cst_127 {dimension_numbers = #tpu.dot_dimension_numbers<[1], [0], [0], [1], [0, 0, 1, 1], [], []>} : vector<2x32xf32>, vector<32x128xf32>, vector<2x128xf32> -> vector<2x128xf32>
    %cst_128 = arith.constant dense<0.000000e+00> : vector<2x128xf32>
    %384 = tpu.matmul %361, %76, %cst_128 {dimension_numbers = #tpu.dot_dimension_numbers<[1], [0], [0], [1], [0, 0, 1, 1], [], []>} : vector<2x32xf32>, vector<32x128xf32>, vector<2x128xf32> -> vector<2x128xf32>
    %385 = arith.addf %383, %384 : vector<2x128xf32>
    %386 = vector.extract_strided_slice %9 {offsets = [14, 0], sizes = [2, 128], strides = [1, 1]} : vector<16x128xf32> to vector<2x128xf32>
    %387 = arith.addf %385, %386 : vector<2x128xf32>
    %388 = vector.broadcast %77 : vector<1x128xf32> to vector<2x128xf32>
    %389 = arith.addf %387, %388 : vector<2x128xf32>
    %390 = arith.negf %389 : vector<2x128xf32>
    %391 = math.exp %390 : vector<2x128xf32>
    %cst_129 = arith.constant 1.000000e+00 : f32
    %392 = vector.broadcast %cst_129 : f32 to vector<2x128xf32>
    %393 = arith.addf %392, %391 : vector<2x128xf32>
    %394 = arith.divf %392, %393 : vector<2x128xf32>
    %395 = math.tanh %389 : vector<2x128xf32>
    %396 = vector.extract_strided_slice %394 {offsets = [0, 0], sizes = [2, 32], strides = [1, 1]} : vector<2x128xf32> to vector<2x32xf32>
    %397 = vector.extract_strided_slice %394 {offsets = [0, 32], sizes = [2, 32], strides = [1, 1]} : vector<2x128xf32> to vector<2x32xf32>
    %398 = vector.extract_strided_slice %395 {offsets = [0, 64], sizes = [2, 32], strides = [1, 1]} : vector<2x128xf32> to vector<2x32xf32>
    %399 = vector.extract_strided_slice %394 {offsets = [0, 96], sizes = [2, 32], strides = [1, 1]} : vector<2x128xf32> to vector<2x32xf32>
    %400 = arith.mulf %397, %359 : vector<2x32xf32>
    %401 = arith.mulf %396, %398 : vector<2x32xf32>
    %402 = arith.addf %400, %401 : vector<2x32xf32>
    %403 = math.tanh %402 : vector<2x32xf32>
    %404 = arith.mulf %399, %403 : vector<2x32xf32>
    %cst_130 = arith.constant dense<0.000000e+00> : vector<2x32xf32>
    %405 = tpu.matmul %404, %78, %cst_130 {dimension_numbers = #tpu.dot_dimension_numbers<[1], [0], [0], [1], [0, 0, 1, 1], [], []>} : vector<2x32xf32>, vector<32x32xf32>, vector<2x32xf32> -> vector<2x32xf32>
    %406 = vector.shape_cast %405 : vector<2x32xf32> to vector<2x1x32xf32>
    %407 = vector.broadcast %406 : vector<2x1x32xf32> to vector<2x6x32xf32>
    %408 = arith.mulf %407, %72 : vector<2x6x32xf32>
    "tpu.trace_start"() <{level = 10 : i32, message = "bnh,hk->bnk"}> : () -> ()
    %cst_131 = arith.constant dense<0.000000e+00> : vector<2x6x32xf32>
    %409 = tpu.matmul %408, %80, %cst_131 {dimension_numbers = #tpu.dot_dimension_numbers<[2], [0], [0, 1], [1], [0, 0, 0, 1, 1, 1], [], []>} : vector<2x6x32xf32>, vector<32x32xf32>, vector<2x6x32xf32> -> vector<2x6x32xf32>
    "tpu.trace_stop"() : () -> ()
    %410 = arith.addf %409, %59 : vector<2x6x32xf32>
    %cst_132 = arith.constant dense<0xFF800000> : vector<2x32xf32>
    %411 = vector.multi_reduction <maximumf>, %410, %cst_132 [1] : vector<2x6x32xf32> to vector<2x32xf32>
    %412 = vector.shape_cast %411 : vector<2x32xf32> to vector<2x1x32xf32>
    %413 = vector.broadcast %412 : vector<2x1x32xf32> to vector<2x6x32xf32>
    %414 = arith.subf %410, %413 : vector<2x6x32xf32>
    %415 = math.exp %414 : vector<2x6x32xf32>
    %cst_133 = arith.constant dense<0.000000e+00> : vector<2x32xf32>
    %416 = vector.multi_reduction <add>, %415, %cst_133 [1] : vector<2x6x32xf32> to vector<2x32xf32>
    %417 = vector.shape_cast %416 : vector<2x32xf32> to vector<2x1x32xf32>
    %418 = tpu.reciprocal %417 {approx = true} : vector<2x1x32xf32> -> vector<2x1x32xf32>
    %419 = vector.broadcast %418 : vector<2x1x32xf32> to vector<2x6x32xf32>
    %420 = arith.mulf %415, %419 : vector<2x6x32xf32>
    %421 = arith.mulf %420, %74 : vector<2x6x32xf32>
    %cst_134 = arith.constant dense<0.000000e+00> : vector<2x32xf32>
    %422 = vector.multi_reduction <add>, %421, %cst_134 [1] : vector<2x6x32xf32> to vector<2x32xf32>
    %cst_135 = arith.constant dense<0.000000e+00> : vector<2x32xf32>
    %423 = tpu.matmul %422, %79, %cst_135 {dimension_numbers = #tpu.dot_dimension_numbers<[1], [0], [0], [1], [0, 0, 1, 1], [], []>} : vector<2x32xf32>, vector<32x32xf32>, vector<2x32xf32> -> vector<2x32xf32>
    %c14 = arith.constant 14 : index
    %c0_136 = arith.constant 0 : index
    %424 = vector.load %arg24[%c14, %c0_136] : memref<16x32xf32, #tpu.memory_space<vmem>>, vector<2x32xf32>
    tpu.vector_store %arg24[%c14, %c0_136], %404 {strides = array<i32>} : memref<16x32xf32, #tpu.memory_space<vmem>>, vector<2x32xf32>,
    %c14_137 = arith.constant 14 : index
    %c0_138 = arith.constant 0 : index
    %425 = vector.load %arg25[%c14_137, %c0_138] : memref<16x32xf32, #tpu.memory_space<vmem>>, vector<2x32xf32>
    tpu.vector_store %arg25[%c14_137, %c0_138], %423 {strides = array<i32>} : memref<16x32xf32, #tpu.memory_space<vmem>>, vector<2x32xf32>,
    %c0_139 = arith.constant 0 : index
    %c0_140 = arith.constant 0 : index
    %426 = vector.load %arg24[%c0_139, %c0_140] : memref<16x32xf32, #tpu.memory_space<vmem>>, vector<16x32xf32>
    %c0_141 = arith.constant 0 : index
    %c0_142 = arith.constant 0 : index
    %427 = vector.load %arg25[%c0_141, %c0_142] : memref<16x32xf32, #tpu.memory_space<vmem>>, vector<16x32xf32>
    %c0_143 = arith.constant 0 : index
    %c0_144 = arith.constant 0 : index
    %428 = vector.load %arg14[%c0_143, %c0_144] : memref<1x32xf32, #tpu.memory_space<vmem>>, vector<1x32xf32>
    %429 = vector.broadcast %428 : vector<1x32xf32> to vector<16x32xf32>
    %430 = arith.mulf %426, %429 : vector<16x32xf32>
    %cst_145 = arith.constant dense<0.000000e+00> : vector<16xf32>
    %431 = vector.multi_reduction <add>, %430, %cst_145 [1] : vector<16x32xf32> to vector<16xf32>
    %432 = vector.shape_cast %431 : vector<16xf32> to vector<16x1xf32>
    %c0_146 = arith.constant 0 : index
    %c0_147 = arith.constant 0 : index
    %433 = vector.load %arg15[%c0_146, %c0_147] : memref<1x32xf32, #tpu.memory_space<vmem>>, vector<1x32xf32>
    %434 = vector.broadcast %433 : vector<1x32xf32> to vector<16x32xf32>
    %435 = arith.mulf %427, %434 : vector<16x32xf32>
    %cst_148 = arith.constant dense<0.000000e+00> : vector<16xf32>
    %436 = vector.multi_reduction <add>, %435, %cst_148 [1] : vector<16x32xf32> to vector<16xf32>
    %437 = vector.shape_cast %436 : vector<16xf32> to vector<16x1xf32>
    %438 = arith.addf %432, %437 : vector<16x1xf32>
    %c0_149 = arith.constant 0 : index
    %c0_150 = arith.constant 0 : index
    %439 = vector.load %arg16[%c0_149, %c0_150] : memref<1x1xf32, #tpu.memory_space<vmem>>, vector<1x1xf32>
    %440 = vector.broadcast %439 : vector<1x1xf32> to vector<16x1xf32>
    %441 = arith.addf %438, %440 : vector<16x1xf32>
    %442 = arith.negf %441 : vector<16x1xf32>
    %443 = math.exp %442 : vector<16x1xf32>
    %cst_151 = arith.constant 1.000000e+00 : f32
    %444 = vector.broadcast %cst_151 : f32 to vector<16x1xf32>
    %445 = arith.addf %444, %443 : vector<16x1xf32>
    %446 = arith.divf %444, %445 : vector<16x1xf32>
    %c0_152 = arith.constant 0 : index
    %c0_153 = arith.constant 0 : index
    %447 = vector.load %arg17[%c0_152, %c0_153] : memref<32x40xf32, #tpu.memory_space<vmem>>, vector<32x40xf32>
    %cst_154 = arith.constant dense<0.000000e+00> : vector<16x40xf32>
    %448 = tpu.matmul %426, %447, %cst_154 {dimension_numbers = #tpu.dot_dimension_numbers<[1], [0], [0], [1], [0, 0, 1, 1], [], []>} : vector<16x32xf32>, vector<32x40xf32>, vector<16x40xf32> -> vector<16x40xf32>
    %c0_155 = arith.constant 0 : index
    %c0_156 = arith.constant 0 : index
    %449 = vector.load %arg18[%c0_155, %c0_156] : memref<32x40xf32, #tpu.memory_space<vmem>>, vector<32x40xf32>
    %cst_157 = arith.constant dense<0.000000e+00> : vector<16x40xf32>
    %450 = tpu.matmul %427, %449, %cst_157 {dimension_numbers = #tpu.dot_dimension_numbers<[1], [0], [0], [1], [0, 0, 1, 1], [], []>} : vector<16x32xf32>, vector<32x40xf32>, vector<16x40xf32> -> vector<16x40xf32>
    %451 = arith.addf %448, %450 : vector<16x40xf32>
    %c0_158 = arith.constant 0 : index
    %c0_159 = arith.constant 0 : index
    %452 = vector.load %arg19[%c0_158, %c0_159] : memref<1x40xf32, #tpu.memory_space<vmem>>, vector<1x40xf32>
    %453 = vector.broadcast %452 : vector<1x40xf32> to vector<16x40xf32>
    %454 = arith.addf %451, %453 : vector<16x40xf32>
    %cst_160 = arith.constant dense<0xFF800000> : vector<16xf32>
    %455 = vector.multi_reduction <maximumf>, %454, %cst_160 [1] : vector<16x40xf32> to vector<16xf32>
    %456 = vector.shape_cast %455 : vector<16xf32> to vector<16x1xf32>
    %457 = vector.broadcast %456 : vector<16x1xf32> to vector<16x40xf32>
    %458 = arith.subf %454, %457 : vector<16x40xf32>
    %459 = math.exp %458 : vector<16x40xf32>
    %cst_161 = arith.constant dense<0.000000e+00> : vector<16xf32>
    %460 = vector.multi_reduction <add>, %459, %cst_161 [1] : vector<16x40xf32> to vector<16xf32>
    %461 = vector.shape_cast %460 : vector<16xf32> to vector<16x1xf32>
    %462 = tpu.reciprocal %461 {approx = true} : vector<16x1xf32> -> vector<16x1xf32>
    %463 = vector.broadcast %462 : vector<16x1xf32> to vector<16x40xf32>
    %464 = arith.mulf %459, %463 : vector<16x40xf32>
    %465 = vector.broadcast %446 : vector<16x1xf32> to vector<16x40xf32>
    %466 = arith.mulf %465, %464 : vector<16x40xf32>
    %c0_162 = arith.constant 0 : index
    %c0_163 = arith.constant 0 : index
    %467 = vector.load %arg20[%c0_162, %c0_163] : memref<32x32xf32, #tpu.memory_space<vmem>>, vector<32x32xf32>
    %cst_164 = arith.constant dense<0.000000e+00> : vector<16x32xf32>
    %468 = tpu.matmul %426, %467, %cst_164 {dimension_numbers = #tpu.dot_dimension_numbers<[1], [0], [0], [1], [0, 0, 1, 1], [], []>} : vector<16x32xf32>, vector<32x32xf32>, vector<16x32xf32> -> vector<16x32xf32>
    %c0_165 = arith.constant 0 : index
    %c0_166 = arith.constant 0 : index
    %469 = vector.load %arg21[%c0_165, %c0_166] : memref<32x32xf32, #tpu.memory_space<vmem>>, vector<32x32xf32>
    %cst_167 = arith.constant dense<0.000000e+00> : vector<16x32xf32>
    %470 = tpu.matmul %427, %469, %cst_167 {dimension_numbers = #tpu.dot_dimension_numbers<[1], [0], [0], [1], [0, 0, 1, 1], [], []>} : vector<16x32xf32>, vector<32x32xf32>, vector<16x32xf32> -> vector<16x32xf32>
    %471 = arith.addf %468, %470 : vector<16x32xf32>
    %cst_168 = arith.constant dense<0.000000e+00> : vector<16x12xf32>
    %472 = tpu.matmul %471, %39, %cst_168 {dimension_numbers = #tpu.dot_dimension_numbers<[1], [1], [0], [0], [0, 0, 1, 0], [], []>} : vector<16x32xf32>, vector<12x32xf32>, vector<16x12xf32> -> vector<16x12xf32>
    %473 = tpu.iota {dimensions = array<i32: 0>} : vector<16x6xi32>
    %c2_i32 = arith.constant 2 : i32
    %c0_i32_169 = arith.constant 0 : i32
    %474 = arith.cmpi eq, %c2_i32, %c0_i32_169 : i32
    %c1_i32_170 = arith.constant 1 : i32
    %475 = arith.select %474, %c1_i32_170, %c2_i32 : i32
    %476 = vector.broadcast %475 : i32 to vector<16x6xi32>
    %477 = arith.remsi %473, %476 : vector<16x6xi32>
    %c0_i32_171 = arith.constant 0 : i32
    %478 = vector.broadcast %c0_i32_171 : i32 to vector<16x6xi32>
    %479 = arith.cmpi ne, %477, %478 : vector<16x6xi32>
    %c0_i32_172 = arith.constant 0 : i32
    %480 = vector.broadcast %c0_i32_172 : i32 to vector<16x6xi32>
    %481 = arith.cmpi slt, %477, %480 : vector<16x6xi32>
    %c0_i32_173 = arith.constant 0 : i32
    %482 = arith.cmpi slt, %475, %c0_i32_173 : i32
    %483 = vector.broadcast %482 : i1 to vector<16x6xi1>
    %484 = vector.broadcast %483 : vector<16x6xi1> to vector<16x6xi1>
    %485 = arith.xori %481, %484 : vector<16x6xi1>
    %486 = arith.andi %485, %479 : vector<16x6xi1>
    %487 = vector.broadcast %475 : i32 to vector<16x6xi32>
    %488 = arith.addi %477, %487 : vector<16x6xi32>
    %489 = arith.select %486, %488, %477 : vector<16x6xi1>, vector<16x6xi32>
    %490 = vector.extract_strided_slice %472 {offsets = [0, 0], sizes = [16, 6], strides = [1, 1]} : vector<16x12xf32> to vector<16x6xf32>
    %c1_i32_174 = arith.constant 1 : i32
    %491 = vector.broadcast %c1_i32_174 : i32 to vector<16x6xi32>
    %492 = arith.cmpi eq, %489, %491 : vector<16x6xi32>
    %493 = vector.extract_strided_slice %472 {offsets = [0, 6], sizes = [16, 6], strides = [1, 1]} : vector<16x12xf32> to vector<16x6xf32>
    %494 = arith.select %492, %493, %490 : vector<16x6xi1>, vector<16x6xf32>
    %c0_i32_175 = arith.constant 0 : i32
    %495 = vector.broadcast %c0_i32_175 : i32 to vector<16x6xi32>
    %c0_i32_176 = arith.constant 0 : i32
    %496 = vector.broadcast %c0_i32_176 : i32 to vector<16x6xi32>
    %497 = arith.cmpi eq, %489, %496 : vector<16x6xi32>
    %498 = vector.broadcast %43 : i32 to vector<16x6xi32>
    %499 = arith.select %497, %498, %495 : vector<16x6xi1>, vector<16x6xi32>
    %c1_i32_177 = arith.constant 1 : i32
    %500 = vector.broadcast %c1_i32_177 : i32 to vector<16x6xi32>
    %501 = arith.cmpi eq, %489, %500 : vector<16x6xi32>
    %502 = vector.broadcast %44 : i32 to vector<16x6xi32>
    %503 = arith.select %501, %502, %499 : vector<16x6xi1>, vector<16x6xi32>
    %504 = tpu.iota {dimensions = array<i32: 1>} : vector<16x6xi32>
    %505 = arith.cmpi slt, %504, %503 : vector<16x6xi32>
    %cst_178 = arith.constant -1.000000e+09 : f32
    %506 = vector.broadcast %cst_178 : f32 to vector<16x6xf32>
    %507 = arith.select %505, %494, %506 : vector<16x6xi1>, vector<16x6xf32>
    %cst_179 = arith.constant dense<0xFF800000> : vector<16xf32>
    %508 = vector.multi_reduction <maximumf>, %507, %cst_179 [1] : vector<16x6xf32> to vector<16xf32>
    %509 = vector.shape_cast %508 : vector<16xf32> to vector<16x1xf32>
    %510 = vector.broadcast %509 : vector<16x1xf32> to vector<16x6xf32>
    %511 = arith.subf %507, %510 : vector<16x6xf32>
    %512 = math.exp %511 : vector<16x6xf32>
    %cst_180 = arith.constant 1.000000e+00 : f32
    %513 = vector.broadcast %cst_180 : f32 to vector<16x1xf32>
    %514 = arith.subf %513, %446 : vector<16x1xf32>
    %cst_181 = arith.constant dense<0.000000e+00> : vector<16xf32>
    %515 = vector.multi_reduction <add>, %512, %cst_181 [1] : vector<16x6xf32> to vector<16xf32>
    %516 = vector.shape_cast %515 : vector<16xf32> to vector<16x1xf32>
    %517 = tpu.reciprocal %516 {approx = true} : vector<16x1xf32> -> vector<16x1xf32>
    %518 = vector.broadcast %517 : vector<16x1xf32> to vector<16x6xf32>
    %519 = arith.mulf %512, %518 : vector<16x6xf32>
    %520 = vector.broadcast %514 : vector<16x1xf32> to vector<16x6xf32>
    %521 = arith.mulf %520, %519 : vector<16x6xf32>
    %cst_182 = arith.constant 9.99999997E-7 : f32
    %522 = vector.broadcast %cst_182 : f32 to vector<16x40xf32>
    %523 = arith.addf %466, %522 : vector<16x40xf32>
    %524 = math.log %523 : vector<16x40xf32>
    %c0_183 = arith.constant 0 : index
    %c0_184 = arith.constant 0 : index
    %525 = vector.load %arg22[%c0_183, %c0_184] : memref<16x46xf32, #tpu.memory_space<vmem>>, vector<16x40xf32>
    tpu.vector_store %arg22[%c0_183, %c0_184], %524 {strides = array<i32>} : memref<16x46xf32, #tpu.memory_space<vmem>>, vector<16x40xf32>,
    %cst_185 = arith.constant 9.99999997E-7 : f32
    %526 = vector.broadcast %cst_185 : f32 to vector<16x6xf32>
    %527 = arith.addf %521, %526 : vector<16x6xf32>
    %528 = math.log %527 : vector<16x6xf32>
    %c0_186 = arith.constant 0 : index
    %c40 = arith.constant 40 : index
    %529 = vector.load %arg22[%c0_186, %c40] : memref<16x46xf32, #tpu.memory_space<vmem>>, vector<16x6xf32>
    tpu.vector_store %arg22[%c0_186, %c40], %528 {strides = array<i32>} : memref<16x46xf32, #tpu.memory_space<vmem>>, vector<16x6xf32>,
    %c0_187 = arith.constant 0 : index
    %c0_188 = arith.constant 0 : index
    %530 = vector.load %arg23[%c0_187, %c0_188] : memref<16x6xf32, #tpu.memory_space<vmem>>, vector<16x6xf32>
    tpu.vector_store %arg23[%c0_187, %c0_188], %521 {strides = array<i32>} : memref<16x6xf32, #tpu.memory_space<vmem>>, vector<16x6xf32>,
    return
  }
}

</mosaic_0001>

<bundles_post_ra>
// kernel: model_forward.1
= control target key start
LH: loop header
LB: loop body
LE: loop exit
PB: predicated region body
PF: predicated region fallthrough
CT: control target
= control target key end

     0   :  { %s6026_s0 = inlined_call_operand.vmem [shape: s32[16,1], index: 0, kind: input, shape index: {}]   ;;  %s6027_s1 = inlined_call_operand.vmem [shape: s32[12,4], index: 1, kind: input, shape index: {}]   ;;  %s6028_s2 = inlined_call_operand.vmem [shape: s32[2], index: 2, kind: input, shape index: {}]   ;;  %s6029_s3 = inlined_call_operand.vmem [shape: f32[50,32], index: 3, kind: input, shape index: {}]   ;;  %s6030_s4 = inlined_call_operand.vmem [shape: f32[32,32], index: 4, kind: input, shape index: {}]   ;;  %s6031_s5 = inlined_call_operand.vmem [shape: f32[32,128], index: 5, kind: input, shape index: {}]   ;;  %s6032_s6 = inlined_call_operand.vmem [shape: f32[32,128], index: 6, kind: input, shape index: {}]   ;;  %s6033_s7 = inlined_call_operand.vmem [shape: f32[32,128], index: 7, kind: input, shape index: {}]   ;;  %s6034_s8 = inlined_call_operand.vmem [shape: f32[1,128], index: 8, kind: input, shape index: {}]   ;;  %s6035_s9 = inlined_call_operand.vmem [shape: f32[32,32], index: 9, kind: input, shape index: {}]   ;;  %s6036_s10 = inlined_call_operand.hbm [shape: f32[32,32], index: 10, kind: input, shape index: {}]   ;;  %s6037_s11 = inlined_call_operand.hbm [shape: f32[32,32], index: 11, kind: input, shape index: {}]   ;;  %s6038_s12 = inlined_call_operand.hbm [shape: f32[32,32], index: 12, kind: input, shape index: {}]   ;;  %s6039_s13 = inlined_call_operand.hbm [shape: f32[32,32], index: 13, kind: input, shape index: {}]   ;;  %s6040_s14 = inlined_call_operand.vmem [shape: f32[1,32], index: 14, kind: input, shape index: {}]   ;;  %s6041_s15 = inlined_call_operand.vmem [shape: f32[1,32], index: 15, kind: input, shape index: {}]   ;;  %s6042_s16 = inlined_call_operand.<no memory space> [shape: f32[1,1], index: 16, kind: input, shape index: {}]   ;;  %s6043_s17 = inlined_call_operand.hbm [shape: f32[32,40], index: 17, kind: input, shape index: {}]   ;;  %s6044_s18 = inlined_call_operand.hbm [shape: f32[32,40], index: 18, kind: input, shape index: {}]   ;;  %s6045_s19 = inlined_call_operand.vmem [shape: f32[1,40], index: 19, kind: input, shape index: {}]   ;;  %s6046_s20 = inlined_call_operand.hbm [shape: f32[32,32], index: 20, kind: input, shape index: {}]   ;;  %s6047_s21 = inlined_call_operand.hbm [shape: f32[32,32], index: 21, kind: input, shape index: {}]   ;;  %s6048_s22 = inlined_call_operand.vmem [shape: f32[16,46], index: 22, kind: output, shape index: {0}]   ;;  %s6049_s23 = inlined_call_operand.vmem [shape: f32[16,6], index: 23, kind: output, shape index: {1}]  }
   0x1   :  { %6073 = sst [smem:[#allocation36_spill]] %s6026_s0  ;;  %v29_v0 = vstv %s6042_s16 }
   0x2   :  { %6074 = sst [smem:[#allocation37_spill]] %s6027_s1  ;;  %30 = vst [vmem:[#allocation4] sm:$0x1] %v29_v0 }
   0x3   :  { %6075 = sst [smem:[#allocation38_spill]] %s6028_s2 }
   0x4   :  { %6076 = sst [smem:[#allocation39_spill]] %s6029_s3 }
   0x5   :  { %6077 = sst [smem:[#allocation40_spill]] %s6030_s4 }
   0x6   :  { %6078 = sst [smem:[#allocation41_spill]] %s6031_s5 }
   0x7   :  { %6079 = sst [smem:[#allocation42_spill]] %s6032_s6 }
   0x8   :  { %6080 = sst [smem:[#allocation43_spill]] %s6033_s7 }
   0x9   :  { %31 = vsyncpa [#allocation7], 0 }
   0xa   :  { %32 = vsyncpa [#allocation6], 0 }
   0xb   :  { %33 = vsyncpa [#allocation10], 0 }
   0xc   :  { %34 = vsyncpa [#allocation13], 0 }
   0xd   :  { %35 = vsyncpa [#allocation16], 0 }
   0xe   :  { %36 = vsyncpa [#allocation19], 0  ;;  %s81_s5 = sshll.u32 %s6037_s11, 4  ;;  %s4779_s1 = smov [#allocation9]   ;;  %s82_s5 = int_to_ptr.hbm [resolvable:$true] %s81_s5 }
   0xf   :  { %s83_s26 = sshll.u32 %s4779_s1, 4  ;;  %s107_s27 = sshll.u32 %s6039_s13, 4  ;;  %s84_s26 = int_to_ptr.vmem [resolvable:$true] %s83_s26  ;;  %s108_s27 = int_to_ptr.hbm [resolvable:$true] %s107_s27 }
  0x10   :  { %s4780_s16 = smov 128   ;;  %s4781_s7 = smov 8  }
  0x11   :  { %89 = dma.hbm_to_vmem [thread:$0]  %s82_s5, 512, %s84_s26, [#allocation10], %s4780_s16, %s4780_s16, %s4781_s7  }
  0x12   :  { %s4782_s28 = smov [#allocation12]   ;;  %s139_s11 = sshll.u32 %s6044_s18, 4  ;;  %s140_s11 = int_to_ptr.hbm [resolvable:$true] %s139_s11 }
  0x13   :  { %s109_s29 = sshll.u32 %s4782_s28, 4  ;;  %s6081_s30 = sld [smem:[#allocation38_spill]]  ;;  %s110_s29 = int_to_ptr.vmem [resolvable:$true] %s109_s29 }
  0x14   :  { %115 = dma.hbm_to_vmem [thread:$0]  %s108_s27, 512, %s110_s29, [#allocation13], %s4780_s16, %s4780_s16, %s4781_s7  }
  0x15   :  { %s4783_s25 = smov [#allocation15]   ;;  %s4784_s5 = smov [#allocation5]  }
  0x16   :  { %s141_s1 = sshll.u32 %s4783_s25, 4  ;;  %s68_s2 = sshll.u32 %s6036_s10, 4  ;;  %s142_s1 = int_to_ptr.vmem [resolvable:$true] %s141_s1  ;;  %s69_s2 = int_to_ptr.hbm [resolvable:$true] %s68_s2 }
  0x17   :  { %147 = dma.hbm_to_vmem [thread:$0]  %s140_s11, 512, %s142_s1, [#allocation16], %s4780_s16, %s4780_s16, %s4781_s7  }
  0x18   :  { %s4785_s6 = smov [#allocation8]   ;;  %s94_s3 = sshll.u32 %s6038_s12, 4  ;;  %s95_s3 = int_to_ptr.hbm [resolvable:$true] %s94_s3 }
  0x19   :  { %s46_s24 = sshll.u32 %s6081_s30, 4  ;;  %s70_s27 = sshll.u32 %s4785_s6, 4  ;;  %s47_s24 = int_to_ptr.vmem [resolvable:$true] %s46_s24  ;;  %s71_s27 = int_to_ptr.vmem [resolvable:$true] %s70_s27 }
  0x1a   :  { %49 = dma.vmem_to_smem %s47_s24, 16, %s4784_s5, [#allocation7]  }
  0x1b   :  { %76 = dma.hbm_to_vmem [thread:$0]  %s69_s2, 512, %s71_s27, [#allocation6], %s4780_s16, %s4780_s16, %s4781_s7  }
  0x1c   :  { %s4786_s0 = smov [#allocation11]   ;;  %s126_s30 = sshll.u32 %s6043_s17, 4  ;;  %s127_s30 = int_to_ptr.hbm [resolvable:$true] %s126_s30 }
  0x1d   :  { %s96_s11 = sshll.u32 %s4786_s0, 4  ;;  %s154_s12 = sshll.u32 %s6046_s20, 4  ;;  %s97_s11 = int_to_ptr.vmem [resolvable:$true] %s96_s11  ;;  %s155_s12 = int_to_ptr.hbm [resolvable:$true] %s154_s12 }
  0x1e   :  { %102 = dma.hbm_to_vmem [thread:$0]  %s95_s3, 512, %s97_s11, [#allocation10], %s4780_s16, %s4780_s16, %s4781_s7  }
  0x1f   :  { %s4787_s25 = smov [#allocation14]   ;;  %s4788_s5 = smov [#allocation17]  }
  0x20   :  { %s128_s1 = sshll.u32 %s4787_s25, 4  ;;  %s156_s17 = sshll.u32 %s4788_s5, 4  ;;  %s129_s1 = int_to_ptr.vmem [resolvable:$true] %s128_s1  ;;  %s157_s17 = int_to_ptr.vmem [resolvable:$true] %s156_s17 }
  0x21   :  { %134 = dma.hbm_to_vmem [thread:$0]  %s127_s30, 512, %s129_s1, [#allocation13], %s4780_s16, %s4780_s16, %s4781_s7  }
  0x22   :  { %s167_s2 = sshll.u32 %s6047_s21, 4  ;;  %s4789_s20 = smov [#allocation18]   ;;  %s168_s2 = int_to_ptr.hbm [resolvable:$true] %s167_s2 }
  0x23   :  { %162 = dma.hbm_to_vmem [thread:$0]  %s155_s12, 512, %s157_s17, [#allocation16], %s4780_s16, %s4780_s16, %s4781_s7  }
  0x24   :  { %s169_s6 = sshll.u32 %s4789_s20, 4  ;;  %s170_s6 = int_to_ptr.vmem [resolvable:$true] %s169_s6 }
  0x25   :  { %175 = dma.hbm_to_vmem [thread:$0]  %s168_s2, 512, %s170_s6, [#allocation19], %s4780_s16, %s4780_s16, %s4781_s7  }
  0x26   :  { %4767 = dma.done.wait [#allocation7], 16  }
  0x27   :  { %4768 = vsyncadd [#allocation7], 4294967280 }
  0x28   :  { %4769 = dma.done.wait [#allocation6], 512  }
  0x29   :  { %4770 = vsyncadd [#allocation6], 4294966784 }
  0x2a   :  { %4771 = dma.done.wait [#allocation10], 1024  }
  0x2b   :  { %4772 = vsyncadd [#allocation10], 4294966272 }
  0x2c   :  { %4773 = dma.done.wait [#allocation13], 1024  }
  0x2d   :  { %4774 = vsyncadd [#allocation13], 4294966272 }
  0x2e   :  { %4775 = dma.done.wait [#allocation16], 1024  }
  0x2f   :  { %4776 = vsyncadd [#allocation16], 4294966272 }
  0x30   :  { %4777 = dma.done.wait [#allocation19], 512  }
  0x31   :  { %4778 = vsyncadd [#allocation19], 4294966784 }
  0x32   :  { %212 = sfence }
  0x33   :  { %s6082_s28 = sld [smem:[#allocation36_spill]]  ;;  %vm243_vm0 = vcmask 1041408   ;;  %v4790_v3 = vmov 0   ;;  %v4791_v10 = vmov 1   ;;  %v4792_v11 = vmov 2   ;;  %v572_v57 = vld [vmem:[#allocation8 + $0x18] sm:$0xff] }
  0x34   :  { %s6083_s16 = sld [smem:[#allocation37_spill]]  ;;  %4280 = vset.pattern.permute.xlu0 %v4790_v3  ;;  %4281 = vset.pattern.permute.xlu1 %v4790_v3  ;;  %v4793_v15 = vmov 3   ;;  %v222_v16 = vlaneseq  ;;  %vm236_vm1 = vcmask 408576   ;;  %v4794_v19 = vmov 0.0   ;;  %v609_v58 = vld [vmem:[#allocation9 + $0x18] sm:$0xff]  ;;  %v571_v59 = vld [vmem:[#allocation8 + $0x10] sm:$0xff] }
  0x35   :  { %s6084_s11 = sld [smem:[#allocation39_spill]]  ;;  %4283 = vset.pattern.permute.xlu2 %v4790_v3  ;;  %vm274_vm10 = vcmask 261120   ;;  %v608_v60 = vld [vmem:[#allocation9 + $0x10] sm:$0xff]  ;;  %v570_v61 = vld [vmem:[#allocation8 + $0x8] sm:$0xff]  ;;  %vm448_vm15 = vcmask 1045504   ;;  %s4799_s25 = smov 32  }
  0x36   :  { %v5034_v17 = vand.u32 127, %v222_v16  ;;  %s6086_s29 = sld [smem:[#allocation42_spill]]  ;;  %v607_v62 = vld [vmem:[#allocation9 + $0x8] sm:$0xff]  ;;  %s4800_s17 = smov 64  }
  0x37   :  { %s6087_s10 = sld [smem:[#allocation40_spill]]  ;;  %s4803_s13 = smov 40  }
  0x38   :  { %6085 = vst [vmem:[#allocation26_spill] sm:$0xff] %v5034_v17  ;;  %s436_s18 = sld [smem:[#allocation5]] }
  0x39   :  { %v220_v1 = vld [vmem:[%s6082_s28] sm:$0xff]  ;;  %v221_v8 = vld [vmem:[%s6082_s28 + $0x8] sm:$0xff]  ;;  %s4174_s26 = sld [smem:[#allocation5 + $0x1]] }
  0x3a   :  { %v304_v2 = vld [vmem:[%s6083_s16] sm:$0xff]  ;;  %225 = vperm.xlu0 %4280, %v220_v1   ;;  %v305_v13 = vld [vmem:[%s6083_s16 + $0x8] sm:$0xf]  ;;  %s6093_s6 = sld [smem:[#allocation43_spill]] }
  0x3b   :  { %v4987_v4 = vld [vmem:[%s6084_s11 + $0x30] sm:$0x3]  ;;  %307 = vperm.xlu1 %4281, %v304_v2   ;;  %v4992_v5 = vld [vmem:[%s6084_s11 + $0x28] sm:$0xff]  ;;  %v4999_v6 = vld [vmem:[%s6084_s11 + $0x20] sm:$0xff]  ;;  %310 = vperm.xlu2 %4283, %v305_v13   ;;  %s6094_s28 = sld [smem:[#allocation41_spill]] }
  0x3c   :  { %4156 = vmatpush.msk.msra.mxu0 %vm243_vm0, %v4987_v4  ;;  %4248 = vmatpush.msk.msra.mxu2 %vm243_vm0, %v4987_v4  ;;  %v5007_v7 = vld [vmem:[%s6084_s11 + $0x18] sm:$0xff]  ;;  %v5017_v9 = vld [vmem:[%s6084_s11 + $0x10] sm:$0xff]  ;;  %v214_v12 = vld [vmem:[%s6084_s11 + $0x8] sm:$0xff] }
  0x3d   :  { %v213_v14 = vld [vmem:[%s6084_s11] sm:$0xff]  ;;  %v273_v23 = vld [vmem:[%s6086_s29 + $0x18] sm:$0xff]  ;;  %v272_v24 = vld [vmem:[%s6086_s29 + $0x10] sm:$0xff] }
  0x3e   :  { %257 = vmatpush.msra.mxu0 %v4992_v5  ;;  %4249 = vmatpush.msra.mxu2 %v4992_v5  ;;  %v271_v26 = vld [vmem:[%s6086_s29 + $0x8] sm:$0xff]  ;;  %v270_v39 = vld [vmem:[%s6086_s29] sm:$0xff]  ;;  %v396_v53 = vld [vmem:[%s6087_s10 + $0x18] sm:$0xff] }
  0x3f   :  { %293 = vmatpush.msra.mxu1 %v273_v23  ;;  %v395_v54 = vld [vmem:[%s6087_s10 + $0x10] sm:$0xff]  ;;  %415 = vmatpush.msra.mxu3 %v396_v53  ;;  %v394_v55 = vld [vmem:[%s6087_s10 + $0x8] sm:$0xff]  ;;  %v393_v56 = vld [vmem:[%s6087_s10] sm:$0xff] }
  0x40   :  { %258 = vmatpush.msra.mxu0 %v4999_v6  ;;  %4250 = vmatpush.msra.mxu2 %v4999_v6 }
  0x41   :  { %294 = vmatpush.msra.mxu1 %v272_v24  ;;  %416 = vmatpush.msra.mxu3 %v395_v54 }
  0x42   :  { %259 = vmatpush.msra.mxu0 %v5007_v7  ;;  %228 = vperm.xlu0 %4280, %v221_v8   ;;  %v606_v8 = vld [vmem:[#allocation9] sm:$0xff] }
  0x43   :  { %4282 = vset.pattern.permute.xlu1 %v4791_v10  ;;  %4251 = vmatpush.msra.mxu2 %v5007_v7 }
  0x44   :  { %321 = vperm.xlu1 %4282, %v304_v2   ;;  %260 = vmatpush.msra.mxu0 %v5017_v9 }
  0x45   :  { %4252 = vmatpush.msra.mxu2 %v5017_v9  ;;  %4284 = vset.pattern.permute.xlu2 %v4791_v10 }
  0x46   :  { %261 = vmatpush.msra.mxu0 %v214_v12  ;;  %324 = vperm.xlu2 %4284, %v305_v13  }
  0x47   :  { %4253 = vmatpush.msra.mxu2 %v214_v12  ;;  %295 = vmatpush.msra.mxu1 %v271_v26 }
  0x48   :  { %262 = vmatpush.msra.mxu0 %v213_v14  ;;  %417 = vmatpush.msra.mxu3 %v394_v55 }
  0x49   :  { %4254 = vmatpush.msra.mxu2 %v213_v14  ;;  %296 = vmatpush.msra.mxu1 %v270_v39  ;;  %v5157_v39 = vld [vmem:[%s6094_s28 + $0x18] sm:$0xff] }
  0x4a   :  { %4285 = vset.pattern.permute.xlu0 %v4792_v11  ;;  %418 = vmatpush.msra.mxu3 %v393_v56 }
  0x4b   :  { %335 = vperm.xlu0 %4285, %v304_v2   ;;  %4169 = vmatpush.msk.msrb.mxu1 %vm243_vm0, %v4987_v4  ;;  %v5107_v4 = vstv %s436_s18  ;;  %vm524_vm0 = vcmask 259072  }
  0x4c   :  { %4286 = vset.pattern.permute.xlu1 %v4792_v11  ;;  %622 = vmatpush.msrb.mxu3 %v609_v58  ;;  %6091 = vst [vmem:[#allocation30_spill] sm:$0xff] %v5107_v4 }
  0x4d   :  { %338 = vperm.xlu1 %4286, %v305_v13   ;;  %380 = vmatpush.msrb.mxu1 %v4992_v5  ;;  %v5111_v5 = vstv %s4174_s26 }
  0x4e   :  { %4287 = vset.pattern.permute.xlu2 %v4793_v15  ;;  %623 = vmatpush.msrb.mxu3 %v608_v60  ;;  %6092 = vst [vmem:[#allocation31_spill] sm:$0xff] %v5111_v5 }
  0x4f   :  { %349 = vperm.xlu2 %4287, %v304_v2   ;;  %381 = vmatpush.msrb.mxu1 %v4999_v6 }
  0x50   :  { %624 = vmatpush.msrb.mxu3 %v607_v62  ;;  %705 = vmatpush.msrb.mxu2 %v5157_v39 }
  0x51   :  { %382 = vmatpush.msrb.mxu1 %v5007_v7  ;;  %v569_v7 = vld [vmem:[#allocation8] sm:$0xff] }
  0x52   :  { %625 = vmatpush.msrb.mxu3 %v606_v8 }
  0x53   :  { %4289 = vset.pattern.permute.xlu0 %v4790_v3  ;;  %383 = vmatpush.msrb.mxu1 %v5017_v9 }
  0x55   :  { %4288 = vset.pattern.permute.xlu1 %v4793_v15  ;;  %384 = vmatpush.msrb.mxu1 %v214_v12 }
  0x56   :  { %352 = vperm.xlu1 %4288, %v305_v13  }
  0x57   :  { %4291 = vset.pattern.permute.xlu2 %v4790_v3  ;;  %385 = vmatpush.msrb.mxu1 %v213_v14 }
  0x5e   :  { %4290 = vset.pattern.permute.xlu1 %v4790_v3  ;;  %v5105_v3 = vshrl.u32 %v222_v16, 7  ;;  %v4795_v16 = vmov 269488144  }
  0x60   :  { %6090 = vst [vmem:[#allocation29_spill] sm:$0xff] %v5105_v3  ;;  %vm442_vm13 = vcmp.lt.s32.totalorder %v5105_v3, %v5107_v4  ;;  %vm443_vm14 = vcmp.lt.s32.totalorder %v5105_v3, %v5111_v5 }
  0x61   :  { %v5117_v6 = vsel %vm442_vm13, 1.0, %v4794_v19  ;;  %v5125_v9 = vsel %vm443_vm14, 1.0, %v4794_v19 }
  0x62   :  { %v449_v10 = vsel %vm448_vm15, %v5117_v6, 0.0  ;;  %v456_v11 = vsel %vm448_vm15, %v5125_v9, 0.0  ;;  %vm1080_vm15 = vcmask 254976  }
  0x63   :  { %v450_v12 = vrot.slane %v449_v10, 4  ;;  %v457_v13 = vrot.slane %v456_v11, 4 }
  0x65   :  { %v451_v14 = vadd.f32 %v450_v12, %v449_v10  ;;  %v458_v15 = vadd.f32 %v457_v13, %v456_v11 }
  0x67   :  { %v452_v24 = vrot.slane %v451_v14, 2 }
  0x95   :  { %v311_v27 = vpop.permute.xlu2 %310 }
  0x96   :  { %vm313_vm4 = vcmp.eq.s32.totalorder %v311_v27, %v5034_v17  ;;  %v4798_v27 = vmov -1e+09  }
  0x97   :  { %v4162_v31 = vsel %vm313_vm4, 1.0, %v4794_v19 }
  0xa0   :  { %v325_v29 = vpop.permute.xlu2 %324 }
  0xa1   :  { %vm327_vm5 = vcmp.eq.s32.totalorder %v325_v29, %v5034_v17 }
  0xa2   :  { %v4164_v32 = vsel %vm327_vm5, 1.0, %v4794_v19 }
  0xa3   :  { %v333_v33 = vadd.f32 %v4164_v32, %v4162_v31  ;;  %v445_v31 = vsel %vm443_vm14, 0.0, %v4798_v27  ;;  %v453_v32 = vadd.f32 %v452_v24, %v451_v14 }
  0xa9   :  { %v350_v45 = vpop.permute.xlu2 %349 }
  0xaa   :  { %vm354_vm12 = vcmp.eq.s32.totalorder %v350_v45, %v5034_v17  ;;  %v5180_v45 = vld [vmem:[%s6094_s28 + $0x8] sm:$0xff] }
  0xab   :  { %v4167_v49 = vsel %vm354_vm12, 1.0, %v4794_v19 }
  0xac   :  { %v226_v18 = vpop.permute.xlu0 %225 }
  0xad   :  { %vm230_vm2 = vcmp.eq.s32.totalorder %v226_v18, %v5034_v17  ;;  %v308_v25 = vpop.permute.xlu1 %307  ;;  %v468_v18 = vunpack.c.l.s4 %v4795_v16 }
  0xae   :  { %v4154_v20 = vsel %vm230_vm2, 1.0, %v4794_v19  ;;  %vm312_vm8 = vcmp.eq.s32.totalorder %v308_v25, %v5034_v17  ;;  %v459_v25 = vrot.slane %v458_v15, 2 }
  0xaf   :  { %4157 = vmatmul.msk.f32.vlgmr.msra.gmra.mxu0 %vm236_vm1, %v4154_v20  ;;  %v4161_v42 = vsel %vm312_vm8, 1.0, %v4794_v19  ;;  %v4796_v20 = vmov 842150450   ;;  %v469_v26 = vunpack.c.0.s8 %v468_v18 }
  0xb4   :  { %v229_v21 = vpop.permute.xlu0 %228 }
  0xb5   :  { %vm231_vm3 = vcmp.eq.s32.totalorder %v229_v21, %v5034_v17  ;;  %v472_v21 = vunpack.c.l.s4 %v4796_v20 }
  0xb6   :  { %v4155_v22 = vsel %vm231_vm3, 1.0, %v4794_v19  ;;  %v322_v28 = vpop.permute.xlu1 %321 }
  0xb7   :  { %4158 = vmatmul.msk.f32.gmra.mxu0 %vm236_vm1, %v4155_v22  ;;  %vm326_vm9 = vcmp.eq.s32.totalorder %v322_v28, %v5034_v17  ;;  %v4797_v22 = vmov 1414812756   ;;  %v444_v28 = vsel %vm442_vm13, 0.0, %v4798_v27  ;;  %v5132_v29 = vunpack.c.0.s8 %v472_v21 }
  0xb8   :  { %v4163_v43 = vsel %vm326_vm9, 1.0, %v4794_v19  ;;  %v476_v23 = vunpack.c.l.s4 %v4797_v22  ;;  %vm666_vm9 = vcmask 1041409  }
  0xb9   :  { %v332_v46 = vadd.f32 %v4163_v43, %v4161_v42  ;;  %v5175_v43 = vld [vmem:[%s6094_s28 + $0x10] sm:$0xff]  ;;  %v474_v54 = vperm.slane %v5117_v6, %v5132_v29 }
  0xba   :  { %706 = vmatpush.msrb.mxu2 %v5175_v43 }
  0xbc   :  { %707 = vmatpush.msrb.mxu2 %v5180_v45 }
  0xbd   :  { %v336_v41 = vpop.permute.xlu0 %335 }
  0xbe   :  { %vm340_vm11 = vcmp.eq.s32.totalorder %v336_v41, %v5034_v17  ;;  %v5165_v41 = vperm.slane %v445_v31, %v5132_v29 }
  0xbf   :  { %v339_v30 = vpop.permute.xlu1 %338  ;;  %v4165_v47 = vsel %vm340_vm11, 1.0, %v4794_v19 }
  0xc0   :  { %vm341_vm6 = vcmp.eq.s32.totalorder %v339_v30, %v5034_v17  ;;  %v346_v48 = vadd.f32 %v4165_v47, %v332_v46  ;;  %v5134_v30 = vunpack.c.0.s8 %v476_v23  ;;  %6095 = vst [vmem:[#allocation32_spill] sm:$0xff] %v5165_v41  ;;  %v5185_v46 = vld [vmem:[%s6093_s6 + $0x8] sm:$0xff] }
  0xc1   :  { %v4166_v34 = vsel %vm341_vm6, 1.0, %v4794_v19 }
  0xc2   :  { %v347_v35 = vadd.f32 %v4166_v34, %v333_v33  ;;  %v360_v51 = vadd.f32 %v4167_v49, %v346_v48  ;;  %v460_v33 = vadd.f32 %v459_v25, %v458_v15  ;;  %v5139_v34 = vperm.slane %v444_v28, %v469_v26  ;;  %v5193_v48 = vld [vmem:[%s6094_s28] sm:$0xff] }
  0xc3   :  { %v5168_v42 = vperm.slane %v445_v31, %v5134_v30  ;;  %v5198_v49 = vld [vmem:[%s6093_s6] sm:$0xff]  ;;  %708 = vmatpush.msrb.mxu2 %v5193_v48  ;;  %v478_v55 = vperm.slane %v5117_v6, %v5134_v30  ;;  %v490_v10 = vperm.slane %v5125_v9, %v5134_v30 }
  0xc4   :  { %v362_v52 = vmul.f32 0.25, %v360_v51  ;;  %v461_v47 = vrot.slane %v460_v33, 1 }
  0xc5   :  { %6096 = vst [vmem:[#allocation33_spill] sm:$0xff] %v5168_v42 }
  0xc6   :  { %v462_v51 = vadd.f32 %v461_v47, %v460_v33 }
  0xc8   :  { %v353_v36 = vpop.permute.xlu1 %352  ;;  %v5215_v56 = vmax.f32 %v462_v51, 1.0 }
  0xc9   :  { %vm355_vm7 = vcmp.eq.s32.totalorder %v353_v36, %v5034_v17  ;;  %v5145_v36 = vperm.slane %v444_v28, %v5134_v30 }
  0xca   :  { %v4168_v37 = vsel %vm355_vm7, 1.0, %v4794_v19  ;;  %vm559_vm3 = vweird.f32 %v5215_v56  ;;  %v565_v47 = vand.u32 2147483648, %v5215_v56 }
  0xcb   :  { %v361_v38 = vadd.f32 %v4168_v37, %v347_v35  ;;  %v5142_v35 = vperm.slane %v444_v28, %v5132_v29  ;;  %v5147_v37 = vperm.slane %v445_v31, %v469_v26 }
  0xcd   :  { %v363_v40 = vmul.f32 0.25, %v361_v38  ;;  %v5152_v38 = vld [vmem:[%s6093_s6 + $0x18] sm:$0xff] }
  0xce   :  { %682 = vmatpush.msrb.mxu0 %v5152_v38 }
  0xcf   :  { %4171 = vmatmul.msk.f32.vlgmr.msra.gmra.mxu2 %vm236_vm1, %v363_v40  ;;  %v5162_v40 = vld [vmem:[%s6093_s6 + $0x10] sm:$0xff] }
  0xd0   :  { %683 = vmatpush.msrb.mxu0 %v5162_v40 }
  0xd2   :  { %684 = vmatpush.msrb.mxu0 %v5185_v46 }
  0xd4   :  { %685 = vmatpush.msrb.mxu0 %v5198_v49 }
  0xd7   :  { %709 = vmatmul.f32.vlgmr.msrb.gmra.mxu2 %v4794_v19 }
 0x12c   :  { %v264_v44 = vpop.f32.mrf.mxu0 }
 0x12d   :  { %4159 = vmatmul.msk.f32.vlgmr.msra.gmra.mxu1 %vm274_vm10, %v264_v44  ;;  %v454_v44 = vrot.slane %v453_v32, 1 }
 0x12e   :  { %589 = vmatpush.msra.mxu1 %v572_v57  ;;  %v482_v57 = vperm.slane %v5125_v9, %v469_v26 }
 0x130   :  { %590 = vmatpush.msra.mxu1 %v571_v59 }
 0x132   :  { %591 = vmatpush.msra.mxu1 %v570_v61 }
 0x134   :  { %v267_v50 = vpop.f32.mrf.mxu0  ;;  %592 = vmatpush.msra.mxu1 %v569_v7 }
 0x135   :  { %4160 = vmatmul.msk.f32.gmra.mxu1 %vm274_vm10, %v267_v50  ;;  %v455_v50 = vadd.f32 %v454_v44, %v453_v32 }
 0x137   :  { %v5209_v53 = vmax.f32 %v455_v50, 1.0 }
 0x139   :  { %4297 = vrcp.f32 %v5209_v53  ;;  %v548_v33 = vand.u32 2147483647, %v5209_v53  ;;  %v550_v44 = vand.u32 2147483648, %v5209_v53 }
 0x13a   :  { %4299 = vrcp.f32 %v5215_v56 }
 0x13b   :  { %vm549_vm7 = vcmp.eq.f32.partialorder %v548_v33, 8.507059e+37 }
 0x13d   :  { %4170 = vmatmul.msk.f32.vlgmr.msrb.gmra.mxu1 %vm236_vm1, %v362_v52  ;;  %v470_v52 = vperm.slane %v5117_v6, %v469_v26  ;;  %v486_v6 = vperm.slane %v5125_v9, %v5132_v29  ;;  %vm544_vm1 = vweird.f32 %v5209_v53 }
 0x13f   :  { %v4298_v11 = vpop.eup %4297 }
 0x140   :  { %v4300_v13 = vpop.eup %4299  ;;  %v540_v18 = vmul.f32 %v4298_v11, %v5209_v53  ;;  %vm545_vm2 = vweird.f32 %v4298_v11 }
 0x141   :  { %v555_v20 = vmul.f32 %v4300_v13, %v5215_v56  ;;  %vm560_vm4 = vweird.f32 %v4300_v13  ;;  %vm5237_vm5 = vmor %vm544_vm1, %vm545_vm2 }
 0x142   :  { %v541_v23 = vsub.f32 1.0, %v540_v18  ;;  %vm561_vm6 = vmor %vm559_vm3, %vm560_vm4 }
 0x143   :  { %v556_v24 = vsub.f32 1.0, %v555_v20 }
 0x144   :  { %v542_v28 = vmul.f32 %v4298_v11, %v541_v23  ;;  %v5272_v23 = vld [vmem:[%s6034_s8] ss:$0 sm:$0xff] }
 0x145   :  { %v557_v29 = vmul.f32 %v4300_v13, %v556_v24 }
 0x146   :  { %v543_v51 = vadd.f32 %v4298_v11, %v542_v28 }
 0x148   :  { %v547_v53 = vsel %vm5237_vm5, %v4298_v11, %v543_v51 }
 0x152   :  { %v5100_v2 = vpop.f32.mrf.mxu2 }
 0x153   :  { %6089 = vst [vmem:[#allocation28_spill] sm:$0xff] %v5100_v2 }
 0x1aa   :  { %v5092_v63 = vpop.f32.mrf.mxu1 }
 0x1b2   :  { %v5094_v0 = vpop.f32.mrf.mxu1 }
 0x1ba   :  { %v5096_v1 = vpop.f32.mrf.mxu1 }
 0x1bb   :  { %6088 = vst [vmem:[#allocation27_spill] sm:$0xff] %v5096_v1  ;;  %4172 = vmatmul.msk.f32.vlgmr.msra.gmra.mxu3 %vm274_vm10, %v5096_v1 }
 0x1bc   :  { %1095 = vmatpush.msra.mxu3 %v5152_v38 }
 0x1be   :  { %1096 = vmatpush.msra.mxu3 %v5162_v40 }
 0x1c0   :  { %1097 = vmatpush.msra.mxu3 %v5185_v46 }
 0x1c2   :  { %1098 = vmatpush.msra.mxu3 %v5198_v49 }
 0x1c3   :  { %4173 = vmatmul.msk.f32.gmra.mxu3 %vm274_vm10, %v5100_v2 }
 0x23e   :  { %v420_v58 = vpop.f32.mrf.mxu3 }
 0x23f   :  { %v428_v59 = vrot.slane %v420_v58, 2  ;;  %v429_v60 = vrot.slane %v420_v58, 4  ;;  %v430_v19 = vrot.slane %v420_v58, 6  ;;  %v497_v61 = vmul.f32 %v470_v52, %v420_v58  ;;  %4175 = vmatmul.msk.f32.vlgmr.msra.gmra.mxu1 %vm274_vm10, %v420_v58  ;;  %4177 = vmatmul.msk.f32.vlgmr.msrb.gmra.mxu3 %vm274_vm10, %v420_v58 }
 0x241   :  { %v498_v62 = vmul.f32 %v474_v54, %v428_v59  ;;  %v499_v7 = vmul.f32 %v478_v55, %v429_v60  ;;  %509 = vst [vmem:[#allocation1] ss:$4 sm:$0xff] %v497_v61  ;;  %v500_v8 = vmul.f32 %v482_v57, %v430_v19  ;;  %v558_v54 = vadd.f32 %v4300_v13, %v557_v29 }
 0x242   :  { %v563_v55 = vand.u32 2147483647, %v5215_v56  ;;  %v551_v59 = vor.u32 1.1754944e-38, %v550_v44  ;;  %v566_v60 = vor.u32 1.1754944e-38, %v565_v47 }
 0x243   :  { %511 = vst [vmem:[#allocation1 + $0x1] ss:$4 sm:$0xff] %v498_v62  ;;  %v562_v61 = vsel %vm561_vm6, %v4300_v13, %v558_v54 }
 0x244   :  { %513 = vst [vmem:[#allocation1 + $0x2] ss:$4 sm:$0xff] %v499_v7  ;;  %vm564_vm8 = vcmp.eq.f32.partialorder %v563_v55, 8.507059e+37 }
 0x245   :  { %516 = vst [vmem:[#allocation1 + $0x20] ss:$4 sm:$0xff] %v500_v8  ;;  %v552_v8 = vsel %vm549_vm7, %v551_v59, %v547_v53 }
 0x246   :  { %v423_v12 = vpop.f32.mrf.mxu3 }
 0x247   :  { %v431_v14 = vrot.slane %v423_v12, 2  ;;  %v501_v15 = vmul.f32 %v486_v6, %v423_v12  ;;  %4176 = vmatmul.msk.f32.gmra.mxu1 %vm274_vm10, %v423_v12  ;;  %4178 = vmatmul.msk.f32.gmra.mxu3 %vm274_vm10, %v423_v12  ;;  %v567_v6 = vsel %vm564_vm8, %v566_v60, %v562_v61  ;;  %v5285_v61 = vld [vmem:[%s6035_s9 + $0x18] sm:$0xff] }
 0x248   :  { %775 = vmatpush.msra.mxu0 %v5285_v61 }
 0x249   :  { %v502_v16 = vmul.f32 %v490_v10, %v431_v14  ;;  %518 = vst [vmem:[#allocation1 + $0x21] ss:$4 sm:$0xff] %v501_v15 }
 0x24b   :  { %v514_v21 = vld.sshfl [vmem:[#allocation1] sm:$0xff pattern:$0x73625140]  ;;  %520 = vst [vmem:[#allocation1 + $0x22] ss:$4 sm:$0xff] %v502_v16 }
 0x24c   :  { %v525_v9 = vsel %vm524_vm0, %v514_v21, 0.0  ;;  %v710_v21 = vpop.f32.mrf.mxu2 }
 0x24d   :  { %v526_v22 = vrot.slane %v525_v9, 4 }
 0x24f   :  { %v527_v25 = vadd.f32 %v526_v22, %v525_v9 }
 0x251   :  { %v528_v26 = vrot.slane %v527_v25, 2 }
 0x252   :  { %v521_v27 = vld.sshfl [vmem:[#allocation1 + $0x20] sm:$0xff pattern:$0x73625140] }
 0x253   :  { %v532_v30 = vsel %vm524_vm0, %v521_v27, 0.0  ;;  %v529_v31 = vadd.f32 %v528_v26, %v527_v25 }
 0x254   :  { %v533_v32 = vrot.slane %v532_v30, 4 }
 0x255   :  { %v530_v57 = vrot.slane %v529_v31, 1 }
 0x256   :  { %v534_v50 = vadd.f32 %v533_v32, %v532_v30 }
 0x257   :  { %v531_v62 = vadd.f32 %v530_v57, %v529_v31 }
 0x258   :  { %v535_v58 = vrot.slane %v534_v50, 2 }
 0x259   :  { %v553_v12 = vmul.f32 %v552_v8, %v531_v62  ;;  %v5290_v62 = vld [vmem:[%s6035_s9 + $0x10] sm:$0xff]  ;;  %v5302_v8 = vld [vmem:[%s6035_s9] sm:$0xff] }
 0x25a   :  { %v536_v19 = vadd.f32 %v535_v58, %v534_v50  ;;  %776 = vmatpush.msra.mxu0 %v5290_v62 }
 0x25c   :  { %v537_v7 = vrot.slane %v536_v19, 1 }
 0x25e   :  { %v538_v10 = vadd.f32 %v537_v7, %v536_v19  ;;  %v5296_v7 = vld [vmem:[%s6035_s9 + $0x8] sm:$0xff] }
 0x25f   :  { %777 = vmatpush.msra.mxu0 %v5296_v7 }
 0x260   :  { %v568_v56 = vmul.f32 %v567_v6, %v538_v10 }
 0x261   :  { %778 = vmatpush.msra.mxu0 %v5302_v8 }
 0x262   :  { %v667_v14 = vsel %vm666_vm9, %v568_v56, %v553_v12  ;;  %v5314_v56 = vld [vmem:[#allocation12 + $0x18] sm:$0xff] }
 0x263   :  { %738 = vrot.lane.b32.xlu0 %v667_v14, %s4799_s25  ;;  %4179 = vmatmul.msk.f32.vlgmr.msrb.gmra.mxu0 %vm274_vm10, %v667_v14  ;;  %v5318_v14 = vld [vmem:[#allocation12 + $0x10] sm:$0xff] }
 0x264   :  { %1118 = vmatpush.msrb.mxu0 %v5157_v39  ;;  %882 = vmatpush.msra.mxu2 %v5314_v56 }
 0x265   :  { %1266 = vmatpush.msrb.mxu3 %v5314_v56 }
 0x266   :  { %1119 = vmatpush.msrb.mxu0 %v5175_v43  ;;  %883 = vmatpush.msra.mxu2 %v5318_v14 }
 0x267   :  { %1267 = vmatpush.msrb.mxu3 %v5318_v14 }
 0x268   :  { %1120 = vmatpush.msrb.mxu0 %v5180_v45 }
 0x26a   :  { %1121 = vmatpush.msrb.mxu0 %v5193_v48 }
 0x2bc   :  { %v5247_v15 = vpop.f32.mrf.mxu1 }
 0x2bd   :  { %v5250_v11 = vrot.slane %v5247_v15, 2  ;;  %v5253_v13 = vrot.slane %v5247_v15, 4  ;;  %v5256_v16 = vrot.slane %v5247_v15, 6  ;;  %789 = vst [vmem:[#allocation1] ss:$4 sm:$0xff] %v5247_v15 }
 0x2bf   :  { %791 = vst [vmem:[#allocation1 + $0x1] ss:$4 sm:$0xff] %v5250_v11 }
 0x2c0   :  { %793 = vst [vmem:[#allocation1 + $0x2] ss:$4 sm:$0xff] %v5253_v13 }
 0x2c1   :  { %796 = vst [vmem:[#allocation1 + $0x20] ss:$4 sm:$0xff] %v5256_v16 }
 0x2c4   :  { %v5262_v18 = vpop.f32.mrf.mxu1 }
 0x2c5   :  { %v5265_v20 = vrot.slane %v5262_v18, 2  ;;  %798 = vst [vmem:[#allocation1 + $0x21] ss:$4 sm:$0xff] %v5262_v18 }
 0x2c7   :  { %800 = vst [vmem:[#allocation1 + $0x22] ss:$4 sm:$0xff] %v5265_v20 }
 0x2d5   :  { %v739_v58 = vpop.permute.xlu0 %738 }
 0x2e0   :  { %v687_v9 = vpop.f32.mrf.mxu0 }
 0x2e1   :  { %v711_v22 = vadd.f32 %v710_v21, %v687_v9  ;;  %v5322_v21 = vld [vmem:[#allocation12 + $0x8] sm:$0xff]  ;;  %v5326_v9 = vld [vmem:[#allocation12] sm:$0xff] }
 0x2e2   :  { %884 = vmatpush.msra.mxu2 %v5322_v21  ;;  %1268 = vmatpush.msrb.mxu3 %v5322_v21 }
 0x2e3   :  { %v713_v24 = vadd.f32 %v711_v22, %v5092_v63 }
 0x2e4   :  { %885 = vmatpush.msra.mxu2 %v5326_v9  ;;  %1269 = vmatpush.msrb.mxu3 %v5326_v9 }
 0x2e5   :  { %v717_v25 = vadd.f32 %v5272_v23, %v713_v24 }
 0x2e6   :  { %1478 = vmatpush.msrb.mxu2 %v5152_v38 }
 0x2e7   :  { %4301 = vtanh.f32 %v717_v25  ;;  %v4180_v27 = vmul.f32 -1.442695, %v717_v25 }
 0x2e8   :  { %1479 = vmatpush.msrb.mxu2 %v5162_v40 }
 0x2e9   :  { %4303 = vpow2.f32 %v4180_v27 }
 0x2ea   :  { %1480 = vmatpush.msrb.mxu2 %v5185_v46 }
 0x2ec   :  { %1481 = vmatpush.msrb.mxu2 %v5198_v49 }
 0x2ed   :  { %v4302_v26 = vpop.eup %4301 }
 0x2ee   :  { %743 = vrot.lane.b32.xlu2 %v4302_v26, %s4800_s17  ;;  %v794_v26 = vld.sshfl [vmem:[#allocation1] sm:$0xff pattern:$0x73625140] }
 0x2ef   :  { %v4304_v28 = vpop.eup %4303 }
 0x2f0   :  { %v721_v29 = vadd.f32 1.0, %v4304_v28 }
 0x2f2   :  { %4305 = vrcp.f32 %v721_v29  ;;  %v733_v47 = vand.u32 2147483648, %v721_v29  ;;  %vm727_vm12 = vweird.f32 %v721_v29  ;;  %v731_v50 = vand.u32 2147483647, %v721_v29 }
 0x2f4   :  { %v734_v52 = vor.u32 1.1754944e-38, %v733_v47  ;;  %vm732_vm14 = vcmp.eq.f32.partialorder %v731_v50, 8.507059e+37 }
 0x2f8   :  { %v4306_v30 = vpop.eup %4305 }
 0x2f9   :  { %v723_v31 = vmul.f32 %v4306_v30, %v721_v29  ;;  %vm728_vm11 = vweird.f32 %v4306_v30  ;;  %v801_v29 = vld.sshfl [vmem:[#allocation1 + $0x20] sm:$0xff pattern:$0x73625140] }
 0x2fa   :  { %vm729_vm13 = vmor %vm727_vm12, %vm728_vm11 }
 0x2fb   :  { %v724_v32 = vsub.f32 1.0, %v723_v31 }
 0x2fd   :  { %v725_v33 = vmul.f32 %v4306_v30, %v724_v32 }
 0x2ff   :  { %v726_v44 = vadd.f32 %v4306_v30, %v725_v33 }
 0x301   :  { %v730_v51 = vsel %vm729_vm13, %v4306_v30, %v726_v44 }
 0x302   :  { %v735_v55 = vsel %vm732_vm14, %v734_v52, %v730_v51 }
 0x303   :  { %v741_v59 = vmul.f32 %v739_v58, %v735_v55 }
 0x348   :  { %v744_v54 = vpop.permute.xlu2 %743 }
 0x349   :  { %v746_v57 = vmul.f32 %v744_v54, %v735_v55 }
 0x34b   :  { %748 = vrot.lane.b32.xlu1 %v746_v57, %s4799_s25 }
 0x3bd   :  { %v749_v60 = vpop.permute.xlu1 %748 }
 0x3be   :  { %v5278_v19 = vadd.f32 %v749_v60, %v741_v59 }
 0x3c0   :  { %4307 = vtanh.f32 %v5278_v19 }
 0x3c6   :  { %v4308_v53 = vpop.eup %4307 }
 0x3c7   :  { %754 = vrot.lane.b32.xlu2 %v4308_v53, %s4800_s17 }
 0x421   :  { %v755_v6 = vpop.permute.xlu2 %754 }
 0x422   :  { %v757_v10 = vmul.f32 %v755_v6, %v735_v55 }
 0x424   :  { %759 = vrot.lane.b32.xlu0 %v757_v10, %s4799_s25 }
 0x496   :  { %v760_v12 = vpop.permute.xlu0 %759 }
 0x497   :  { %1081 = vst.msk [vmem:[#allocation2] sm:$0x3] %vm1080_vm15, %v760_v12  ;;  %4181 = vmatmul.msk.f32.vlgmr.msra.gmra.mxu0 %vm274_vm10, %v760_v12  ;;  %4185 = vmatmul.msk.f32.vlgmr.msra.gmra.mxu3 %vm274_vm10, %v760_v12 }
 0x498   :  { %1860 = vmatpush.msra.mxu3 %v5152_v38 }
 0x49a   :  { %1861 = vmatpush.msra.mxu3 %v5162_v40 }
 0x49c   :  { %1862 = vmatpush.msra.mxu3 %v5185_v46 }
 0x49e   :  { %1863 = vmatpush.msra.mxu3 %v5198_v49 }
 0x514   :  { %v780_v22 = vpop.f32.mrf.mxu0 }
 0x515   :  { %v784_v24 = vrot.slane %v780_v22, 1  ;;  %v785_v25 = vperm.slane %v780_v22, 0 }
 0x517   :  { %v786_v27 = vperm.slane %v784_v24, 0  ;;  %v804_v28 = vmul.f32 %v794_v26, %v785_v25 }
 0x519   :  { %v805_v30 = vmul.f32 %v801_v29, %v786_v27  ;;  %v808_v31 = vrot.slane %v804_v28, 2  ;;  %v809_v32 = vrot.slane %v804_v28, 4  ;;  %838 = vst [vmem:[#allocation1] ss:$4 sm:$0xff] %v804_v28 }
 0x51b   :  { %v810_v33 = vrot.slane %v805_v30, 2  ;;  %v811_v44 = vrot.slane %v805_v30, 4  ;;  %840 = vst [vmem:[#allocation1 + $0x1] ss:$4 sm:$0xff] %v808_v31 }
 0x51c   :  { %842 = vst [vmem:[#allocation1 + $0x2] ss:$4 sm:$0xff] %v809_v32 }
 0x51d   :  { %844 = vst [vmem:[#allocation1 + $0x3] ss:$4 sm:$0xff] %v805_v30 }
 0x51e   :  { %846 = vst [vmem:[#allocation1 + $0x20] ss:$4 sm:$0xff] %v810_v33 }
 0x51f   :  { %848 = vst [vmem:[#allocation1 + $0x21] ss:$4 sm:$0xff] %v811_v44 }
 0x524   :  { %v849_v47 = vld.sshfl [vmem:[#allocation1] sm:$0xff pattern:$0x73625140] }
 0x525   :  { %851 = vst [vmem:[#allocation1] ss:$4 sm:$0xff] %v5139_v34  ;;  %4182 = vmatmul.msk.f32.vlgmr.msra.gmra.mxu2 %vm274_vm10, %v849_v47 }
 0x526   :  { %v850_v50 = vld.sshfl [vmem:[#allocation1 + $0x20] sm:$0xff pattern:$0x73625140]  ;;  %853 = vst [vmem:[#allocation1 + $0x1] ss:$4 sm:$0xff] %v5142_v35  ;;  %1648 = vmatpush.msra.mxu2 %v5314_v56 }
 0x527   :  { %855 = vst [vmem:[#allocation1 + $0x2] ss:$4 sm:$0xff] %v5145_v36 }
 0x528   :  { %857 = vst [vmem:[#allocation1 + $0x3] ss:$4 sm:$0xff] %v5147_v37  ;;  %1649 = vmatpush.msra.mxu2 %v5318_v14 }
 0x529   :  { %859 = vst [vmem:[#allocation1 + $0x20] ss:$4 sm:$0xff] %v5165_v41 }
 0x52a   :  { %861 = vst [vmem:[#allocation1 + $0x21] ss:$4 sm:$0xff] %v5168_v42  ;;  %1650 = vmatpush.msra.mxu2 %v5322_v21 }
 0x52c   :  { %1651 = vmatpush.msra.mxu2 %v5326_v9 }
 0x52d   :  { %4183 = vmatmul.msk.f32.gmra.mxu2 %vm274_vm10, %v850_v50 }
 0x52f   :  { %v862_v51 = vld.sshfl [vmem:[#allocation1] sm:$0xff pattern:$0x73625140] }
 0x531   :  { %v863_v59 = vld.sshfl [vmem:[#allocation1 + $0x20] sm:$0xff pattern:$0x73625140] }
 0x5a8   :  { %v887_v52 = vpop.f32.mrf.mxu2 }
 0x5a9   :  { %v888_v54 = vadd.f32 %v887_v52, %v862_v51 }
 0x5ab   :  { %v895_v55 = vrot.slane %v888_v54, 2  ;;  %v896_v57 = vrot.slane %v888_v54, 4  ;;  %v897_v58 = vrot.slane %v888_v54, 6  ;;  %903 = vst [vmem:[#allocation1] ss:$4 sm:$0xff] %v888_v54 }
 0x5ad   :  { %905 = vst [vmem:[#allocation1 + $0x1] ss:$4 sm:$0xff] %v895_v55 }
 0x5ae   :  { %907 = vst [vmem:[#allocation1 + $0x2] ss:$4 sm:$0xff] %v896_v57 }
 0x5af   :  { %910 = vst [vmem:[#allocation1 + $0x20] ss:$4 sm:$0xff] %v897_v58 }
 0x5b0   :  { %v890_v60 = vpop.f32.mrf.mxu2 }
 0x5b1   :  { %v891_v53 = vadd.f32 %v890_v60, %v863_v59 }
 0x5b3   :  { %v898_v6 = vrot.slane %v891_v53, 2  ;;  %912 = vst [vmem:[#allocation1 + $0x21] ss:$4 sm:$0xff] %v891_v53 }
 0x5b5   :  { %v908_v10 = vld.sshfl [vmem:[#allocation1] sm:$0xff pattern:$0x73625140]  ;;  %914 = vst [vmem:[#allocation1 + $0x22] ss:$4 sm:$0xff] %v898_v6 }
 0x5b6   :  { %v918_v12 = vsel %vm524_vm0, %v908_v10, -inf }
 0x5b7   :  { %v919_v22 = vrot.slane %v918_v12, 4 }
 0x5b9   :  { %v920_v24 = vmax.f32 %v918_v12, %v919_v22 }
 0x5bb   :  { %v921_v25 = vrot.slane %v920_v24, 2 }
 0x5bc   :  { %v915_v26 = vld.sshfl [vmem:[#allocation1 + $0x20] sm:$0xff pattern:$0x73625140] }
 0x5bd   :  { %v922_v27 = vmax.f32 %v920_v24, %v921_v25  ;;  %v925_v28 = vsel %vm524_vm0, %v915_v26, -inf }
 0x5be   :  { %v926_v29 = vrot.slane %v925_v28, 4 }
 0x5bf   :  { %v923_v30 = vrot.slane %v922_v27, 1 }
 0x5c0   :  { %v927_v31 = vmax.f32 %v925_v28, %v926_v29 }
 0x5c1   :  { %v924_v32 = vmax.f32 %v922_v27, %v923_v30 }
 0x5c2   :  { %v928_v33 = vrot.slane %v927_v31, 2 }
 0x5c3   :  { %v934_v44 = vrot.slane %v924_v32, 2  ;;  %v935_v47 = vrot.slane %v924_v32, 4  ;;  %v942_v50 = vsub.f32 %v888_v54, %v924_v32 }
 0x5c4   :  { %v929_v51 = vmax.f32 %v927_v31, %v928_v33 }
 0x5c5   :  { %v943_v52 = vsub.f32 %v895_v55, %v934_v44  ;;  %v944_v59 = vsub.f32 %v896_v57, %v935_v47  ;;  %v948_v60 = vmul.f32 1.442695, %v942_v50 }
 0x5c6   :  { %v930_v10 = vrot.slane %v929_v51, 1 }
 0x5c7   :  { %4309 = vpow2.f32 %v948_v60  ;;  %v950_v12 = vmul.f32 1.442695, %v943_v52  ;;  %v952_v22 = vmul.f32 1.442695, %v944_v59 }
 0x5c8   :  { %v931_v17 = vmax.f32 %v929_v51, %v930_v10 }
 0x5c9   :  { %4311 = vpow2.f32 %v950_v12 }
 0x5ca   :  { %4313 = vpow2.f32 %v952_v22  ;;  %v936_v24 = vrot.slane %v931_v17, 2  ;;  %v937_v25 = vrot.slane %v931_v17, 4  ;;  %v945_v26 = vsub.f32 %v897_v58, %v931_v17 }
 0x5cc   :  { %v946_v28 = vsub.f32 %v891_v53, %v936_v24  ;;  %v947_v27 = vsub.f32 %v898_v6, %v937_v25  ;;  %v954_v29 = vmul.f32 1.442695, %v945_v26  ;;  %v5354_v25 = vpop.f32.mrf.mxu3 }
 0x5cd   :  { %v4310_v30 = vpop.eup %4309 }
 0x5ce   :  { %966 = vst [vmem:[#allocation1] ss:$4 sm:$0xff] %v4310_v30  ;;  %4315 = vpow2.f32 %v954_v29  ;;  %v956_v54 = vmul.f32 1.442695, %v946_v28  ;;  %v958_v55 = vmul.f32 1.442695, %v947_v27 }
 0x5cf   :  { %v4312_v57 = vpop.eup %4311  ;;  %v5356_v29 = vld [vmem:[#allocation11 + $0x18] sm:$0xff] }
 0x5d0   :  { %v4314_v31 = vpop.eup %4313  ;;  %968 = vst [vmem:[#allocation1 + $0x1] ss:$4 sm:$0xff] %v4312_v57  ;;  %4317 = vpow2.f32 %v956_v54  ;;  %v5358_v54 = vld [vmem:[#allocation11 + $0x10] sm:$0xff]  ;;  %1071 = vmatpush.msrb.mxu1 %v5356_v29  ;;  %1455 = vmatpush.msra.mxu0 %v5356_v29 }
 0x5d1   :  { %970 = vst [vmem:[#allocation1 + $0x2] ss:$4 sm:$0xff] %v4314_v31  ;;  %4319 = vpow2.f32 %v958_v55 }
 0x5d2   :  { %1072 = vmatpush.msrb.mxu1 %v5358_v54  ;;  %1456 = vmatpush.msra.mxu0 %v5358_v54 }
 0x5d4   :  { %v4316_v32 = vpop.eup %4315 }
 0x5d5   :  { %973 = vst [vmem:[#allocation1 + $0x20] ss:$4 sm:$0xff] %v4316_v32 }
 0x5d6   :  { %v4318_v33 = vpop.eup %4317 }
 0x5d7   :  { %v4320_v44 = vpop.eup %4319  ;;  %975 = vst [vmem:[#allocation1 + $0x21] ss:$4 sm:$0xff] %v4318_v33 }
 0x5d8   :  { %v971_v17 = vld.sshfl [vmem:[#allocation1] sm:$0xff pattern:$0x73625140]  ;;  %977 = vst [vmem:[#allocation1 + $0x22] ss:$4 sm:$0xff] %v4320_v44 }
 0x5d9   :  { %v981_v58 = vsel %vm524_vm0, %v971_v17, 0.0 }
 0x5da   :  { %v982_v53 = vrot.slane %v981_v58, 4 }
 0x5dc   :  { %v983_v6 = vadd.f32 %v982_v53, %v981_v58  ;;  %v5363_v53 = vrot.slane %v5354_v25, 2 }
 0x5de   :  { %v984_v47 = vrot.slane %v983_v6, 2 }
 0x5df   :  { %v978_v50 = vld.sshfl [vmem:[#allocation1 + $0x20] sm:$0xff pattern:$0x73625140] }
 0x5e0   :  { %v985_v51 = vadd.f32 %v984_v47, %v983_v6  ;;  %v988_v52 = vsel %vm524_vm0, %v978_v50, 0.0  ;;  %v5365_v6 = vld [vmem:[#allocation11 + $0x8] sm:$0xff]  ;;  %v5368_v47 = vrot.slane %v5354_v25, 4 }
 0x5e1   :  { %v989_v59 = vrot.slane %v988_v52, 4  ;;  %1073 = vmatpush.msrb.mxu1 %v5365_v6  ;;  %1457 = vmatpush.msra.mxu0 %v5365_v6 }
 0x5e2   :  { %v986_v60 = vrot.slane %v985_v51, 1 }
 0x5e3   :  { %v990_v10 = vadd.f32 %v989_v59, %v988_v52 }
 0x5e4   :  { %v987_v12 = vadd.f32 %v986_v60, %v985_v51 }
 0x5e5   :  { %v991_v22 = vrot.slane %v990_v10, 2 }
 0x5e6   :  { %4321 = vrcp.f32 %v987_v12 }
 0x5e7   :  { %v992_v24 = vadd.f32 %v991_v22, %v990_v10 }
 0x5e9   :  { %v993_v26 = vrot.slane %v992_v24, 1 }
 0x5eb   :  { %v994_v28 = vadd.f32 %v993_v26, %v992_v24 }
 0x5ec   :  { %v4322_v27 = vpop.eup %4321 }
 0x5ed   :  { %v999_v55 = vrot.slane %v4322_v27, 2  ;;  %v1000_v17 = vrot.slane %v4322_v27, 4  ;;  %v1007_v58 = vmul.f32 %v4322_v27, %v4310_v30  ;;  %4323 = vrcp.f32 %v994_v28  ;;  %v5373_v30 = vld [vmem:[#allocation11] sm:$0xff] }
 0x5ee   :  { %1074 = vmatpush.msrb.mxu1 %v5373_v30  ;;  %1458 = vmatpush.msra.mxu0 %v5373_v30 }
 0x5ef   :  { %v1008_v50 = vmul.f32 %v4312_v57, %v999_v55  ;;  %v1009_v51 = vmul.f32 %v4314_v31, %v1000_v17  ;;  %v1013_v52 = vmul.f32 %v1007_v58, %v5354_v25  ;;  %v5379_v57 = vpop.f32.mrf.mxu3  ;;  %v5384_v31 = vrot.slane %v5354_v25, 6 }
 0x5f0   :  { %1185 = vmatpush.msra.mxu1 %v5285_v61  ;;  %v5388_v26 = vrot.slane %v5379_v57, 2 }
 0x5f1   :  { %v1014_v59 = vmul.f32 %v1008_v50, %v5363_v53  ;;  %v1015_v60 = vmul.f32 %v1009_v51, %v5368_v47  ;;  %1025 = vst [vmem:[#allocation1] ss:$4 sm:$0xff] %v1013_v52 }
 0x5f2   :  { %1186 = vmatpush.msra.mxu1 %v5290_v62 }
 0x5f3   :  { %v4324_v10 = vpop.eup %4323  ;;  %1027 = vst [vmem:[#allocation1 + $0x1] ss:$4 sm:$0xff] %v1014_v59 }
 0x5f4   :  { %1029 = vst [vmem:[#allocation1 + $0x2] ss:$4 sm:$0xff] %v1015_v60  ;;  %v1001_v12 = vrot.slane %v4324_v10, 2  ;;  %v1002_v22 = vrot.slane %v4324_v10, 4  ;;  %v1010_v24 = vmul.f32 %v4324_v10, %v4316_v32  ;;  %1187 = vmatpush.msra.mxu1 %v5296_v7 }
 0x5f6   :  { %v1011_v28 = vmul.f32 %v4318_v33, %v1001_v12  ;;  %v1012_v27 = vmul.f32 %v4320_v44, %v1002_v22  ;;  %v1016_v55 = vmul.f32 %v1010_v24, %v5384_v31  ;;  %1188 = vmatpush.msra.mxu1 %v5302_v8 }
 0x5f8   :  { %v1017_v17 = vmul.f32 %v1011_v28, %v5379_v57  ;;  %v1018_v58 = vmul.f32 %v1012_v27, %v5388_v26  ;;  %1032 = vst [vmem:[#allocation1 + $0x20] ss:$4 sm:$0xff] %v1016_v55 }
 0x5fa   :  { %1034 = vst [vmem:[#allocation1 + $0x21] ss:$4 sm:$0xff] %v1017_v17 }
 0x5fb   :  { %v1030_v32 = vld.sshfl [vmem:[#allocation1] sm:$0xff pattern:$0x73625140]  ;;  %1036 = vst [vmem:[#allocation1 + $0x22] ss:$4 sm:$0xff] %v1018_v58 }
 0x5fc   :  { %1199 = vst [vmem:[#allocation1] ss:$4 sm:$0xff] %v5247_v15  ;;  %v1040_v33 = vsel %vm524_vm0, %v1030_v32, 0.0 }
 0x5fd   :  { %1201 = vst [vmem:[#allocation1 + $0x1] ss:$4 sm:$0xff] %v5250_v11  ;;  %v1041_v44 = vrot.slane %v1040_v33, 4 }
 0x5fe   :  { %1203 = vst [vmem:[#allocation1 + $0x2] ss:$4 sm:$0xff] %v5253_v13 }
 0x5ff   :  { %v1042_v50 = vadd.f32 %v1041_v44, %v1040_v33 }
 0x601   :  { %v1043_v52 = vrot.slane %v1042_v50, 2 }
 0x602   :  { %v1037_v51 = vld.sshfl [vmem:[#allocation1 + $0x20] sm:$0xff pattern:$0x73625140] }
 0x603   :  { %1206 = vst [vmem:[#allocation1 + $0x20] ss:$4 sm:$0xff] %v5256_v16  ;;  %v1047_v59 = vsel %vm524_vm0, %v1037_v51, 0.0  ;;  %v1044_v10 = vadd.f32 %v1043_v52, %v1042_v50 }
 0x604   :  { %1208 = vst [vmem:[#allocation1 + $0x21] ss:$4 sm:$0xff] %v5262_v18  ;;  %v1048_v60 = vrot.slane %v1047_v59, 4 }
 0x605   :  { %1210 = vst [vmem:[#allocation1 + $0x22] ss:$4 sm:$0xff] %v5265_v20  ;;  %v1045_v24 = vrot.slane %v1044_v10, 1 }
 0x606   :  { %v1049_v12 = vadd.f32 %v1048_v60, %v1047_v59 }
 0x607   :  { %v1046_v55 = vadd.f32 %v1045_v24, %v1044_v10 }
 0x608   :  { %v1050_v22 = vrot.slane %v1049_v12, 2 }
 0x60a   :  { %v1051_v28 = vadd.f32 %v1050_v22, %v1049_v12 }
 0x60c   :  { %v1052_v27 = vrot.slane %v1051_v28, 1 }
 0x60e   :  { %v1053_v17 = vadd.f32 %v1052_v27, %v1051_v28 }
 0x610   :  { %v1056_v58 = vsel %vm666_vm9, %v1053_v17, %v1046_v55 }
 0x611   :  { %4184 = vmatmul.msk.f32.vlgmr.msrb.gmra.mxu1 %vm274_vm10, %v1056_v58 }
 0x612   :  { %1501 = vmatpush.msrb.mxu1 %v5157_v39  ;;  %v1100_v39 = vpop.f32.mrf.mxu3 }
 0x614   :  { %1502 = vmatpush.msrb.mxu1 %v5175_v43 }
 0x616   :  { %1503 = vmatpush.msrb.mxu1 %v5180_v45  ;;  %v1127_v45 = vrot.slane %v5092_v63, 2 }
 0x618   :  { %1504 = vmatpush.msrb.mxu1 %v5193_v48 }
 0x68e   :  { %v1076_v32 = vpop.f32.mrf.mxu1 }
 0x68f   :  { %1082 = vst.msk [vmem:[#allocation3] sm:$0x3] %vm1080_vm15, %v1076_v32  ;;  %4186 = vmatmul.msk.f32.vlgmr.msrb.gmra.mxu0 %vm274_vm10, %v1076_v32 }
 0x690   :  { %1567 = vmatpush.msrb.mxu0 %v5285_v61 }
 0x692   :  { %1568 = vmatpush.msrb.mxu0 %v5290_v62 }
 0x694   :  { %1569 = vmatpush.msrb.mxu0 %v5296_v7 }
 0x696   :  { %1570 = vmatpush.msrb.mxu0 %v5302_v8 }
 0x70c   :  { %v1123_v33 = vpop.f32.mrf.mxu0 }
 0x70d   :  { %v1124_v43 = vadd.f32 %v1123_v33, %v1100_v39 }
 0x70f   :  { %v1129_v44 = vadd.f32 %v1127_v45, %v1124_v43 }
 0x711   :  { %v1130_v48 = vadd.f32 %v5272_v23, %v1129_v44 }
 0x713   :  { %4325 = vtanh.f32 %v1130_v48  ;;  %v4187_v51 = vmul.f32 -1.442695, %v1130_v48 }
 0x715   :  { %4327 = vpow2.f32 %v4187_v51 }
 0x719   :  { %v4326_v50 = vpop.eup %4325 }
 0x71a   :  { %1153 = vrot.lane.b32.xlu1 %v4326_v50, %s4800_s17 }
 0x71b   :  { %v4328_v52 = vpop.eup %4327 }
 0x71c   :  { %v1134_v59 = vadd.f32 1.0, %v4328_v52 }
 0x71e   :  { %4329 = vrcp.f32 %v1134_v59  ;;  %v1146_v28 = vand.u32 2147483648, %v1134_v59  ;;  %vm1140_vm2 = vweird.f32 %v1134_v59  ;;  %v1144_v27 = vand.u32 2147483647, %v1134_v59 }
 0x720   :  { %v1147_v17 = vor.u32 1.1754944e-38, %v1146_v28  ;;  %vm1145_vm4 = vcmp.eq.f32.partialorder %v1144_v27, 8.507059e+37 }
 0x724   :  { %v4330_v60 = vpop.eup %4329 }
 0x725   :  { %v1136_v10 = vmul.f32 %v4330_v60, %v1134_v59  ;;  %vm1141_vm1 = vweird.f32 %v4330_v60 }
 0x726   :  { %vm1142_vm3 = vmor %vm1140_vm2, %vm1141_vm1 }
 0x727   :  { %v1137_v12 = vsub.f32 1.0, %v1136_v10 }
 0x729   :  { %v1138_v22 = vmul.f32 %v4330_v60, %v1137_v12 }
 0x72b   :  { %v1139_v24 = vadd.f32 %v4330_v60, %v1138_v22  ;;  %v1211_v22 = vld.sshfl [vmem:[#allocation1 + $0x20] sm:$0xff pattern:$0x73625140] }
 0x72d   :  { %v1143_v55 = vsel %vm1142_vm3, %v4330_v60, %v1139_v24  ;;  %v1204_v60 = vld.sshfl [vmem:[#allocation1] sm:$0xff pattern:$0x73625140] }
 0x72e   :  { %v1148_v32 = vsel %vm1145_vm4, %v1147_v17, %v1143_v55 }
 0x72f   :  { %v1151_v33 = vmul.f32 %v1148_v32, %v5278_v19 }
 0x78c   :  { %v1154_v58 = vpop.permute.xlu1 %1153 }
 0x78d   :  { %v1156_v39 = vmul.f32 %v1154_v58, %v1148_v32 }
 0x78f   :  { %1158 = vrot.lane.b32.xlu2 %v1156_v39, %s4799_s25 }
 0x7e9   :  { %v1159_v43 = vpop.permute.xlu2 %1158 }
 0x7ea   :  { %v5421_v45 = vadd.f32 %v1159_v43, %v1151_v33 }
 0x7ec   :  { %4331 = vtanh.f32 %v5421_v45 }
 0x7f2   :  { %v4332_v44 = vpop.eup %4331 }
 0x7f3   :  { %1164 = vrot.lane.b32.xlu0 %v4332_v44, %s4800_s17 }
 0x865   :  { %v1165_v48 = vpop.permute.xlu0 %1164 }
 0x866   :  { %v1167_v50 = vmul.f32 %v1165_v48, %v1148_v32 }
 0x868   :  { %1169 = vrot.lane.b32.xlu1 %v1167_v50, %s4799_s25 }
 0x8da   :  { %v1170_v51 = vpop.permute.xlu1 %1169 }
 0x8db   :  { %1464 = vst.msk [vmem:[#allocation2 + $0x2] sm:$0x3] %vm1080_vm15, %v1170_v51  ;;  %4188 = vmatmul.msk.f32.vlgmr.msra.gmra.mxu1 %vm274_vm10, %v1170_v51  ;;  %4192 = vmatmul.msk.f32.vlgmr.msrb.gmra.mxu2 %vm274_vm10, %v1170_v51 }
 0x8dc   :  { %1837 = vmatpush.msra.mxu1 %v5356_v29  ;;  %2242 = vmatpush.msrb.mxu2 %v5152_v38 }
 0x8de   :  { %1838 = vmatpush.msra.mxu1 %v5358_v54  ;;  %2243 = vmatpush.msrb.mxu2 %v5162_v40 }
 0x8e0   :  { %1839 = vmatpush.msra.mxu1 %v5365_v6  ;;  %2244 = vmatpush.msrb.mxu2 %v5185_v46 }
 0x8e2   :  { %1840 = vmatpush.msra.mxu1 %v5373_v30  ;;  %2245 = vmatpush.msrb.mxu2 %v5198_v49 }
 0x958   :  { %v1190_v19 = vpop.f32.mrf.mxu1 }
 0x959   :  { %v1194_v52 = vrot.slane %v1190_v19, 1  ;;  %v1195_v59 = vperm.slane %v1190_v19, 0 }
 0x95b   :  { %v1196_v10 = vperm.slane %v1194_v52, 0  ;;  %v1214_v12 = vmul.f32 %v1204_v60, %v1195_v59 }
 0x95d   :  { %v1215_v38 = vmul.f32 %v1211_v22, %v1196_v10  ;;  %v1218_v24 = vrot.slane %v1214_v12, 2  ;;  %v1219_v28 = vrot.slane %v1214_v12, 4  ;;  %1222 = vst [vmem:[#allocation1] ss:$4 sm:$0xff] %v1214_v12 }
 0x95f   :  { %v1220_v40 = vrot.slane %v1215_v38, 2  ;;  %v1221_v27 = vrot.slane %v1215_v38, 4  ;;  %1224 = vst [vmem:[#allocation1 + $0x1] ss:$4 sm:$0xff] %v1218_v24 }
 0x960   :  { %1226 = vst [vmem:[#allocation1 + $0x2] ss:$4 sm:$0xff] %v1219_v28 }
 0x961   :  { %1228 = vst [vmem:[#allocation1 + $0x3] ss:$4 sm:$0xff] %v1215_v38 }
 0x962   :  { %1230 = vst [vmem:[#allocation1 + $0x20] ss:$4 sm:$0xff] %v1220_v40 }
 0x963   :  { %1232 = vst [vmem:[#allocation1 + $0x21] ss:$4 sm:$0xff] %v1221_v27 }
 0x968   :  { %v1233_v46 = vld.sshfl [vmem:[#allocation1] sm:$0xff pattern:$0x73625140] }
 0x969   :  { %1235 = vst [vmem:[#allocation1] ss:$4 sm:$0xff] %v5139_v34  ;;  %4189 = vmatmul.msk.f32.vlgmr.msrb.gmra.mxu3 %vm274_vm10, %v1233_v46 }
 0x96a   :  { %v1234_v49 = vld.sshfl [vmem:[#allocation1 + $0x20] sm:$0xff pattern:$0x73625140]  ;;  %1237 = vst [vmem:[#allocation1 + $0x1] ss:$4 sm:$0xff] %v5142_v35  ;;  %2030 = vmatpush.msrb.mxu3 %v5314_v56 }
 0x96b   :  { %1239 = vst [vmem:[#allocation1 + $0x2] ss:$4 sm:$0xff] %v5145_v36 }
 0x96c   :  { %1241 = vst [vmem:[#allocation1 + $0x3] ss:$4 sm:$0xff] %v5147_v37  ;;  %2031 = vmatpush.msrb.mxu3 %v5318_v14 }
 0x96d   :  { %1243 = vst [vmem:[#allocation1 + $0x20] ss:$4 sm:$0xff] %v5165_v41 }
 0x96e   :  { %1245 = vst [vmem:[#allocation1 + $0x21] ss:$4 sm:$0xff] %v5168_v42  ;;  %2032 = vmatpush.msrb.mxu3 %v5322_v21 }
 0x970   :  { %2033 = vmatpush.msrb.mxu3 %v5326_v9 }
 0x971   :  { %4190 = vmatmul.msk.f32.gmra.mxu3 %vm274_vm10, %v1234_v49 }
 0x973   :  { %v1246_v55 = vld.sshfl [vmem:[#allocation1] sm:$0xff pattern:$0x73625140] }
 0x975   :  { %v1247_v33 = vld.sshfl [vmem:[#allocation1 + $0x20] sm:$0xff pattern:$0x73625140] }
 0x9ec   :  { %v1271_v17 = vpop.f32.mrf.mxu3 }
 0x9ed   :  { %v1272_v58 = vadd.f32 %v1271_v17, %v1246_v55 }
 0x9ef   :  { %v1279_v56 = vrot.slane %v1272_v58, 2  ;;  %v1280_v32 = vrot.slane %v1272_v58, 4  ;;  %v1281_v39 = vrot.slane %v1272_v58, 6  ;;  %1287 = vst [vmem:[#allocation1] ss:$4 sm:$0xff] %v1272_v58 }
 0x9f1   :  { %1289 = vst [vmem:[#allocation1 + $0x1] ss:$4 sm:$0xff] %v1279_v56 }
 0x9f2   :  { %1291 = vst [vmem:[#allocation1 + $0x2] ss:$4 sm:$0xff] %v1280_v32 }
 0x9f3   :  { %1294 = vst [vmem:[#allocation1 + $0x20] ss:$4 sm:$0xff] %v1281_v39 }
 0x9f4   :  { %v1274_v14 = vpop.f32.mrf.mxu3 }
 0x9f5   :  { %v1275_v43 = vadd.f32 %v1274_v14, %v1247_v33 }
 0x9f7   :  { %v1282_v44 = vrot.slane %v1275_v43, 2  ;;  %1296 = vst [vmem:[#allocation1 + $0x21] ss:$4 sm:$0xff] %v1275_v43 }
 0x9f9   :  { %v1292_v21 = vld.sshfl [vmem:[#allocation1] sm:$0xff pattern:$0x73625140]  ;;  %1298 = vst [vmem:[#allocation1 + $0x22] ss:$4 sm:$0xff] %v1282_v44 }
 0x9fa   :  { %v1302_v9 = vsel %vm524_vm0, %v1292_v21, -inf }
 0x9fb   :  { %v1303_v48 = vrot.slane %v1302_v9, 4 }
 0x9fd   :  { %v1304_v50 = vmax.f32 %v1302_v9, %v1303_v48 }
 0x9ff   :  { %v1305_v51 = vrot.slane %v1304_v50, 2 }
 0xa00   :  { %v1299_v19 = vld.sshfl [vmem:[#allocation1 + $0x20] sm:$0xff pattern:$0x73625140] }
 0xa01   :  { %v1306_v52 = vmax.f32 %v1304_v50, %v1305_v51  ;;  %v1309_v59 = vsel %vm524_vm0, %v1299_v19, -inf }
 0xa02   :  { %v1310_v60 = vrot.slane %v1309_v59, 4 }
 0xa03   :  { %v1307_v10 = vrot.slane %v1306_v52, 1 }
 0xa04   :  { %v1311_v12 = vmax.f32 %v1309_v59, %v1310_v60 }
 0xa05   :  { %v1308_v22 = vmax.f32 %v1306_v52, %v1307_v10 }
 0xa06   :  { %v1312_v38 = vrot.slane %v1311_v12, 2 }
 0xa07   :  { %v1318_v24 = vrot.slane %v1308_v22, 2  ;;  %v1319_v28 = vrot.slane %v1308_v22, 4  ;;  %v1326_v40 = vsub.f32 %v1272_v58, %v1308_v22 }
 0xa08   :  { %v1313_v27 = vmax.f32 %v1311_v12, %v1312_v38 }
 0xa09   :  { %v1327_v46 = vsub.f32 %v1279_v56, %v1318_v24  ;;  %v1328_v49 = vsub.f32 %v1280_v32, %v1319_v28  ;;  %v1332_v55 = vmul.f32 1.442695, %v1326_v40 }
 0xa0a   :  { %v1314_v17 = vrot.slane %v1313_v27, 1 }
 0xa0b   :  { %4333 = vpow2.f32 %v1332_v55  ;;  %v1334_v33 = vmul.f32 1.442695, %v1327_v46  ;;  %v1336_v14 = vmul.f32 1.442695, %v1328_v49 }
 0xa0c   :  { %v1315_v21 = vmax.f32 %v1313_v27, %v1314_v17 }
 0xa0d   :  { %4335 = vpow2.f32 %v1334_v33 }
 0xa0e   :  { %4337 = vpow2.f32 %v1336_v14  ;;  %v1320_v9 = vrot.slane %v1315_v21, 2  ;;  %v1321_v48 = vrot.slane %v1315_v21, 4  ;;  %v1329_v50 = vsub.f32 %v1281_v39, %v1315_v21 }
 0xa10   :  { %v1330_v51 = vsub.f32 %v1275_v43, %v1320_v9  ;;  %v1331_v19 = vsub.f32 %v1282_v44, %v1321_v48  ;;  %v1338_v52 = vmul.f32 1.442695, %v1329_v50 }
 0xa11   :  { %v4334_v59 = vpop.eup %4333 }
 0xa12   :  { %1350 = vst [vmem:[#allocation1] ss:$4 sm:$0xff] %v4334_v59  ;;  %4339 = vpow2.f32 %v1338_v52  ;;  %v1340_v58 = vmul.f32 1.442695, %v1330_v51  ;;  %v1342_v56 = vmul.f32 1.442695, %v1331_v19 }
 0xa13   :  { %v4336_v32 = vpop.eup %4335 }
 0xa14   :  { %v4338_v60 = vpop.eup %4337  ;;  %1352 = vst [vmem:[#allocation1 + $0x1] ss:$4 sm:$0xff] %v4336_v32  ;;  %4341 = vpow2.f32 %v1340_v58 }
 0xa15   :  { %1354 = vst [vmem:[#allocation1 + $0x2] ss:$4 sm:$0xff] %v4338_v60  ;;  %4343 = vpow2.f32 %v1342_v56 }
 0xa18   :  { %v4340_v10 = vpop.eup %4339 }
 0xa19   :  { %1357 = vst [vmem:[#allocation1 + $0x20] ss:$4 sm:$0xff] %v4340_v10 }
 0xa1a   :  { %v4342_v12 = vpop.eup %4341 }
 0xa1b   :  { %v4344_v22 = vpop.eup %4343  ;;  %1359 = vst [vmem:[#allocation1 + $0x21] ss:$4 sm:$0xff] %v4342_v12 }
 0xa1c   :  { %v1355_v39 = vld.sshfl [vmem:[#allocation1] sm:$0xff pattern:$0x73625140]  ;;  %1361 = vst [vmem:[#allocation1 + $0x22] ss:$4 sm:$0xff] %v4344_v22 }
 0xa1d   :  { %v1365_v43 = vsel %vm524_vm0, %v1355_v39, 0.0 }
 0xa1e   :  { %v1366_v44 = vrot.slane %v1365_v43, 4 }
 0xa20   :  { %v1367_v38 = vadd.f32 %v1366_v44, %v1365_v43 }
 0xa22   :  { %v1368_v24 = vrot.slane %v1367_v38, 2 }
 0xa23   :  { %v1362_v28 = vld.sshfl [vmem:[#allocation1 + $0x20] sm:$0xff pattern:$0x73625140] }
 0xa24   :  { %v1369_v40 = vadd.f32 %v1368_v24, %v1367_v38  ;;  %v1372_v27 = vsel %vm524_vm0, %v1362_v28, 0.0 }
 0xa25   :  { %v1373_v46 = vrot.slane %v1372_v27, 4 }
 0xa26   :  { %v1370_v49 = vrot.slane %v1369_v40, 1 }
 0xa27   :  { %v1374_v55 = vadd.f32 %v1373_v46, %v1372_v27 }
 0xa28   :  { %v1371_v17 = vadd.f32 %v1370_v49, %v1369_v40 }
 0xa29   :  { %v1375_v33 = vrot.slane %v1374_v55, 2 }
 0xa2a   :  { %4345 = vrcp.f32 %v1371_v17 }
 0xa2b   :  { %v1376_v14 = vadd.f32 %v1375_v33, %v1374_v55 }
 0xa2d   :  { %v1377_v21 = vrot.slane %v1376_v14, 1 }
 0xa2f   :  { %v1378_v9 = vadd.f32 %v1377_v21, %v1376_v14 }
 0xa30   :  { %v4346_v48 = vpop.eup %4345 }
 0xa31   :  { %v1383_v50 = vrot.slane %v4346_v48, 2  ;;  %v1384_v51 = vrot.slane %v4346_v48, 4  ;;  %v1391_v19 = vmul.f32 %v4346_v48, %v4334_v59  ;;  %4347 = vrcp.f32 %v1378_v9 }
 0xa33   :  { %v1392_v52 = vmul.f32 %v4336_v32, %v1383_v50  ;;  %v1393_v58 = vmul.f32 %v4338_v60, %v1384_v51  ;;  %v1397_v56 = vmul.f32 %v1391_v19, %v5354_v25 }
 0xa35   :  { %v1398_v39 = vmul.f32 %v1392_v52, %v5363_v53  ;;  %v1399_v43 = vmul.f32 %v1393_v58, %v5368_v47  ;;  %1409 = vst [vmem:[#allocation1] ss:$4 sm:$0xff] %v1397_v56  ;;  %v5472_v56 = vld [vmem:[%s6094_s28 + $0x18] sm:$0xff] }
 0xa37   :  { %v4348_v44 = vpop.eup %4347  ;;  %1411 = vst [vmem:[#allocation1 + $0x1] ss:$4 sm:$0xff] %v1398_v39  ;;  %v5478_v39 = vld [vmem:[%s6094_s28 + $0x10] sm:$0xff] }
 0xa38   :  { %1413 = vst [vmem:[#allocation1 + $0x2] ss:$4 sm:$0xff] %v1399_v43  ;;  %v1385_v38 = vrot.slane %v4348_v44, 2  ;;  %v1386_v24 = vrot.slane %v4348_v44, 4  ;;  %v1394_v28 = vmul.f32 %v4348_v44, %v4340_v10  ;;  %v5484_v43 = vld [vmem:[%s6094_s28 + $0x8] sm:$0xff]  ;;  %v5490_v44 = vld [vmem:[%s6094_s28] sm:$0xff] }
 0xa3a   :  { %v1395_v40 = vmul.f32 %v4342_v12, %v1385_v38  ;;  %v1396_v27 = vmul.f32 %v4344_v22, %v1386_v24  ;;  %v1400_v59 = vmul.f32 %v1394_v28, %v5384_v31  ;;  %v1483_v24 = vpop.f32.mrf.mxu2 }
 0xa3c   :  { %v1401_v32 = vmul.f32 %v1395_v40, %v5379_v57  ;;  %v1402_v60 = vmul.f32 %v1396_v27, %v5388_v26  ;;  %1416 = vst [vmem:[#allocation1 + $0x20] ss:$4 sm:$0xff] %v1400_v59  ;;  %v1509_v27 = vrot.slane %v5092_v63, 4 }
 0xa3e   :  { %1418 = vst [vmem:[#allocation1 + $0x21] ss:$4 sm:$0xff] %v1401_v32 }
 0xa3f   :  { %v1414_v46 = vld.sshfl [vmem:[#allocation1] sm:$0xff pattern:$0x73625140]  ;;  %1420 = vst [vmem:[#allocation1 + $0x22] ss:$4 sm:$0xff] %v1402_v60 }
 0xa40   :  { %1581 = vst [vmem:[#allocation1] ss:$4 sm:$0xff] %v5247_v15  ;;  %v1424_v49 = vsel %vm524_vm0, %v1414_v46, 0.0 }
 0xa41   :  { %1583 = vst [vmem:[#allocation1 + $0x1] ss:$4 sm:$0xff] %v5250_v11  ;;  %v1425_v55 = vrot.slane %v1424_v49, 4 }
 0xa42   :  { %1585 = vst [vmem:[#allocation1 + $0x2] ss:$4 sm:$0xff] %v5253_v13 }
 0xa43   :  { %v1426_v10 = vadd.f32 %v1425_v55, %v1424_v49 }
 0xa45   :  { %v1427_v22 = vrot.slane %v1426_v10, 2 }
 0xa46   :  { %v1421_v12 = vld.sshfl [vmem:[#allocation1 + $0x20] sm:$0xff pattern:$0x73625140] }
 0xa47   :  { %1588 = vst [vmem:[#allocation1 + $0x20] ss:$4 sm:$0xff] %v5256_v16  ;;  %v1431_v17 = vsel %vm524_vm0, %v1421_v12, 0.0  ;;  %v1428_v14 = vadd.f32 %v1427_v22, %v1426_v10 }
 0xa48   :  { %1590 = vst [vmem:[#allocation1 + $0x21] ss:$4 sm:$0xff] %v5262_v18  ;;  %v1432_v33 = vrot.slane %v1431_v17, 4 }
 0xa49   :  { %1592 = vst [vmem:[#allocation1 + $0x22] ss:$4 sm:$0xff] %v5265_v20  ;;  %v1429_v48 = vrot.slane %v1428_v14, 1 }
 0xa4a   :  { %v1433_v21 = vadd.f32 %v1432_v33, %v1431_v17 }
 0xa4b   :  { %v1430_v19 = vadd.f32 %v1429_v48, %v1428_v14 }
 0xa4c   :  { %v1434_v9 = vrot.slane %v1433_v21, 2 }
 0xa4e   :  { %v1435_v50 = vadd.f32 %v1434_v9, %v1433_v21 }
 0xa50   :  { %v1436_v51 = vrot.slane %v1435_v50, 1 }
 0xa52   :  { %v1437_v52 = vadd.f32 %v1436_v51, %v1435_v50 }
 0xa54   :  { %v1440_v58 = vsel %vm666_vm9, %v1437_v52, %v1430_v19 }
 0xa55   :  { %4191 = vmatmul.msk.f32.vlgmr.msra.gmra.mxu0 %vm274_vm10, %v1440_v58 }
 0xa56   :  { %1883 = vmatpush.msra.mxu0 %v5472_v56 }
 0xa58   :  { %1884 = vmatpush.msra.mxu0 %v5478_v39 }
 0xa5a   :  { %1885 = vmatpush.msra.mxu0 %v5484_v43 }
 0xa5c   :  { %1886 = vmatpush.msra.mxu0 %v5490_v44 }
 0xad2   :  { %v1460_v38 = vpop.f32.mrf.mxu0 }
 0xad3   :  { %1465 = vst.msk [vmem:[#allocation3 + $0x2] sm:$0x3] %vm1080_vm15, %v1460_v38  ;;  %4193 = vmatmul.msk.f32.vlgmr.msrb.gmra.mxu1 %vm274_vm10, %v1460_v38  ;;  %v5523_v38 = vld [vmem:[%s6093_s6 + $0x10] sm:$0xff] }
 0xad4   :  { %1949 = vmatpush.msrb.mxu1 %v5285_v61 }
 0xad6   :  { %1950 = vmatpush.msrb.mxu1 %v5290_v62 }
 0xad8   :  { %1951 = vmatpush.msrb.mxu1 %v5296_v7 }
 0xada   :  { %1952 = vmatpush.msrb.mxu1 %v5302_v8 }
 0xb50   :  { %v1506_v28 = vpop.f32.mrf.mxu1 }
 0xb51   :  { %v1507_v40 = vadd.f32 %v1506_v28, %v1483_v24 }
 0xb53   :  { %v1511_v59 = vadd.f32 %v1509_v27, %v1507_v40 }
 0xb55   :  { %v1512_v32 = vadd.f32 %v5272_v23, %v1511_v59 }
 0xb57   :  { %4349 = vtanh.f32 %v1512_v32  ;;  %v4194_v46 = vmul.f32 -1.442695, %v1512_v32  ;;  %v1593_v32 = vld.sshfl [vmem:[#allocation1 + $0x20] sm:$0xff pattern:$0x73625140] }
 0xb59   :  { %4351 = vpow2.f32 %v4194_v46 }
 0xb5d   :  { %v4350_v60 = vpop.eup %4349 }
 0xb5e   :  { %1535 = vrot.lane.b32.xlu2 %v4350_v60, %s4800_s17 }
 0xb5f   :  { %v4352_v61 = vpop.eup %4351 }
 0xb60   :  { %v1516_v62 = vadd.f32 1.0, %v4352_v61 }
 0xb62   :  { %4353 = vrcp.f32 %v1516_v62  ;;  %v1528_v12 = vand.u32 2147483648, %v1516_v62  ;;  %vm1522_vm6 = vweird.f32 %v1516_v62  ;;  %v1526_v22 = vand.u32 2147483647, %v1516_v62 }
 0xb64   :  { %v1529_v17 = vor.u32 1.1754944e-38, %v1528_v12  ;;  %vm1527_vm8 = vcmp.eq.f32.partialorder %v1526_v22, 8.507059e+37  ;;  %v5556_v12 = vld [vmem:[#allocation12] sm:$0xff] }
 0xb65   :  { %6100 = vst [vmem:[#allocation35_spill] sm:$0xff] %v5556_v12 }
 0xb68   :  { %v4354_v7 = vpop.eup %4353 }
 0xb69   :  { %v1518_v49 = vmul.f32 %v4354_v7, %v1516_v62  ;;  %vm1523_vm5 = vweird.f32 %v4354_v7 }
 0xb6a   :  { %vm1524_vm7 = vmor %vm1522_vm6, %vm1523_vm5 }
 0xb6b   :  { %v1519_v8 = vsub.f32 1.0, %v1518_v49 }
 0xb6d   :  { %v1520_v55 = vmul.f32 %v4354_v7, %v1519_v8  ;;  %v5543_v8 = vld [vmem:[#allocation12 + $0x18] sm:$0xff] }
 0xb6f   :  { %v1521_v10 = vadd.f32 %v4354_v7, %v1520_v55  ;;  %v5548_v55 = vld [vmem:[#allocation12 + $0x10] sm:$0xff] }
 0xb71   :  { %v1525_v23 = vsel %vm1524_vm7, %v4354_v7, %v1521_v10  ;;  %v5553_v10 = vld [vmem:[#allocation12 + $0x8] sm:$0xff] }
 0xb72   :  { %v1530_v14 = vsel %vm1527_vm8, %v1529_v17, %v1525_v23  ;;  %6099 = vst [vmem:[#allocation34_spill] sm:$0xff] %v5553_v10 }
 0xb73   :  { %v1533_v9 = vmul.f32 %v1530_v14, %v5421_v45  ;;  %v5516_v45 = vld [vmem:[%s6093_s6 + $0x18] sm:$0xff] }
 0xbb8   :  { %v1536_v33 = vpop.permute.xlu2 %1535 }
 0xbb9   :  { %v1538_v21 = vmul.f32 %v1536_v33, %v1530_v14 }
 0xbbb   :  { %1540 = vrot.lane.b32.xlu0 %v1538_v21, %s4799_s25 }
 0xc2d   :  { %v1541_v48 = vpop.permute.xlu0 %1540 }
 0xc2e   :  { %v5504_v50 = vadd.f32 %v1541_v48, %v1533_v9 }
 0xc30   :  { %4355 = vtanh.f32 %v5504_v50 }
 0xc36   :  { %v4356_v51 = vpop.eup %4355 }
 0xc37   :  { %1546 = vrot.lane.b32.xlu1 %v4356_v51, %s4800_s17 }
 0xca9   :  { %v1547_v19 = vpop.permute.xlu1 %1546 }
 0xcaa   :  { %v1549_v52 = vmul.f32 %v1547_v19, %v1530_v14 }
 0xcac   :  { %1551 = vrot.lane.b32.xlu2 %v1549_v52, %s4799_s25 }
 0xd06   :  { %v1552_v58 = vpop.permute.xlu2 %1551 }
 0xd07   :  { %1846 = vst.msk [vmem:[#allocation2 + $0x4] sm:$0x3] %vm1080_vm15, %v1552_v58  ;;  %4195 = vmatmul.msk.f32.vlgmr.msrb.gmra.mxu0 %vm274_vm10, %v1552_v58  ;;  %4199 = vmatmul.msk.f32.vlgmr.msra.gmra.mxu3 %vm274_vm10, %v1552_v58 }
 0xd08   :  { %2219 = vmatpush.msrb.mxu0 %v5356_v29  ;;  %2622 = vmatpush.msra.mxu3 %v5516_v45  ;;  %v5530_v29 = vld [vmem:[%s6093_s6 + $0x8] sm:$0xff] }
 0xd0a   :  { %2220 = vmatpush.msrb.mxu0 %v5358_v54  ;;  %2623 = vmatpush.msra.mxu3 %v5523_v38  ;;  %v5537_v54 = vld [vmem:[%s6093_s6] sm:$0xff] }
 0xd0c   :  { %2221 = vmatpush.msrb.mxu0 %v5365_v6  ;;  %2624 = vmatpush.msra.mxu3 %v5530_v29  ;;  %v1586_v6 = vld.sshfl [vmem:[#allocation1] sm:$0xff pattern:$0x73625140] }
 0xd0e   :  { %2222 = vmatpush.msrb.mxu0 %v5373_v30  ;;  %2625 = vmatpush.msra.mxu3 %v5537_v54 }
 0xd84   :  { %v1572_v24 = vpop.f32.mrf.mxu0 }
 0xd85   :  { %v1576_v28 = vrot.slane %v1572_v24, 1  ;;  %v1577_v40 = vperm.slane %v1572_v24, 0 }
 0xd87   :  { %v1578_v27 = vperm.slane %v1576_v28, 0  ;;  %v1596_v59 = vmul.f32 %v1586_v6, %v1577_v40 }
 0xd89   :  { %v1597_v60 = vmul.f32 %v1593_v32, %v1578_v27  ;;  %v1600_v46 = vrot.slane %v1596_v59, 2  ;;  %v1601_v61 = vrot.slane %v1596_v59, 4  ;;  %1604 = vst [vmem:[#allocation1] ss:$4 sm:$0xff] %v1596_v59 }
 0xd8b   :  { %v1602_v62 = vrot.slane %v1597_v60, 2  ;;  %v1603_v30 = vrot.slane %v1597_v60, 4  ;;  %1606 = vst [vmem:[#allocation1 + $0x1] ss:$4 sm:$0xff] %v1600_v46 }
 0xd8c   :  { %1608 = vst [vmem:[#allocation1 + $0x2] ss:$4 sm:$0xff] %v1601_v61 }
 0xd8d   :  { %1610 = vst [vmem:[#allocation1 + $0x3] ss:$4 sm:$0xff] %v1597_v60 }
 0xd8e   :  { %1612 = vst [vmem:[#allocation1 + $0x20] ss:$4 sm:$0xff] %v1602_v62 }
 0xd8f   :  { %1614 = vst [vmem:[#allocation1 + $0x21] ss:$4 sm:$0xff] %v1603_v30 }
 0xd94   :  { %v1615_v7 = vld.sshfl [vmem:[#allocation1] sm:$0xff pattern:$0x73625140] }
 0xd95   :  { %1617 = vst [vmem:[#allocation1] ss:$4 sm:$0xff] %v5139_v34  ;;  %4196 = vmatmul.msk.f32.vlgmr.msra.gmra.mxu2 %vm274_vm10, %v1615_v7 }
 0xd96   :  { %v1616_v49 = vld.sshfl [vmem:[#allocation1 + $0x20] sm:$0xff pattern:$0x73625140]  ;;  %1619 = vst [vmem:[#allocation1 + $0x1] ss:$4 sm:$0xff] %v5142_v35  ;;  %2410 = vmatpush.msra.mxu2 %v5543_v8 }
 0xd97   :  { %1621 = vst [vmem:[#allocation1 + $0x2] ss:$4 sm:$0xff] %v5145_v36 }
 0xd98   :  { %1623 = vst [vmem:[#allocation1 + $0x3] ss:$4 sm:$0xff] %v5147_v37  ;;  %2411 = vmatpush.msra.mxu2 %v5548_v55 }
 0xd99   :  { %1625 = vst [vmem:[#allocation1 + $0x20] ss:$4 sm:$0xff] %v5165_v41 }
 0xd9a   :  { %1627 = vst [vmem:[#allocation1 + $0x21] ss:$4 sm:$0xff] %v5168_v42  ;;  %2412 = vmatpush.msra.mxu2 %v5553_v10 }
 0xd9c   :  { %2413 = vmatpush.msra.mxu2 %v5556_v12 }
 0xd9d   :  { %4197 = vmatmul.msk.f32.gmra.mxu2 %vm274_vm10, %v1616_v49 }
 0xd9f   :  { %v1628_v22 = vld.sshfl [vmem:[#allocation1] sm:$0xff pattern:$0x73625140] }
 0xda1   :  { %v1629_v9 = vld.sshfl [vmem:[#allocation1 + $0x20] sm:$0xff pattern:$0x73625140] }
 0xe18   :  { %v1653_v23 = vpop.f32.mrf.mxu2 }
 0xe19   :  { %v1654_v17 = vadd.f32 %v1653_v23, %v1628_v22 }
 0xe1b   :  { %v1661_v33 = vrot.slane %v1654_v17, 2  ;;  %v1662_v14 = vrot.slane %v1654_v17, 4  ;;  %v1663_v21 = vrot.slane %v1654_v17, 6  ;;  %1669 = vst [vmem:[#allocation1] ss:$4 sm:$0xff] %v1654_v17 }
 0xe1d   :  { %1671 = vst [vmem:[#allocation1 + $0x1] ss:$4 sm:$0xff] %v1661_v33 }
 0xe1e   :  { %1673 = vst [vmem:[#allocation1 + $0x2] ss:$4 sm:$0xff] %v1662_v14 }
 0xe1f   :  { %1676 = vst [vmem:[#allocation1 + $0x20] ss:$4 sm:$0xff] %v1663_v21 }
 0xe20   :  { %v1656_v48 = vpop.f32.mrf.mxu2 }
 0xe21   :  { %v1657_v51 = vadd.f32 %v1656_v48, %v1629_v9 }
 0xe23   :  { %v1664_v19 = vrot.slane %v1657_v51, 2  ;;  %1678 = vst [vmem:[#allocation1 + $0x21] ss:$4 sm:$0xff] %v1657_v51 }
 0xe25   :  { %v1674_v52 = vld.sshfl [vmem:[#allocation1] sm:$0xff pattern:$0x73625140]  ;;  %1680 = vst [vmem:[#allocation1 + $0x22] ss:$4 sm:$0xff] %v1664_v19 }
 0xe26   :  { %v1684_v58 = vsel %vm524_vm0, %v1674_v52, -inf }
 0xe27   :  { %v1685_v24 = vrot.slane %v1684_v58, 4 }
 0xe29   :  { %v1686_v28 = vmax.f32 %v1684_v58, %v1685_v24 }
 0xe2b   :  { %v1687_v40 = vrot.slane %v1686_v28, 2 }
 0xe2c   :  { %v1681_v6 = vld.sshfl [vmem:[#allocation1 + $0x20] sm:$0xff pattern:$0x73625140] }
 0xe2d   :  { %v1688_v27 = vmax.f32 %v1686_v28, %v1687_v40  ;;  %v1691_v59 = vsel %vm524_vm0, %v1681_v6, -inf }
 0xe2e   :  { %v1692_v32 = vrot.slane %v1691_v59, 4 }
 0xe2f   :  { %v1689_v60 = vrot.slane %v1688_v27, 1 }
 0xe30   :  { %v1693_v46 = vmax.f32 %v1691_v59, %v1692_v32 }
 0xe31   :  { %v1690_v61 = vmax.f32 %v1688_v27, %v1689_v60 }
 0xe32   :  { %v1694_v62 = vrot.slane %v1693_v46, 2 }
 0xe33   :  { %v1700_v30 = vrot.slane %v1690_v61, 2  ;;  %v1701_v7 = vrot.slane %v1690_v61, 4  ;;  %v1708_v49 = vsub.f32 %v1654_v17, %v1690_v61 }
 0xe34   :  { %v1695_v22 = vmax.f32 %v1693_v46, %v1694_v62 }
 0xe35   :  { %v1709_v23 = vsub.f32 %v1661_v33, %v1700_v30  ;;  %v1710_v9 = vsub.f32 %v1662_v14, %v1701_v7  ;;  %v1714_v48 = vmul.f32 1.442695, %v1708_v49 }
 0xe36   :  { %v1696_v52 = vrot.slane %v1695_v22, 1 }
 0xe37   :  { %4357 = vpow2.f32 %v1714_v48  ;;  %v1716_v58 = vmul.f32 1.442695, %v1709_v23  ;;  %v1718_v24 = vmul.f32 1.442695, %v1710_v9 }
 0xe38   :  { %v1697_v5 = vmax.f32 %v1695_v22, %v1696_v52 }
 0xe39   :  { %4359 = vpow2.f32 %v1716_v58 }
 0xe3a   :  { %4361 = vpow2.f32 %v1718_v24  ;;  %v1702_v28 = vrot.slane %v1697_v5, 2  ;;  %v1703_v40 = vrot.slane %v1697_v5, 4  ;;  %v1711_v6 = vsub.f32 %v1663_v21, %v1697_v5 }
 0xe3c   :  { %v1712_v59 = vsub.f32 %v1657_v51, %v1702_v28  ;;  %v1713_v27 = vsub.f32 %v1664_v19, %v1703_v40  ;;  %v1720_v32 = vmul.f32 1.442695, %v1711_v6 }
 0xe3d   :  { %v4358_v60 = vpop.eup %4357 }
 0xe3e   :  { %1732 = vst [vmem:[#allocation1] ss:$4 sm:$0xff] %v4358_v60  ;;  %4363 = vpow2.f32 %v1720_v32  ;;  %v1722_v17 = vmul.f32 1.442695, %v1712_v59  ;;  %v1724_v33 = vmul.f32 1.442695, %v1713_v27 }
 0xe3f   :  { %v4360_v14 = vpop.eup %4359 }
 0xe40   :  { %v4362_v46 = vpop.eup %4361  ;;  %1734 = vst [vmem:[#allocation1 + $0x1] ss:$4 sm:$0xff] %v4360_v14  ;;  %4365 = vpow2.f32 %v1722_v17 }
 0xe41   :  { %1736 = vst [vmem:[#allocation1 + $0x2] ss:$4 sm:$0xff] %v4362_v46  ;;  %4367 = vpow2.f32 %v1724_v33 }
 0xe44   :  { %v4364_v61 = vpop.eup %4363 }
 0xe45   :  { %1739 = vst [vmem:[#allocation1 + $0x20] ss:$4 sm:$0xff] %v4364_v61 }
 0xe46   :  { %v4366_v62 = vpop.eup %4365 }
 0xe47   :  { %v4368_v30 = vpop.eup %4367  ;;  %1741 = vst [vmem:[#allocation1 + $0x21] ss:$4 sm:$0xff] %v4366_v62 }
 0xe48   :  { %v1737_v5 = vld.sshfl [vmem:[#allocation1] sm:$0xff pattern:$0x73625140]  ;;  %1743 = vst [vmem:[#allocation1 + $0x22] ss:$4 sm:$0xff] %v4368_v30 }
 0xe49   :  { %v1747_v21 = vsel %vm524_vm0, %v1737_v5, 0.0 }
 0xe4a   :  { %v1748_v51 = vrot.slane %v1747_v21, 4 }
 0xe4c   :  { %v1749_v19 = vadd.f32 %v1748_v51, %v1747_v21 }
 0xe4e   :  { %v1750_v7 = vrot.slane %v1749_v19, 2 }
 0xe4f   :  { %v1744_v49 = vld.sshfl [vmem:[#allocation1 + $0x20] sm:$0xff pattern:$0x73625140] }
 0xe50   :  { %v1751_v22 = vadd.f32 %v1750_v7, %v1749_v19  ;;  %v1754_v23 = vsel %vm524_vm0, %v1744_v49, 0.0 }
 0xe51   :  { %v1755_v9 = vrot.slane %v1754_v23, 4 }
 0xe52   :  { %v1752_v48 = vrot.slane %v1751_v22, 1 }
 0xe53   :  { %v1756_v52 = vadd.f32 %v1755_v9, %v1754_v23 }
 0xe54   :  { %v1753_v58 = vadd.f32 %v1752_v48, %v1751_v22 }
 0xe55   :  { %v1757_v24 = vrot.slane %v1756_v52, 2 }
 0xe56   :  { %4369 = vrcp.f32 %v1753_v58 }
 0xe57   :  { %v1758_v28 = vadd.f32 %v1757_v24, %v1756_v52 }
 0xe59   :  { %v1759_v40 = vrot.slane %v1758_v28, 1 }
 0xe5b   :  { %v1760_v6 = vadd.f32 %v1759_v40, %v1758_v28 }
 0xe5c   :  { %v4370_v59 = vpop.eup %4369 }
 0xe5d   :  { %v1765_v27 = vrot.slane %v4370_v59, 2  ;;  %v1766_v32 = vrot.slane %v4370_v59, 4  ;;  %v1773_v17 = vmul.f32 %v4370_v59, %v4358_v60  ;;  %4371 = vrcp.f32 %v1760_v6 }
 0xe5f   :  { %v1774_v33 = vmul.f32 %v4360_v14, %v1765_v27  ;;  %v1775_v5 = vmul.f32 %v4362_v46, %v1766_v32  ;;  %v1779_v21 = vmul.f32 %v1773_v17, %v5354_v25 }
 0xe61   :  { %v1780_v51 = vmul.f32 %v1774_v33, %v5363_v53  ;;  %v1781_v19 = vmul.f32 %v1775_v5, %v5368_v47  ;;  %1791 = vst [vmem:[#allocation1] ss:$4 sm:$0xff] %v1779_v21 }
 0xe63   :  { %v4372_v7 = vpop.eup %4371  ;;  %1793 = vst [vmem:[#allocation1 + $0x1] ss:$4 sm:$0xff] %v1780_v51 }
 0xe64   :  { %1795 = vst [vmem:[#allocation1 + $0x2] ss:$4 sm:$0xff] %v1781_v19  ;;  %v1767_v49 = vrot.slane %v4372_v7, 2  ;;  %v1768_v22 = vrot.slane %v4372_v7, 4  ;;  %v1776_v23 = vmul.f32 %v4372_v7, %v4364_v61  ;;  %v5589_v7 = vld [vmem:[%s6035_s9 + $0x18] sm:$0xff] }
 0xe66   :  { %v1777_v9 = vmul.f32 %v4366_v62, %v1767_v49  ;;  %v1778_v48 = vmul.f32 %v4368_v30, %v1768_v22  ;;  %v1782_v60 = vmul.f32 %v1776_v23, %v5384_v31  ;;  %v5595_v49 = vld [vmem:[%s6035_s9 + $0x10] sm:$0xff]  ;;  %v5601_v22 = vld [vmem:[%s6035_s9 + $0x8] sm:$0xff]  ;;  %v5607_v23 = vld [vmem:[%s6035_s9] sm:$0xff] }
 0xe68   :  { %v1783_v14 = vmul.f32 %v1777_v9, %v5379_v57  ;;  %v1784_v46 = vmul.f32 %v1778_v48, %v5388_v26  ;;  %1798 = vst [vmem:[#allocation1 + $0x20] ss:$4 sm:$0xff] %v1782_v60  ;;  %v1865_v9 = vpop.f32.mrf.mxu3 }
 0xe6a   :  { %1800 = vst [vmem:[#allocation1 + $0x21] ss:$4 sm:$0xff] %v1783_v14  ;;  %v1891_v14 = vrot.slane %v5092_v63, 6 }
 0xe6b   :  { %v1796_v52 = vld.sshfl [vmem:[#allocation1] sm:$0xff pattern:$0x73625140]  ;;  %1802 = vst [vmem:[#allocation1 + $0x22] ss:$4 sm:$0xff] %v1784_v46 }
 0xe6c   :  { %1963 = vst [vmem:[#allocation1] ss:$4 sm:$0xff] %v5247_v15  ;;  %v1806_v58 = vsel %vm524_vm0, %v1796_v52, 0.0  ;;  %v5614_v52 = vld [vmem:[%s6034_s8] ss:$0 sm:$0xff] }
 0xe6d   :  { %1965 = vst [vmem:[#allocation1 + $0x1] ss:$4 sm:$0xff] %v5250_v11  ;;  %v1807_v24 = vrot.slane %v1806_v58, 4 }
 0xe6e   :  { %1967 = vst [vmem:[#allocation1 + $0x2] ss:$4 sm:$0xff] %v5253_v13 }
 0xe6f   :  { %v1808_v61 = vadd.f32 %v1807_v24, %v1806_v58 }
 0xe71   :  { %v1809_v30 = vrot.slane %v1808_v61, 2 }
 0xe72   :  { %v1803_v62 = vld.sshfl [vmem:[#allocation1 + $0x20] sm:$0xff pattern:$0x73625140] }
 0xe73   :  { %1970 = vst [vmem:[#allocation1 + $0x20] ss:$4 sm:$0xff] %v5256_v16  ;;  %v1813_v28 = vsel %vm524_vm0, %v1803_v62, 0.0  ;;  %v1810_v6 = vadd.f32 %v1809_v30, %v1808_v61 }
 0xe74   :  { %1972 = vst [vmem:[#allocation1 + $0x21] ss:$4 sm:$0xff] %v5262_v18  ;;  %v1814_v40 = vrot.slane %v1813_v28, 4 }
 0xe75   :  { %1974 = vst [vmem:[#allocation1 + $0x22] ss:$4 sm:$0xff] %v5265_v20  ;;  %v1811_v32 = vrot.slane %v1810_v6, 1 }
 0xe76   :  { %v1815_v59 = vadd.f32 %v1814_v40, %v1813_v28 }
 0xe77   :  { %v1812_v5 = vadd.f32 %v1811_v32, %v1810_v6 }
 0xe78   :  { %v1816_v27 = vrot.slane %v1815_v59, 2 }
 0xe7a   :  { %v1817_v17 = vadd.f32 %v1816_v27, %v1815_v59 }
 0xe7c   :  { %v1818_v33 = vrot.slane %v1817_v17, 1 }
 0xe7e   :  { %v1819_v21 = vadd.f32 %v1818_v33, %v1817_v17 }
 0xe80   :  { %v1822_v51 = vsel %vm666_vm9, %v1819_v21, %v1812_v5 }
 0xe81   :  { %4198 = vmatmul.msk.f32.vlgmr.msra.gmra.mxu1 %vm274_vm10, %v1822_v51 }
 0xe82   :  { %2265 = vmatpush.msra.mxu1 %v5472_v56 }
 0xe84   :  { %2266 = vmatpush.msra.mxu1 %v5478_v39 }
 0xe86   :  { %2267 = vmatpush.msra.mxu1 %v5484_v43 }
 0xe88   :  { %2268 = vmatpush.msra.mxu1 %v5490_v44 }
 0xefe   :  { %v1842_v19 = vpop.f32.mrf.mxu1 }
 0xeff   :  { %1847 = vst.msk [vmem:[#allocation3 + $0x4] sm:$0x3] %vm1080_vm15, %v1842_v19  ;;  %4200 = vmatmul.msk.f32.vlgmr.msra.gmra.mxu0 %vm274_vm10, %v1842_v19 }
 0xf00   :  { %2329 = vmatpush.msra.mxu0 %v5589_v7 }
 0xf02   :  { %2330 = vmatpush.msra.mxu0 %v5595_v49 }
 0xf04   :  { %2331 = vmatpush.msra.mxu0 %v5601_v22 }
 0xf06   :  { %2332 = vmatpush.msra.mxu0 %v5607_v23 }
 0xf7c   :  { %v1888_v48 = vpop.f32.mrf.mxu0 }
 0xf7d   :  { %v1889_v60 = vadd.f32 %v1888_v48, %v1865_v9 }
 0xf7f   :  { %v1893_v46 = vadd.f32 %v1891_v14, %v1889_v60 }
 0xf81   :  { %v1894_v58 = vadd.f32 %v5614_v52, %v1893_v46 }
 0xf83   :  { %4373 = vtanh.f32 %v1894_v58  ;;  %v4201_v61 = vmul.f32 -1.442695, %v1894_v58 }
 0xf85   :  { %4375 = vpow2.f32 %v4201_v61  ;;  %v5636_v61 = vld [vmem:[#allocation11 + $0x8] sm:$0xff] }
 0xf89   :  { %v4374_v24 = vpop.eup %4373 }
 0xf8a   :  { %1917 = vrot.lane.b32.xlu0 %v4374_v24, %s4800_s17  ;;  %v5632_v24 = vld [vmem:[#allocation11 + $0x10] sm:$0xff] }
 0xf8b   :  { %v4376_v62 = vpop.eup %4375 }
 0xf8c   :  { %v1898_v30 = vadd.f32 1.0, %v4376_v62  ;;  %v5640_v62 = vld [vmem:[#allocation11] sm:$0xff] }
 0xf8e   :  { %4377 = vrcp.f32 %v1898_v30  ;;  %v1910_v27 = vand.u32 2147483648, %v1898_v30  ;;  %vm1904_vm12 = vweird.f32 %v1898_v30  ;;  %v1908_v32 = vand.u32 2147483647, %v1898_v30 }
 0xf90   :  { %v1911_v33 = vor.u32 1.1754944e-38, %v1910_v27  ;;  %vm1909_vm14 = vcmp.eq.f32.partialorder %v1908_v32, 8.507059e+37  ;;  %v1975_v27 = vld.sshfl [vmem:[#allocation1 + $0x20] sm:$0xff pattern:$0x73625140] }
 0xf94   :  { %v4378_v28 = vpop.eup %4377 }
 0xf95   :  { %v1900_v40 = vmul.f32 %v4378_v28, %v1898_v30  ;;  %vm1905_vm11 = vweird.f32 %v4378_v28 }
 0xf96   :  { %vm1906_vm13 = vmor %vm1904_vm12, %vm1905_vm11 }
 0xf97   :  { %v1901_v63 = vsub.f32 1.0, %v1900_v40 }
 0xf99   :  { %v1902_v6 = vmul.f32 %v4378_v28, %v1901_v63  ;;  %v1968_v63 = vld.sshfl [vmem:[#allocation1] sm:$0xff pattern:$0x73625140] }
 0xf9b   :  { %v1903_v59 = vadd.f32 %v4378_v28, %v1902_v6 }
 0xf9d   :  { %v1907_v17 = vsel %vm1906_vm13, %v4378_v28, %v1903_v59 }
 0xf9e   :  { %v1912_v21 = vsel %vm1909_vm14, %v1911_v33, %v1907_v17 }
 0xf9f   :  { %v1915_v19 = vmul.f32 %v1912_v21, %v5504_v50  ;;  %v5628_v50 = vld [vmem:[#allocation11 + $0x18] sm:$0xff] }
 0xffc   :  { %v1918_v5 = vpop.permute.xlu0 %1917 }
 0xffd   :  { %v1920_v51 = vmul.f32 %v1918_v5, %v1912_v21 }
 0xfff   :  { %1922 = vrot.lane.b32.xlu1 %v1920_v51, %s4799_s25 }
0x1071   :  { %v1923_v9 = vpop.permute.xlu1 %1922 }
0x1072   :  { %v5620_v48 = vadd.f32 %v1923_v9, %v1915_v19 }
0x1074   :  { %4379 = vtanh.f32 %v5620_v48 }
0x107a   :  { %v4380_v60 = vpop.eup %4379 }
0x107b   :  { %1928 = vrot.lane.b32.xlu2 %v4380_v60, %s4800_s17 }
0x10d5   :  { %v1929_v14 = vpop.permute.xlu2 %1928 }
0x10d6   :  { %v1931_v46 = vmul.f32 %v1929_v14, %v1912_v21 }
0x10d8   :  { %1933 = vrot.lane.b32.xlu0 %v1931_v46, %s4799_s25 }
0x114a   :  { %v1934_v58 = vpop.permute.xlu0 %1933 }
0x114b   :  { %2228 = vst.msk [vmem:[#allocation2 + $0x6] sm:$0x3] %vm1080_vm15, %v1934_v58  ;;  %4202 = vmatmul.msk.f32.vlgmr.msrb.gmra.mxu1 %vm274_vm10, %v1934_v58  ;;  %4206 = vmatmul.msk.f32.vlgmr.msrb.gmra.mxu2 %vm274_vm10, %v1934_v58 }
0x114c   :  { %2599 = vmatpush.msrb.mxu1 %v5628_v50  ;;  %3005 = vmatpush.msrb.mxu2 %v5516_v45 }
0x114e   :  { %2600 = vmatpush.msrb.mxu1 %v5632_v24  ;;  %3006 = vmatpush.msrb.mxu2 %v5523_v38 }
0x1150   :  { %2601 = vmatpush.msrb.mxu1 %v5636_v61  ;;  %3007 = vmatpush.msrb.mxu2 %v5530_v29 }
0x1152   :  { %2602 = vmatpush.msrb.mxu1 %v5640_v62  ;;  %3008 = vmatpush.msrb.mxu2 %v5537_v54 }
0x11c8   :  { %v1954_v30 = vpop.f32.mrf.mxu1 }
0x11c9   :  { %v1958_v28 = vrot.slane %v1954_v30, 1  ;;  %v1959_v40 = vperm.slane %v1954_v30, 0 }
0x11cb   :  { %v1960_v6 = vperm.slane %v1958_v28, 0  ;;  %v1978_v59 = vmul.f32 %v1968_v63, %v1959_v40 }
0x11cd   :  { %v1979_v32 = vmul.f32 %v1975_v27, %v1960_v6  ;;  %v1982_v17 = vrot.slane %v1978_v59, 2  ;;  %v1983_v33 = vrot.slane %v1978_v59, 4  ;;  %1986 = vst [vmem:[#allocation1] ss:$4 sm:$0xff] %v1978_v59 }
0x11cf   :  { %v1984_v5 = vrot.slane %v1979_v32, 2  ;;  %v1985_v21 = vrot.slane %v1979_v32, 4  ;;  %1988 = vst [vmem:[#allocation1 + $0x1] ss:$4 sm:$0xff] %v1982_v17 }
0x11d0   :  { %1990 = vst [vmem:[#allocation1 + $0x2] ss:$4 sm:$0xff] %v1983_v33 }
0x11d1   :  { %1992 = vst [vmem:[#allocation1 + $0x3] ss:$4 sm:$0xff] %v1979_v32 }
0x11d2   :  { %1994 = vst [vmem:[#allocation1 + $0x20] ss:$4 sm:$0xff] %v1984_v5 }
0x11d3   :  { %1996 = vst [vmem:[#allocation1 + $0x21] ss:$4 sm:$0xff] %v1985_v21 }
0x11d8   :  { %v1997_v51 = vld.sshfl [vmem:[#allocation1] sm:$0xff pattern:$0x73625140] }
0x11d9   :  { %1999 = vst [vmem:[#allocation1] ss:$4 sm:$0xff] %v5139_v34  ;;  %4203 = vmatmul.msk.f32.vlgmr.msrb.gmra.mxu3 %vm274_vm10, %v1997_v51 }
0x11da   :  { %v1998_v19 = vld.sshfl [vmem:[#allocation1 + $0x20] sm:$0xff pattern:$0x73625140]  ;;  %2001 = vst [vmem:[#allocation1 + $0x1] ss:$4 sm:$0xff] %v5142_v35  ;;  %2793 = vmatpush.msrb.mxu3 %v5543_v8 }
0x11db   :  { %2003 = vst [vmem:[#allocation1 + $0x2] ss:$4 sm:$0xff] %v5145_v36 }
0x11dc   :  { %2005 = vst [vmem:[#allocation1 + $0x3] ss:$4 sm:$0xff] %v5147_v37  ;;  %2794 = vmatpush.msrb.mxu3 %v5548_v55 }
0x11dd   :  { %2007 = vst [vmem:[#allocation1 + $0x20] ss:$4 sm:$0xff] %v5165_v41 }
0x11de   :  { %2009 = vst [vmem:[#allocation1 + $0x21] ss:$4 sm:$0xff] %v5168_v42  ;;  %2795 = vmatpush.msrb.mxu3 %v5553_v10 }
0x11e0   :  { %2796 = vmatpush.msrb.mxu3 %v5556_v12 }
0x11e1   :  { %4204 = vmatmul.msk.f32.gmra.mxu3 %vm274_vm10, %v1998_v19 }
0x11e3   :  { %v2010_v9 = vld.sshfl [vmem:[#allocation1] sm:$0xff pattern:$0x73625140] }
0x11e5   :  { %v2011_v28 = vld.sshfl [vmem:[#allocation1 + $0x20] sm:$0xff pattern:$0x73625140] }
0x125c   :  { %v2035_v60 = vpop.f32.mrf.mxu3 }
0x125d   :  { %v2036_v14 = vadd.f32 %v2035_v60, %v2010_v9 }
0x125f   :  { %v2043_v46 = vrot.slane %v2036_v14, 2  ;;  %v2044_v58 = vrot.slane %v2036_v14, 4  ;;  %v2045_v30 = vrot.slane %v2036_v14, 6  ;;  %2051 = vst [vmem:[#allocation1] ss:$4 sm:$0xff] %v2036_v14 }
0x1261   :  { %2053 = vst [vmem:[#allocation1 + $0x1] ss:$4 sm:$0xff] %v2043_v46 }
0x1262   :  { %2055 = vst [vmem:[#allocation1 + $0x2] ss:$4 sm:$0xff] %v2044_v58 }
0x1263   :  { %2058 = vst [vmem:[#allocation1 + $0x20] ss:$4 sm:$0xff] %v2045_v30 }
0x1264   :  { %v2038_v40 = vpop.f32.mrf.mxu3 }
0x1265   :  { %v2039_v63 = vadd.f32 %v2038_v40, %v2011_v28 }
0x1267   :  { %v2046_v6 = vrot.slane %v2039_v63, 2  ;;  %2060 = vst [vmem:[#allocation1 + $0x21] ss:$4 sm:$0xff] %v2039_v63 }
0x1269   :  { %v2056_v59 = vld.sshfl [vmem:[#allocation1] sm:$0xff pattern:$0x73625140]  ;;  %2062 = vst [vmem:[#allocation1 + $0x22] ss:$4 sm:$0xff] %v2046_v6 }
0x126a   :  { %v2066_v27 = vsel %vm524_vm0, %v2056_v59, -inf }
0x126b   :  { %v2067_v32 = vrot.slane %v2066_v27, 4 }
0x126d   :  { %v2068_v17 = vmax.f32 %v2066_v27, %v2067_v32 }
0x126f   :  { %v2069_v33 = vrot.slane %v2068_v17, 2 }
0x1270   :  { %v2063_v5 = vld.sshfl [vmem:[#allocation1 + $0x20] sm:$0xff pattern:$0x73625140] }
0x1271   :  { %v2070_v21 = vmax.f32 %v2068_v17, %v2069_v33  ;;  %v2073_v51 = vsel %vm524_vm0, %v2063_v5, -inf }
0x1272   :  { %v2074_v19 = vrot.slane %v2073_v51, 4 }
0x1273   :  { %v2071_v9 = vrot.slane %v2070_v21, 1 }
0x1274   :  { %v2075_v60 = vmax.f32 %v2073_v51, %v2074_v19 }
0x1275   :  { %v2072_v4 = vmax.f32 %v2070_v21, %v2071_v9 }
0x1276   :  { %v2076_v3 = vrot.slane %v2075_v60, 2 }
0x1277   :  { %v2082_v1 = vrot.slane %v2072_v4, 2  ;;  %v2083_v28 = vrot.slane %v2072_v4, 4  ;;  %v2090_v40 = vsub.f32 %v2036_v14, %v2072_v4 }
0x1278   :  { %v2077_v2 = vmax.f32 %v2075_v60, %v2076_v3 }
0x1279   :  { %v2091_v12 = vsub.f32 %v2043_v46, %v2082_v1  ;;  %v2092_v10 = vsub.f32 %v2044_v58, %v2083_v28  ;;  %v2096_v42 = vmul.f32 1.442695, %v2090_v40 }
0x127a   :  { %v2078_v59 = vrot.slane %v2077_v2, 1 }
0x127b   :  { %4381 = vpow2.f32 %v2096_v42  ;;  %v2098_v27 = vmul.f32 1.442695, %v2091_v12  ;;  %v2100_v32 = vmul.f32 1.442695, %v2092_v10 }
0x127c   :  { %v2079_v41 = vmax.f32 %v2077_v2, %v2078_v59 }
0x127d   :  { %4383 = vpow2.f32 %v2098_v27 }
0x127e   :  { %4385 = vpow2.f32 %v2100_v32  ;;  %v2084_v17 = vrot.slane %v2079_v41, 2  ;;  %v2085_v33 = vrot.slane %v2079_v41, 4  ;;  %v2093_v5 = vsub.f32 %v2045_v30, %v2079_v41 }
0x1280   :  { %v2094_v51 = vsub.f32 %v2039_v63, %v2084_v17  ;;  %v2095_v21 = vsub.f32 %v2046_v6, %v2085_v33  ;;  %v2102_v19 = vmul.f32 1.442695, %v2093_v5 }
0x1281   :  { %v4382_v9 = vpop.eup %4381 }
0x1282   :  { %2114 = vst [vmem:[#allocation1] ss:$4 sm:$0xff] %v4382_v9  ;;  %4387 = vpow2.f32 %v2102_v19  ;;  %v2104_v3 = vmul.f32 1.442695, %v2094_v51  ;;  %v2106_v1 = vmul.f32 1.442695, %v2095_v21 }
0x1283   :  { %v4384_v4 = vpop.eup %4383 }
0x1284   :  { %v4386_v14 = vpop.eup %4385  ;;  %2116 = vst [vmem:[#allocation1 + $0x1] ss:$4 sm:$0xff] %v4384_v4  ;;  %4389 = vpow2.f32 %v2104_v3 }
0x1285   :  { %2118 = vst [vmem:[#allocation1 + $0x2] ss:$4 sm:$0xff] %v4386_v14  ;;  %4391 = vpow2.f32 %v2106_v1 }
0x1288   :  { %v4388_v2 = vpop.eup %4387 }
0x1289   :  { %2121 = vst [vmem:[#allocation1 + $0x20] ss:$4 sm:$0xff] %v4388_v2 }
0x128a   :  { %v4390_v42 = vpop.eup %4389 }
0x128b   :  { %v4392_v10 = vpop.eup %4391  ;;  %2123 = vst [vmem:[#allocation1 + $0x21] ss:$4 sm:$0xff] %v4390_v42 }
0x128c   :  { %v2119_v41 = vld.sshfl [vmem:[#allocation1] sm:$0xff pattern:$0x73625140]  ;;  %2125 = vst [vmem:[#allocation1 + $0x22] ss:$4 sm:$0xff] %v4392_v10 }
0x128d   :  { %v2129_v12 = vsel %vm524_vm0, %v2119_v41, 0.0 }
0x128e   :  { %v2130_v46 = vrot.slane %v2129_v12, 4 }
0x1290   :  { %v2131_v58 = vadd.f32 %v2130_v46, %v2129_v12 }
0x1292   :  { %v2132_v30 = vrot.slane %v2131_v58, 2 }
0x1293   :  { %v2126_v63 = vld.sshfl [vmem:[#allocation1 + $0x20] sm:$0xff pattern:$0x73625140] }
0x1294   :  { %v2133_v6 = vadd.f32 %v2132_v30, %v2131_v58  ;;  %v2136_v60 = vsel %vm524_vm0, %v2126_v63, 0.0 }
0x1295   :  { %v2137_v28 = vrot.slane %v2136_v60, 4 }
0x1296   :  { %v2134_v40 = vrot.slane %v2133_v6, 1 }
0x1297   :  { %v2138_v59 = vadd.f32 %v2137_v28, %v2136_v60 }
0x1298   :  { %v2135_v27 = vadd.f32 %v2134_v40, %v2133_v6 }
0x1299   :  { %v2139_v32 = vrot.slane %v2138_v59, 2 }
0x129a   :  { %4393 = vrcp.f32 %v2135_v27 }
0x129b   :  { %v2140_v17 = vadd.f32 %v2139_v32, %v2138_v59 }
0x129d   :  { %v2141_v33 = vrot.slane %v2140_v17, 1 }
0x129f   :  { %v2142_v5 = vadd.f32 %v2141_v33, %v2140_v17 }
0x12a0   :  { %v4394_v51 = vpop.eup %4393 }
0x12a1   :  { %v2147_v21 = vrot.slane %v4394_v51, 2  ;;  %v2148_v19 = vrot.slane %v4394_v51, 4  ;;  %v2155_v3 = vmul.f32 %v4394_v51, %v4382_v9  ;;  %4395 = vrcp.f32 %v2142_v5 }
0x12a3   :  { %v2156_v1 = vmul.f32 %v4384_v4, %v2147_v21  ;;  %v2157_v41 = vmul.f32 %v4386_v14, %v2148_v19  ;;  %v2161_v12 = vmul.f32 %v2155_v3, %v5354_v25 }
0x12a5   :  { %v2162_v46 = vmul.f32 %v2156_v1, %v5363_v53  ;;  %v2163_v58 = vmul.f32 %v2157_v41, %v5368_v47  ;;  %2173 = vst [vmem:[#allocation1] ss:$4 sm:$0xff] %v2161_v12 }
0x12a7   :  { %v4396_v30 = vpop.eup %4395  ;;  %2175 = vst [vmem:[#allocation1 + $0x1] ss:$4 sm:$0xff] %v2162_v46 }
0x12a8   :  { %2177 = vst [vmem:[#allocation1 + $0x2] ss:$4 sm:$0xff] %v2163_v58  ;;  %v2149_v63 = vrot.slane %v4396_v30, 2  ;;  %v2150_v6 = vrot.slane %v4396_v30, 4  ;;  %v2158_v60 = vmul.f32 %v4396_v30, %v4388_v2 }
0x12aa   :  { %v2159_v28 = vmul.f32 %v4390_v42, %v2149_v63  ;;  %v2160_v40 = vmul.f32 %v4392_v10, %v2150_v6  ;;  %v2164_v9 = vmul.f32 %v2158_v60, %v5384_v31 }
0x12ac   :  { %v2165_v4 = vmul.f32 %v2159_v28, %v5379_v57  ;;  %v2166_v14 = vmul.f32 %v2160_v40, %v5388_v26  ;;  %2180 = vst [vmem:[#allocation1 + $0x20] ss:$4 sm:$0xff] %v2164_v9 }
0x12ae   :  { %2182 = vst [vmem:[#allocation1 + $0x21] ss:$4 sm:$0xff] %v2165_v4 }
0x12af   :  { %v2178_v59 = vld.sshfl [vmem:[#allocation1] sm:$0xff pattern:$0x73625140]  ;;  %2184 = vst [vmem:[#allocation1 + $0x22] ss:$4 sm:$0xff] %v2166_v14 }
0x12b0   :  { %2343 = vst [vmem:[#allocation1] ss:$4 sm:$0xff] %v5247_v15  ;;  %v2188_v27 = vsel %vm524_vm0, %v2178_v59, 0.0 }
0x12b1   :  { %2345 = vst [vmem:[#allocation1 + $0x1] ss:$4 sm:$0xff] %v5250_v11  ;;  %v2189_v32 = vrot.slane %v2188_v27, 4 }
0x12b2   :  { %2347 = vst [vmem:[#allocation1 + $0x2] ss:$4 sm:$0xff] %v5253_v13 }
0x12b3   :  { %v2190_v2 = vadd.f32 %v2189_v32, %v2188_v27 }
0x12b5   :  { %v2191_v10 = vrot.slane %v2190_v2, 2 }
0x12b6   :  { %v2185_v42 = vld.sshfl [vmem:[#allocation1 + $0x20] sm:$0xff pattern:$0x73625140] }
0x12b7   :  { %2350 = vst [vmem:[#allocation1 + $0x20] ss:$4 sm:$0xff] %v5256_v16  ;;  %v2195_v17 = vsel %vm524_vm0, %v2185_v42, 0.0  ;;  %v2192_v5 = vadd.f32 %v2191_v10, %v2190_v2 }
0x12b8   :  { %2352 = vst [vmem:[#allocation1 + $0x21] ss:$4 sm:$0xff] %v5262_v18  ;;  %v2196_v33 = vrot.slane %v2195_v17, 4 }
0x12b9   :  { %2354 = vst [vmem:[#allocation1 + $0x22] ss:$4 sm:$0xff] %v5265_v20  ;;  %v2193_v19 = vrot.slane %v2192_v5, 1 }
0x12ba   :  { %v2197_v51 = vadd.f32 %v2196_v33, %v2195_v17 }
0x12bb   :  { %v2194_v41 = vadd.f32 %v2193_v19, %v2192_v5 }
0x12bc   :  { %v2198_v21 = vrot.slane %v2197_v51, 2 }
0x12be   :  { %v2199_v3 = vadd.f32 %v2198_v21, %v2197_v51 }
0x12c0   :  { %v2200_v1 = vrot.slane %v2199_v3, 1 }
0x12c2   :  { %v2201_v12 = vadd.f32 %v2200_v1, %v2199_v3 }
0x12c4   :  { %v2204_v46 = vsel %vm666_vm9, %v2201_v12, %v2194_v41 }
0x12c5   :  { %4205 = vmatmul.msk.f32.vlgmr.msrb.gmra.mxu0 %vm274_vm10, %v2204_v46 }
0x12c6   :  { %2645 = vmatpush.msrb.mxu0 %v5472_v56  ;;  %v2247_v56 = vpop.f32.mrf.mxu2 }
0x12c8   :  { %2646 = vmatpush.msrb.mxu0 %v5478_v39 }
0x12ca   :  { %2647 = vmatpush.msrb.mxu0 %v5484_v43 }
0x12cc   :  { %2648 = vmatpush.msrb.mxu0 %v5490_v44 }
0x1342   :  { %v2224_v58 = vpop.f32.mrf.mxu0 }
0x1343   :  { %2229 = vst.msk [vmem:[#allocation3 + $0x6] sm:$0x3] %vm1080_vm15, %v2224_v58  ;;  %4207 = vmatmul.msk.f32.vlgmr.msra.gmra.mxu1 %vm274_vm10, %v2224_v58  ;;  %v2348_v58 = vld.sshfl [vmem:[#allocation1] sm:$0xff pattern:$0x73625140] }
0x1344   :  { %2712 = vmatpush.msra.mxu1 %v5589_v7 }
0x1346   :  { %2713 = vmatpush.msra.mxu1 %v5595_v49 }
0x1348   :  { %2714 = vmatpush.msra.mxu1 %v5601_v22 }
0x134a   :  { %2715 = vmatpush.msra.mxu1 %v5607_v23 }
0x13c0   :  { %v2270_v30 = vpop.f32.mrf.mxu1 }
0x13c1   :  { %v2271_v39 = vadd.f32 %v2270_v30, %v2247_v56 }
0x13c3   :  { %v2273_v43 = vadd.f32 %v2271_v39, %v5094_v0  ;;  %v2355_v39 = vld.sshfl [vmem:[#allocation1 + $0x20] sm:$0xff pattern:$0x73625140] }
0x13c5   :  { %v2274_v44 = vadd.f32 %v5614_v52, %v2273_v43 }
0x13c7   :  { %4397 = vtanh.f32 %v2274_v44  ;;  %v4208_v6 = vmul.f32 -1.442695, %v2274_v44 }
0x13c9   :  { %4399 = vpow2.f32 %v4208_v6  ;;  %v6101_v6 = vld [vmem:[#allocation32_spill] sm:$0xff] }
0x13cd   :  { %v4398_v63 = vpop.eup %4397 }
0x13ce   :  { %2297 = vrot.lane.b32.xlu1 %v4398_v63, %s4800_s17 }
0x13cf   :  { %v4400_v60 = vpop.eup %4399 }
0x13d0   :  { %v2278_v28 = vadd.f32 1.0, %v4400_v60  ;;  %v6102_v60 = vld [vmem:[#allocation33_spill] sm:$0xff] }
0x13d2   :  { %4401 = vrcp.f32 %v2278_v28  ;;  %v2290_v27 = vand.u32 2147483648, %v2278_v28  ;;  %vm2284_vm2 = vweird.f32 %v2278_v28  ;;  %v2288_v32 = vand.u32 2147483647, %v2278_v28 }
0x13d4   :  { %v2291_v42 = vor.u32 1.1754944e-38, %v2290_v27  ;;  %vm2289_vm4 = vcmp.eq.f32.partialorder %v2288_v32, 8.507059e+37 }
0x13d8   :  { %v4402_v40 = vpop.eup %4401 }
0x13d9   :  { %v2280_v9 = vmul.f32 %v4402_v40, %v2278_v28  ;;  %vm2285_vm1 = vweird.f32 %v4402_v40  ;;  %v6103_v28 = vld [vmem:[#allocation34_spill] sm:$0xff] }
0x13da   :  { %vm2286_vm3 = vmor %vm2284_vm2, %vm2285_vm1 }
0x13db   :  { %v2281_v4 = vsub.f32 1.0, %v2280_v9 }
0x13dd   :  { %v2282_v14 = vmul.f32 %v4402_v40, %v2281_v4 }
0x13df   :  { %v2283_v59 = vadd.f32 %v4402_v40, %v2282_v14 }
0x13e1   :  { %v2287_v2 = vsel %vm2286_vm3, %v4402_v40, %v2283_v59  ;;  %v6104_v40 = vld [vmem:[#allocation35_spill] sm:$0xff] }
0x13e2   :  { %v2292_v17 = vsel %vm2289_vm4, %v2291_v42, %v2287_v2 }
0x13e3   :  { %v2295_v5 = vmul.f32 %v2292_v17, %v5620_v48 }
0x1440   :  { %v2298_v10 = vpop.permute.xlu1 %2297 }
0x1441   :  { %v2300_v33 = vmul.f32 %v2298_v10, %v2292_v17 }
0x1443   :  { %2302 = vrot.lane.b32.xlu2 %v2300_v33, %s4799_s25 }
0x149d   :  { %v2303_v51 = vpop.permute.xlu2 %2302 }
0x149e   :  { %v5691_v21 = vadd.f32 %v2303_v51, %v2295_v5 }
0x14a0   :  { %4403 = vtanh.f32 %v5691_v21 }
0x14a6   :  { %v4404_v19 = vpop.eup %4403 }
0x14a7   :  { %2308 = vrot.lane.b32.xlu0 %v4404_v19, %s4800_s17 }
0x1519   :  { %v2309_v3 = vpop.permute.xlu0 %2308 }
0x151a   :  { %v2311_v1 = vmul.f32 %v2309_v3, %v2292_v17 }
0x151c   :  { %2313 = vrot.lane.b32.xlu1 %v2311_v1, %s4799_s25 }
0x158e   :  { %v2314_v41 = vpop.permute.xlu1 %2313 }
0x158f   :  { %2608 = vst.msk [vmem:[#allocation2 + $0x8] sm:$0x3] %vm1080_vm15, %v2314_v41  ;;  %4209 = vmatmul.msk.f32.vlgmr.msra.gmra.mxu0 %vm274_vm10, %v2314_v41  ;;  %4213 = vmatmul.msk.f32.vlgmr.msra.gmra.mxu3 %vm274_vm10, %v2314_v41 }
0x1590   :  { %2982 = vmatpush.msra.mxu0 %v5628_v50  ;;  %3387 = vmatpush.msra.mxu3 %v5516_v45 }
0x1592   :  { %2983 = vmatpush.msra.mxu0 %v5632_v24  ;;  %3388 = vmatpush.msra.mxu3 %v5523_v38 }
0x1594   :  { %2984 = vmatpush.msra.mxu0 %v5636_v61  ;;  %3389 = vmatpush.msra.mxu3 %v5530_v29 }
0x1596   :  { %2985 = vmatpush.msra.mxu0 %v5640_v62  ;;  %3390 = vmatpush.msra.mxu3 %v5537_v54 }
0x160c   :  { %v2334_v48 = vpop.f32.mrf.mxu0 }
0x160d   :  { %v2338_v12 = vrot.slane %v2334_v48, 1  ;;  %v2339_v46 = vperm.slane %v2334_v48, 0 }
0x160f   :  { %v2340_v56 = vperm.slane %v2338_v12, 0  ;;  %v2358_v30 = vmul.f32 %v2348_v58, %v2339_v46 }
0x1611   :  { %v2359_v45 = vmul.f32 %v2355_v39, %v2340_v56  ;;  %v2362_v43 = vrot.slane %v2358_v30, 2  ;;  %v2363_v44 = vrot.slane %v2358_v30, 4  ;;  %2366 = vst [vmem:[#allocation1] ss:$4 sm:$0xff] %v2358_v30 }
0x1613   :  { %v2364_v38 = vrot.slane %v2359_v45, 2  ;;  %v2365_v63 = vrot.slane %v2359_v45, 4  ;;  %2368 = vst [vmem:[#allocation1 + $0x1] ss:$4 sm:$0xff] %v2362_v43 }
0x1614   :  { %2370 = vst [vmem:[#allocation1 + $0x2] ss:$4 sm:$0xff] %v2363_v44 }
0x1615   :  { %2372 = vst [vmem:[#allocation1 + $0x3] ss:$4 sm:$0xff] %v2359_v45 }
0x1616   :  { %2374 = vst [vmem:[#allocation1 + $0x20] ss:$4 sm:$0xff] %v2364_v38 }
0x1617   :  { %2376 = vst [vmem:[#allocation1 + $0x21] ss:$4 sm:$0xff] %v2365_v63 }
0x161c   :  { %v2377_v29 = vld.sshfl [vmem:[#allocation1] sm:$0xff pattern:$0x73625140] }
0x161d   :  { %2379 = vst [vmem:[#allocation1] ss:$4 sm:$0xff] %v5139_v34  ;;  %4210 = vmatmul.msk.f32.vlgmr.msra.gmra.mxu2 %vm274_vm10, %v2377_v29 }
0x161e   :  { %v2378_v54 = vld.sshfl [vmem:[#allocation1 + $0x20] sm:$0xff pattern:$0x73625140]  ;;  %2381 = vst [vmem:[#allocation1 + $0x1] ss:$4 sm:$0xff] %v5142_v35  ;;  %3175 = vmatpush.msra.mxu2 %v5543_v8 }
0x161f   :  { %2383 = vst [vmem:[#allocation1 + $0x2] ss:$4 sm:$0xff] %v5145_v36 }
0x1620   :  { %2385 = vst [vmem:[#allocation1 + $0x3] ss:$4 sm:$0xff] %v5147_v37  ;;  %3176 = vmatpush.msra.mxu2 %v5548_v55 }
0x1621   :  { %2387 = vst [vmem:[#allocation1 + $0x20] ss:$4 sm:$0xff] %v6101_v6 }
0x1622   :  { %2389 = vst [vmem:[#allocation1 + $0x21] ss:$4 sm:$0xff] %v6102_v60  ;;  %3177 = vmatpush.msra.mxu2 %v6103_v28 }
0x1624   :  { %3178 = vmatpush.msra.mxu2 %v6104_v40 }
0x1625   :  { %4211 = vmatmul.msk.f32.gmra.mxu2 %vm274_vm10, %v2378_v54 }
0x1627   :  { %v2390_v9 = vld.sshfl [vmem:[#allocation1] sm:$0xff pattern:$0x73625140] }
0x1629   :  { %v2391_v32 = vld.sshfl [vmem:[#allocation1 + $0x20] sm:$0xff pattern:$0x73625140] }
0x16a0   :  { %v2415_v4 = vpop.f32.mrf.mxu2 }
0x16a1   :  { %v2416_v14 = vadd.f32 %v2415_v4, %v2390_v9 }
0x16a3   :  { %v2423_v8 = vrot.slane %v2416_v14, 2  ;;  %v2424_v59 = vrot.slane %v2416_v14, 4  ;;  %v2425_v27 = vrot.slane %v2416_v14, 6  ;;  %2431 = vst [vmem:[#allocation1] ss:$4 sm:$0xff] %v2416_v14 }
0x16a5   :  { %2433 = vst [vmem:[#allocation1 + $0x1] ss:$4 sm:$0xff] %v2423_v8 }
0x16a6   :  { %2435 = vst [vmem:[#allocation1 + $0x2] ss:$4 sm:$0xff] %v2424_v59 }
0x16a7   :  { %2438 = vst [vmem:[#allocation1 + $0x20] ss:$4 sm:$0xff] %v2425_v27 }
0x16a8   :  { %v2418_v55 = vpop.f32.mrf.mxu2 }
0x16a9   :  { %v2419_v2 = vadd.f32 %v2418_v55, %v2391_v32 }
0x16ab   :  { %v2426_v42 = vrot.slane %v2419_v2, 2  ;;  %2440 = vst [vmem:[#allocation1 + $0x21] ss:$4 sm:$0xff] %v2419_v2 }
0x16ad   :  { %v2436_v10 = vld.sshfl [vmem:[#allocation1] sm:$0xff pattern:$0x73625140]  ;;  %2442 = vst [vmem:[#allocation1 + $0x22] ss:$4 sm:$0xff] %v2426_v42 }
0x16ae   :  { %v2446_v17 = vsel %vm524_vm0, %v2436_v10, -inf }
0x16af   :  { %v2447_v33 = vrot.slane %v2446_v17, 4 }
0x16b1   :  { %v2448_v5 = vmax.f32 %v2446_v17, %v2447_v33 }
0x16b3   :  { %v2449_v51 = vrot.slane %v2448_v5, 2 }
0x16b4   :  { %v2443_v19 = vld.sshfl [vmem:[#allocation1 + $0x20] sm:$0xff pattern:$0x73625140] }
0x16b5   :  { %v2450_v3 = vmax.f32 %v2448_v5, %v2449_v51  ;;  %v2453_v1 = vsel %vm524_vm0, %v2443_v19, -inf }
0x16b6   :  { %v2454_v41 = vrot.slane %v2453_v1, 4 }
0x16b7   :  { %v2451_v48 = vrot.slane %v2450_v3, 1 }
0x16b8   :  { %v2455_v12 = vmax.f32 %v2453_v1, %v2454_v41 }
0x16b9   :  { %v2452_v46 = vmax.f32 %v2450_v3, %v2451_v48 }
0x16ba   :  { %v2456_v58 = vrot.slane %v2455_v12, 2 }
0x16bb   :  { %v2462_v56 = vrot.slane %v2452_v46, 2  ;;  %v2463_v30 = vrot.slane %v2452_v46, 4  ;;  %v2470_v39 = vsub.f32 %v2416_v14, %v2452_v46 }
0x16bc   :  { %v2457_v45 = vmax.f32 %v2455_v12, %v2456_v58 }
0x16bd   :  { %v2471_v43 = vsub.f32 %v2423_v8, %v2462_v56  ;;  %v2472_v44 = vsub.f32 %v2424_v59, %v2463_v30  ;;  %v2476_v38 = vmul.f32 1.442695, %v2470_v39 }
0x16be   :  { %v2458_v63 = vrot.slane %v2457_v45, 1 }
0x16bf   :  { %4405 = vpow2.f32 %v2476_v38  ;;  %v2478_v29 = vmul.f32 1.442695, %v2471_v43  ;;  %v2480_v54 = vmul.f32 1.442695, %v2472_v44 }
0x16c0   :  { %v2459_v28 = vmax.f32 %v2457_v45, %v2458_v63 }
0x16c1   :  { %4407 = vpow2.f32 %v2478_v29 }
0x16c2   :  { %4409 = vpow2.f32 %v2480_v54  ;;  %v2464_v40 = vrot.slane %v2459_v28, 2  ;;  %v2465_v9 = vrot.slane %v2459_v28, 4  ;;  %v2473_v4 = vsub.f32 %v2425_v27, %v2459_v28 }
0x16c4   :  { %v2474_v32 = vsub.f32 %v2419_v2, %v2464_v40  ;;  %v2475_v55 = vsub.f32 %v2426_v42, %v2465_v9  ;;  %v2482_v10 = vmul.f32 1.442695, %v2473_v4 }
0x16c5   :  { %v4406_v17 = vpop.eup %4405 }
0x16c6   :  { %2494 = vst [vmem:[#allocation1] ss:$4 sm:$0xff] %v4406_v17  ;;  %4411 = vpow2.f32 %v2482_v10  ;;  %v2484_v14 = vmul.f32 1.442695, %v2474_v32  ;;  %v2486_v8 = vmul.f32 1.442695, %v2475_v55 }
0x16c7   :  { %v4408_v59 = vpop.eup %4407 }
0x16c8   :  { %v4410_v33 = vpop.eup %4409  ;;  %2496 = vst [vmem:[#allocation1 + $0x1] ss:$4 sm:$0xff] %v4408_v59  ;;  %4413 = vpow2.f32 %v2484_v14 }
0x16c9   :  { %2498 = vst [vmem:[#allocation1 + $0x2] ss:$4 sm:$0xff] %v4410_v33  ;;  %4415 = vpow2.f32 %v2486_v8 }
0x16cc   :  { %v4412_v5 = vpop.eup %4411 }
0x16cd   :  { %2501 = vst [vmem:[#allocation1 + $0x20] ss:$4 sm:$0xff] %v4412_v5 }
0x16ce   :  { %v4414_v51 = vpop.eup %4413 }
0x16cf   :  { %v4416_v19 = vpop.eup %4415  ;;  %2503 = vst [vmem:[#allocation1 + $0x21] ss:$4 sm:$0xff] %v4414_v51 }
0x16d0   :  { %v2499_v27 = vld.sshfl [vmem:[#allocation1] sm:$0xff pattern:$0x73625140]  ;;  %2505 = vst [vmem:[#allocation1 + $0x22] ss:$4 sm:$0xff] %v4416_v19 }
0x16d1   :  { %v2509_v2 = vsel %vm524_vm0, %v2499_v27, 0.0 }
0x16d2   :  { %v2510_v42 = vrot.slane %v2509_v2, 4 }
0x16d4   :  { %v2511_v3 = vadd.f32 %v2510_v42, %v2509_v2 }
0x16d6   :  { %v2512_v1 = vrot.slane %v2511_v3, 2 }
0x16d7   :  { %v2506_v41 = vld.sshfl [vmem:[#allocation1 + $0x20] sm:$0xff pattern:$0x73625140] }
0x16d8   :  { %v2513_v48 = vadd.f32 %v2512_v1, %v2511_v3  ;;  %v2516_v12 = vsel %vm524_vm0, %v2506_v41, 0.0 }
0x16d9   :  { %v2517_v46 = vrot.slane %v2516_v12, 4 }
0x16da   :  { %v2514_v58 = vrot.slane %v2513_v48, 1 }
0x16db   :  { %v2518_v56 = vadd.f32 %v2517_v46, %v2516_v12 }
0x16dc   :  { %v2515_v30 = vadd.f32 %v2514_v58, %v2513_v48 }
0x16dd   :  { %v2519_v39 = vrot.slane %v2518_v56, 2 }
0x16de   :  { %4417 = vrcp.f32 %v2515_v30 }
0x16df   :  { %v2520_v45 = vadd.f32 %v2519_v39, %v2518_v56 }
0x16e1   :  { %v2521_v43 = vrot.slane %v2520_v45, 1 }
0x16e3   :  { %v2522_v44 = vadd.f32 %v2521_v43, %v2520_v45 }
0x16e4   :  { %v4418_v38 = vpop.eup %4417 }
0x16e5   :  { %v2527_v63 = vrot.slane %v4418_v38, 2  ;;  %v2528_v29 = vrot.slane %v4418_v38, 4  ;;  %v2535_v54 = vmul.f32 %v4418_v38, %v4406_v17  ;;  %4419 = vrcp.f32 %v2522_v44  ;;  %v5742_v38 = vld [vmem:[%s6094_s28 + $0x18] sm:$0xff] }
0x16e7   :  { %v2536_v28 = vmul.f32 %v4408_v59, %v2527_v63  ;;  %v2537_v40 = vmul.f32 %v4410_v33, %v2528_v29  ;;  %v2541_v9 = vmul.f32 %v2535_v54, %v5354_v25  ;;  %v5748_v63 = vld [vmem:[%s6094_s28 + $0x10] sm:$0xff]  ;;  %v5754_v29 = vld [vmem:[%s6094_s28 + $0x8] sm:$0xff]  ;;  %v5760_v54 = vld [vmem:[%s6094_s28] sm:$0xff] }
0x16e9   :  { %v2542_v4 = vmul.f32 %v2536_v28, %v5363_v53  ;;  %v2543_v32 = vmul.f32 %v2537_v40, %v5368_v47  ;;  %2553 = vst [vmem:[#allocation1] ss:$4 sm:$0xff] %v2541_v9  ;;  %v2627_v40 = vpop.f32.mrf.mxu3 }
0x16eb   :  { %v4420_v55 = vpop.eup %4419  ;;  %2555 = vst [vmem:[#allocation1 + $0x1] ss:$4 sm:$0xff] %v2542_v4 }
0x16ec   :  { %2557 = vst [vmem:[#allocation1 + $0x2] ss:$4 sm:$0xff] %v2543_v32  ;;  %v2529_v10 = vrot.slane %v4420_v55, 2  ;;  %v2530_v14 = vrot.slane %v4420_v55, 4  ;;  %v2538_v8 = vmul.f32 %v4420_v55, %v4412_v5  ;;  %v2654_v32 = vrot.slane %v5094_v0, 2 }
0x16ee   :  { %v2539_v27 = vmul.f32 %v4414_v51, %v2529_v10  ;;  %v2540_v2 = vmul.f32 %v4416_v19, %v2530_v14  ;;  %v2544_v17 = vmul.f32 %v2538_v8, %v5384_v31 }
0x16f0   :  { %v2545_v59 = vmul.f32 %v2539_v27, %v5379_v57  ;;  %v2546_v33 = vmul.f32 %v2540_v2, %v5388_v26  ;;  %2560 = vst [vmem:[#allocation1 + $0x20] ss:$4 sm:$0xff] %v2544_v17 }
0x16f2   :  { %2562 = vst [vmem:[#allocation1 + $0x21] ss:$4 sm:$0xff] %v2545_v59 }
0x16f3   :  { %v2558_v42 = vld.sshfl [vmem:[#allocation1] sm:$0xff pattern:$0x73625140]  ;;  %2564 = vst [vmem:[#allocation1 + $0x22] ss:$4 sm:$0xff] %v2546_v33 }
0x16f4   :  { %2726 = vst [vmem:[#allocation1] ss:$4 sm:$0xff] %v5247_v15  ;;  %v2568_v3 = vsel %vm524_vm0, %v2558_v42, 0.0 }
0x16f5   :  { %2728 = vst [vmem:[#allocation1 + $0x1] ss:$4 sm:$0xff] %v5250_v11  ;;  %v2569_v1 = vrot.slane %v2568_v3, 4 }
0x16f6   :  { %2730 = vst [vmem:[#allocation1 + $0x2] ss:$4 sm:$0xff] %v5253_v13 }
0x16f7   :  { %v2570_v5 = vadd.f32 %v2569_v1, %v2568_v3 }
0x16f9   :  { %v2571_v19 = vrot.slane %v2570_v5, 2 }
0x16fa   :  { %v2565_v51 = vld.sshfl [vmem:[#allocation1 + $0x20] sm:$0xff pattern:$0x73625140] }
0x16fb   :  { %2733 = vst [vmem:[#allocation1 + $0x20] ss:$4 sm:$0xff] %v5256_v16  ;;  %v2575_v41 = vsel %vm524_vm0, %v2565_v51, 0.0  ;;  %v2572_v12 = vadd.f32 %v2571_v19, %v2570_v5 }
0x16fc   :  { %2735 = vst [vmem:[#allocation1 + $0x21] ss:$4 sm:$0xff] %v5262_v18  ;;  %v2576_v48 = vrot.slane %v2575_v41, 4 }
0x16fd   :  { %2737 = vst [vmem:[#allocation1 + $0x22] ss:$4 sm:$0xff] %v5265_v20  ;;  %v2573_v56 = vrot.slane %v2572_v12, 1 }
0x16fe   :  { %v2577_v46 = vadd.f32 %v2576_v48, %v2575_v41 }
0x16ff   :  { %v2574_v45 = vadd.f32 %v2573_v56, %v2572_v12 }
0x1700   :  { %v2578_v58 = vrot.slane %v2577_v46, 2 }
0x1702   :  { %v2579_v30 = vadd.f32 %v2578_v58, %v2577_v46 }
0x1704   :  { %v2580_v39 = vrot.slane %v2579_v30, 1 }
0x1706   :  { %v2581_v43 = vadd.f32 %v2580_v39, %v2579_v30  ;;  %v2731_v39 = vld.sshfl [vmem:[#allocation1] sm:$0xff pattern:$0x73625140] }
0x1708   :  { %v2584_v44 = vsel %vm666_vm9, %v2581_v43, %v2574_v45 }
0x1709   :  { %4212 = vmatmul.msk.f32.vlgmr.msrb.gmra.mxu1 %vm274_vm10, %v2584_v44  ;;  %v2738_v44 = vld.sshfl [vmem:[#allocation1 + $0x20] sm:$0xff pattern:$0x73625140] }
0x170a   :  { %3028 = vmatpush.msrb.mxu1 %v5742_v38 }
0x170c   :  { %3029 = vmatpush.msrb.mxu1 %v5748_v63 }
0x170e   :  { %3030 = vmatpush.msrb.mxu1 %v5754_v29 }
0x1710   :  { %3031 = vmatpush.msrb.mxu1 %v5760_v54 }
0x1786   :  { %v2604_v28 = vpop.f32.mrf.mxu1 }
0x1787   :  { %2609 = vst.msk [vmem:[#allocation3 + $0x8] sm:$0x3] %vm1080_vm15, %v2604_v28  ;;  %4214 = vmatmul.msk.f32.vlgmr.msrb.gmra.mxu0 %vm274_vm10, %v2604_v28 }
0x1788   :  { %3094 = vmatpush.msrb.mxu0 %v5589_v7 }
0x178a   :  { %3095 = vmatpush.msrb.mxu0 %v5595_v49 }
0x178c   :  { %3096 = vmatpush.msrb.mxu0 %v5601_v22 }
0x178e   :  { %3097 = vmatpush.msrb.mxu0 %v5607_v23 }
0x1804   :  { %v2650_v9 = vpop.f32.mrf.mxu0 }
0x1805   :  { %v2651_v4 = vadd.f32 %v2650_v9, %v2627_v40 }
0x1807   :  { %v2656_v55 = vadd.f32 %v2654_v32, %v2651_v4 }
0x1809   :  { %v2657_v10 = vadd.f32 %v5614_v52, %v2656_v55  ;;  %v4552_v55 = vld [vmem:[#allocation12 + $0x8] sm:$0xff] }
0x180b   :  { %4421 = vtanh.f32 %v2657_v10  ;;  %v4215_v8 = vmul.f32 -1.442695, %v2657_v10  ;;  %v4553_v10 = vld [vmem:[#allocation12] sm:$0xff] }
0x180d   :  { %4423 = vpow2.f32 %v4215_v8 }
0x1811   :  { %v4422_v14 = vpop.eup %4421 }
0x1812   :  { %2680 = vrot.lane.b32.xlu2 %v4422_v14, %s4800_s17 }
0x1813   :  { %v4424_v7 = vpop.eup %4423 }
0x1814   :  { %v2661_v49 = vadd.f32 1.0, %v4424_v7 }
0x1816   :  { %4425 = vrcp.f32 %v2661_v49  ;;  %v2673_v59 = vand.u32 2147483648, %v2661_v49  ;;  %vm2667_vm6 = vweird.f32 %v2661_v49  ;;  %v2671_v33 = vand.u32 2147483647, %v2661_v49 }
0x1818   :  { %v2674_v42 = vor.u32 1.1754944e-38, %v2673_v59  ;;  %vm2672_vm8 = vcmp.eq.f32.partialorder %v2671_v33, 8.507059e+37 }
0x181c   :  { %v4426_v22 = vpop.eup %4425 }
0x181d   :  { %v2663_v27 = vmul.f32 %v4426_v22, %v2661_v49  ;;  %vm2668_vm5 = vweird.f32 %v4426_v22 }
0x181e   :  { %vm2669_vm7 = vmor %vm2667_vm6, %vm2668_vm5  ;;  %vm4076_vm5 = vcmask 48128   ;;  %vm3903_vm6 = vcmask 326656  }
0x181f   :  { %v2664_v23 = vsub.f32 1.0, %v2663_v27 }
0x1821   :  { %v2665_v2 = vmul.f32 %v4426_v22, %v2664_v23 }
0x1823   :  { %v2666_v17 = vadd.f32 %v4426_v22, %v2665_v2 }
0x1825   :  { %v2670_v52 = vsel %vm2669_vm7, %v4426_v22, %v2666_v17 }
0x1826   :  { %v2675_v1 = vsel %vm2672_vm8, %v2674_v42, %v2670_v52 }
0x1827   :  { %v2678_v51 = vmul.f32 %v2675_v1, %v5691_v21 }
0x186c   :  { %v2681_v3 = vpop.permute.xlu2 %2680 }
0x186d   :  { %v2683_v5 = vmul.f32 %v2681_v3, %v2675_v1 }
0x186f   :  { %2685 = vrot.lane.b32.xlu0 %v2683_v5, %s4799_s25 }
0x18e1   :  { %v2686_v19 = vpop.permute.xlu0 %2685 }
0x18e2   :  { %v5774_v41 = vadd.f32 %v2686_v19, %v2678_v51 }
0x18e4   :  { %4427 = vtanh.f32 %v5774_v41 }
0x18ea   :  { %v4428_v48 = vpop.eup %4427 }
0x18eb   :  { %2691 = vrot.lane.b32.xlu1 %v4428_v48, %s4800_s17 }
0x195d   :  { %v2692_v12 = vpop.permute.xlu1 %2691 }
0x195e   :  { %v2694_v46 = vmul.f32 %v2692_v12, %v2675_v1 }
0x1960   :  { %2696 = vrot.lane.b32.xlu2 %v2694_v46, %s4799_s25 }
0x19ba   :  { %v2697_v58 = vpop.permute.xlu2 %2696 }
0x19bb   :  { %2991 = vst.msk [vmem:[#allocation2 + $0xa] sm:$0x3] %vm1080_vm15, %v2697_v58  ;;  %4216 = vmatmul.msk.f32.vlgmr.msra.gmra.mxu1 %vm274_vm10, %v2697_v58  ;;  %4220 = vmatmul.msk.f32.vlgmr.msrb.gmra.mxu2 %vm274_vm10, %v2697_v58 }
0x19bc   :  { %3364 = vmatpush.msra.mxu1 %v5628_v50 }
0x19be   :  { %3365 = vmatpush.msra.mxu1 %v5632_v24 }
0x19c0   :  { %3366 = vmatpush.msra.mxu1 %v5636_v61  ;;  %v4550_v61 = vld [vmem:[#allocation12 + $0x18] sm:$0xff] }
0x19c2   :  { %3367 = vmatpush.msra.mxu1 %v5640_v62  ;;  %v4551_v62 = vld [vmem:[#allocation12 + $0x10] sm:$0xff] }
0x1a38   :  { %v2717_v21 = vpop.f32.mrf.mxu1 }
0x1a39   :  { %v2721_v56 = vrot.slane %v2717_v21, 1  ;;  %v2722_v30 = vperm.slane %v2717_v21, 0 }
0x1a3b   :  { %v2723_v45 = vperm.slane %v2721_v56, 0  ;;  %v2741_v43 = vmul.f32 %v2731_v39, %v2722_v30 }
0x1a3d   :  { %v2742_v28 = vmul.f32 %v2738_v44, %v2723_v45  ;;  %v2745_v40 = vrot.slane %v2741_v43, 2  ;;  %v2746_v9 = vrot.slane %v2741_v43, 4  ;;  %2749 = vst [vmem:[#allocation1] ss:$4 sm:$0xff] %v2741_v43 }
0x1a3f   :  { %v2747_v4 = vrot.slane %v2742_v28, 2  ;;  %v2748_v32 = vrot.slane %v2742_v28, 4  ;;  %2751 = vst [vmem:[#allocation1 + $0x1] ss:$4 sm:$0xff] %v2745_v40 }
0x1a40   :  { %2753 = vst [vmem:[#allocation1 + $0x2] ss:$4 sm:$0xff] %v2746_v9 }
0x1a41   :  { %2755 = vst [vmem:[#allocation1 + $0x3] ss:$4 sm:$0xff] %v2742_v28 }
0x1a42   :  { %2757 = vst [vmem:[#allocation1 + $0x20] ss:$4 sm:$0xff] %v2747_v4 }
0x1a43   :  { %2759 = vst [vmem:[#allocation1 + $0x21] ss:$4 sm:$0xff] %v2748_v32 }
0x1a48   :  { %v2760_v50 = vld.sshfl [vmem:[#allocation1] sm:$0xff pattern:$0x73625140] }
0x1a49   :  { %2762 = vst [vmem:[#allocation1] ss:$4 sm:$0xff] %v5139_v34  ;;  %4217 = vmatmul.msk.f32.vlgmr.msrb.gmra.mxu3 %vm274_vm10, %v2760_v50 }
0x1a4a   :  { %2764 = vst [vmem:[#allocation1 + $0x1] ss:$4 sm:$0xff] %v5142_v35  ;;  %v2761_v24 = vld.sshfl [vmem:[#allocation1 + $0x20] sm:$0xff pattern:$0x73625140]  ;;  %3557 = vmatpush.msrb.mxu3 %v4550_v61 }
0x1a4b   :  { %2766 = vst [vmem:[#allocation1 + $0x2] ss:$4 sm:$0xff] %v5145_v36 }
0x1a4c   :  { %2768 = vst [vmem:[#allocation1 + $0x3] ss:$4 sm:$0xff] %v5147_v37  ;;  %3558 = vmatpush.msrb.mxu3 %v4551_v62 }
0x1a4d   :  { %2770 = vst [vmem:[#allocation1 + $0x20] ss:$4 sm:$0xff] %v6101_v6 }
0x1a4e   :  { %2772 = vst [vmem:[#allocation1 + $0x21] ss:$4 sm:$0xff] %v6102_v60  ;;  %3559 = vmatpush.msrb.mxu3 %v4552_v55 }
0x1a50   :  { %3560 = vmatpush.msrb.mxu3 %v4553_v10 }
0x1a51   :  { %4218 = vmatmul.msk.f32.gmra.mxu3 %vm274_vm10, %v2761_v24 }
0x1a53   :  { %v2773_v14 = vld.sshfl [vmem:[#allocation1] sm:$0xff pattern:$0x73625140] }
0x1a55   :  { %v2774_v23 = vld.sshfl [vmem:[#allocation1 + $0x20] sm:$0xff pattern:$0x73625140] }
0x1acc   :  { %v2798_v8 = vpop.f32.mrf.mxu3 }
0x1acd   :  { %v2799_v7 = vadd.f32 %v2798_v8, %v2773_v14 }
0x1acf   :  { %v2806_v49 = vrot.slane %v2799_v7, 2  ;;  %v2807_v22 = vrot.slane %v2799_v7, 4  ;;  %v2808_v27 = vrot.slane %v2799_v7, 6  ;;  %2814 = vst [vmem:[#allocation1] ss:$4 sm:$0xff] %v2799_v7 }
0x1ad1   :  { %2816 = vst [vmem:[#allocation1 + $0x1] ss:$4 sm:$0xff] %v2806_v49 }
0x1ad2   :  { %2818 = vst [vmem:[#allocation1 + $0x2] ss:$4 sm:$0xff] %v2807_v22 }
0x1ad3   :  { %2821 = vst [vmem:[#allocation1 + $0x20] ss:$4 sm:$0xff] %v2808_v27 }
0x1ad4   :  { %v2801_v2 = vpop.f32.mrf.mxu3 }
0x1ad5   :  { %v2802_v17 = vadd.f32 %v2801_v2, %v2774_v23 }
0x1ad7   :  { %v2809_v59 = vrot.slane %v2802_v17, 2  ;;  %2823 = vst [vmem:[#allocation1 + $0x21] ss:$4 sm:$0xff] %v2802_v17 }
0x1ad9   :  { %v2819_v33 = vld.sshfl [vmem:[#allocation1] sm:$0xff pattern:$0x73625140]  ;;  %2825 = vst [vmem:[#allocation1 + $0x22] ss:$4 sm:$0xff] %v2809_v59 }
0x1ada   :  { %v2829_v52 = vsel %vm524_vm0, %v2819_v33, -inf }
0x1adb   :  { %v2830_v42 = vrot.slane %v2829_v52, 4 }
0x1add   :  { %v2831_v3 = vmax.f32 %v2829_v52, %v2830_v42 }
0x1adf   :  { %v2832_v1 = vrot.slane %v2831_v3, 2 }
0x1ae0   :  { %v2826_v5 = vld.sshfl [vmem:[#allocation1 + $0x20] sm:$0xff pattern:$0x73625140] }
0x1ae1   :  { %v2833_v51 = vmax.f32 %v2831_v3, %v2832_v1  ;;  %v2836_v19 = vsel %vm524_vm0, %v2826_v5, -inf }
0x1ae2   :  { %v2837_v48 = vrot.slane %v2836_v19, 4 }
0x1ae3   :  { %v2834_v12 = vrot.slane %v2833_v51, 1 }
0x1ae4   :  { %v2838_v46 = vmax.f32 %v2836_v19, %v2837_v48 }
0x1ae5   :  { %v2835_v58 = vmax.f32 %v2833_v51, %v2834_v12 }
0x1ae6   :  { %v2839_v21 = vrot.slane %v2838_v46, 2 }
0x1ae7   :  { %v2845_v56 = vrot.slane %v2835_v58, 2  ;;  %v2846_v30 = vrot.slane %v2835_v58, 4  ;;  %v2853_v39 = vsub.f32 %v2799_v7, %v2835_v58 }
0x1ae8   :  { %v2840_v45 = vmax.f32 %v2838_v46, %v2839_v21 }
0x1ae9   :  { %v2854_v43 = vsub.f32 %v2806_v49, %v2845_v56  ;;  %v2855_v44 = vsub.f32 %v2807_v22, %v2846_v30  ;;  %v2859_v28 = vmul.f32 1.442695, %v2853_v39 }
0x1aea   :  { %v2841_v40 = vrot.slane %v2840_v45, 1 }
0x1aeb   :  { %4429 = vpow2.f32 %v2859_v28  ;;  %v2861_v9 = vmul.f32 1.442695, %v2854_v43  ;;  %v2863_v4 = vmul.f32 1.442695, %v2855_v44 }
0x1aec   :  { %v2842_v32 = vmax.f32 %v2840_v45, %v2841_v40 }
0x1aed   :  { %4431 = vpow2.f32 %v2861_v9 }
0x1aee   :  { %4433 = vpow2.f32 %v2863_v4  ;;  %v2847_v50 = vrot.slane %v2842_v32, 2  ;;  %v2848_v24 = vrot.slane %v2842_v32, 4  ;;  %v2856_v61 = vsub.f32 %v2808_v27, %v2842_v32 }
0x1af0   :  { %v2857_v62 = vsub.f32 %v2802_v17, %v2847_v50  ;;  %v2858_v55 = vsub.f32 %v2809_v59, %v2848_v24  ;;  %v2865_v10 = vmul.f32 1.442695, %v2856_v61 }
0x1af1   :  { %v4430_v14 = vpop.eup %4429 }
0x1af2   :  { %2877 = vst [vmem:[#allocation1] ss:$4 sm:$0xff] %v4430_v14  ;;  %4435 = vpow2.f32 %v2865_v10  ;;  %v2867_v8 = vmul.f32 1.442695, %v2857_v62  ;;  %v2869_v7 = vmul.f32 1.442695, %v2858_v55 }
0x1af3   :  { %v4432_v49 = vpop.eup %4431 }
0x1af4   :  { %v4434_v22 = vpop.eup %4433  ;;  %2879 = vst [vmem:[#allocation1 + $0x1] ss:$4 sm:$0xff] %v4432_v49  ;;  %4437 = vpow2.f32 %v2867_v8 }
0x1af5   :  { %2881 = vst [vmem:[#allocation1 + $0x2] ss:$4 sm:$0xff] %v4434_v22  ;;  %4439 = vpow2.f32 %v2869_v7 }
0x1af8   :  { %v4436_v23 = vpop.eup %4435 }
0x1af9   :  { %2884 = vst [vmem:[#allocation1 + $0x20] ss:$4 sm:$0xff] %v4436_v23 }
0x1afa   :  { %v4438_v2 = vpop.eup %4437 }
0x1afb   :  { %v4440_v33 = vpop.eup %4439  ;;  %2886 = vst [vmem:[#allocation1 + $0x21] ss:$4 sm:$0xff] %v4438_v2 }
0x1afc   :  { %v2882_v27 = vld.sshfl [vmem:[#allocation1] sm:$0xff pattern:$0x73625140]  ;;  %2888 = vst [vmem:[#allocation1 + $0x22] ss:$4 sm:$0xff] %v4440_v33 }
0x1afd   :  { %v2892_v17 = vsel %vm524_vm0, %v2882_v27, 0.0 }
0x1afe   :  { %v2893_v59 = vrot.slane %v2892_v17, 4 }
0x1b00   :  { %v2894_v52 = vadd.f32 %v2893_v59, %v2892_v17 }
0x1b02   :  { %v2895_v42 = vrot.slane %v2894_v52, 2 }
0x1b03   :  { %v2889_v3 = vld.sshfl [vmem:[#allocation1 + $0x20] sm:$0xff pattern:$0x73625140] }
0x1b04   :  { %v2896_v1 = vadd.f32 %v2895_v42, %v2894_v52  ;;  %v2899_v5 = vsel %vm524_vm0, %v2889_v3, 0.0 }
0x1b05   :  { %v2900_v51 = vrot.slane %v2899_v5, 4 }
0x1b06   :  { %v2897_v19 = vrot.slane %v2896_v1, 1 }
0x1b07   :  { %v2901_v48 = vadd.f32 %v2900_v51, %v2899_v5 }
0x1b08   :  { %v2898_v12 = vadd.f32 %v2897_v19, %v2896_v1 }
0x1b09   :  { %v2902_v46 = vrot.slane %v2901_v48, 2 }
0x1b0a   :  { %4441 = vrcp.f32 %v2898_v12 }
0x1b0b   :  { %v2903_v58 = vadd.f32 %v2902_v46, %v2901_v48  ;;  %v4554_v46 = vld [vmem:[%s6035_s9 + $0x18] sm:$0xff] }
0x1b0d   :  { %v2904_v21 = vrot.slane %v2903_v58, 1 }
0x1b0f   :  { %v2905_v56 = vadd.f32 %v2904_v21, %v2903_v58 }
0x1b10   :  { %v4442_v30 = vpop.eup %4441 }
0x1b11   :  { %v2910_v39 = vrot.slane %v4442_v30, 2  ;;  %v2911_v45 = vrot.slane %v4442_v30, 4  ;;  %v2918_v43 = vmul.f32 %v4442_v30, %v4430_v14  ;;  %4443 = vrcp.f32 %v2905_v56 }
0x1b12   :  { %v3036_v56 = vrot.slane %v5094_v0, 4 }
0x1b13   :  { %v2919_v44 = vmul.f32 %v4432_v49, %v2910_v39  ;;  %v2920_v28 = vmul.f32 %v4434_v22, %v2911_v45  ;;  %v2924_v40 = vmul.f32 %v2918_v43, %v5354_v25  ;;  %v5836_v39 = vld [vmem:[%s6034_s8] ss:$0 sm:$0xff]  ;;  %s4801_s8 = smov 6  }
0x1b15   :  { %v2925_v9 = vmul.f32 %v2919_v44, %v5363_v53  ;;  %v2926_v4 = vmul.f32 %v2920_v28, %v5368_v47  ;;  %2936 = vst [vmem:[#allocation1] ss:$4 sm:$0xff] %v2924_v40 }
0x1b17   :  { %v4444_v32 = vpop.eup %4443  ;;  %2938 = vst [vmem:[#allocation1 + $0x1] ss:$4 sm:$0xff] %v2925_v9 }
0x1b18   :  { %2940 = vst [vmem:[#allocation1 + $0x2] ss:$4 sm:$0xff] %v2926_v4  ;;  %v2912_v50 = vrot.slane %v4444_v32, 2  ;;  %v2913_v24 = vrot.slane %v4444_v32, 4  ;;  %v2921_v61 = vmul.f32 %v4444_v32, %v4436_v23 }
0x1b1a   :  { %v2922_v62 = vmul.f32 %v4438_v2, %v2912_v50  ;;  %v2923_v55 = vmul.f32 %v4440_v33, %v2913_v24  ;;  %v2927_v10 = vmul.f32 %v2921_v61, %v5384_v31 }
0x1b1c   :  { %v2928_v14 = vmul.f32 %v2922_v62, %v5379_v57  ;;  %v2929_v8 = vmul.f32 %v2923_v55, %v5388_v26  ;;  %2943 = vst [vmem:[#allocation1 + $0x20] ss:$4 sm:$0xff] %v2927_v10 }
0x1b1e   :  { %2945 = vst [vmem:[#allocation1 + $0x21] ss:$4 sm:$0xff] %v2928_v14 }
0x1b1f   :  { %2947 = vst [vmem:[#allocation1 + $0x22] ss:$4 sm:$0xff] %v2929_v8  ;;  %v2941_v7 = vld.sshfl [vmem:[#allocation1] sm:$0xff pattern:$0x73625140] }
0x1b20   :  { %v2951_v49 = vsel %vm524_vm0, %v2941_v7, 0.0  ;;  %3108 = vst [vmem:[#allocation1] ss:$4 sm:$0xff] %v5247_v15 }
0x1b21   :  { %v2952_v22 = vrot.slane %v2951_v49, 4  ;;  %3110 = vst [vmem:[#allocation1 + $0x1] ss:$4 sm:$0xff] %v5250_v11 }
0x1b22   :  { %3112 = vst [vmem:[#allocation1 + $0x2] ss:$4 sm:$0xff] %v5253_v13 }
0x1b23   :  { %v2953_v23 = vadd.f32 %v2952_v22, %v2951_v49 }
0x1b25   :  { %v2954_v33 = vrot.slane %v2953_v23, 2 }
0x1b26   :  { %v2948_v2 = vld.sshfl [vmem:[#allocation1 + $0x20] sm:$0xff pattern:$0x73625140] }
0x1b27   :  { %v2958_v27 = vsel %vm524_vm0, %v2948_v2, 0.0  ;;  %3115 = vst [vmem:[#allocation1 + $0x20] ss:$4 sm:$0xff] %v5256_v16  ;;  %v2955_v59 = vadd.f32 %v2954_v33, %v2953_v23 }
0x1b28   :  { %v2959_v17 = vrot.slane %v2958_v27, 4  ;;  %3117 = vst [vmem:[#allocation1 + $0x21] ss:$4 sm:$0xff] %v5262_v18 }
0x1b29   :  { %3119 = vst [vmem:[#allocation1 + $0x22] ss:$4 sm:$0xff] %v5265_v20  ;;  %v2956_v3 = vrot.slane %v2955_v59, 1 }
0x1b2a   :  { %v2960_v52 = vadd.f32 %v2959_v17, %v2958_v27 }
0x1b2b   :  { %v2957_v51 = vadd.f32 %v2956_v3, %v2955_v59  ;;  %v4560_v59 = vld [vmem:[#allocation11 + $0x10] sm:$0xff]  ;;  %v3838_v3 = vld [vmem:[#allocation15 + $0x18] sm:$0xff] }
0x1b2c   :  { %v2961_v42 = vrot.slane %v2960_v52, 2  ;;  %3857 = vmatpush.msrb.mxu2 %v3838_v3 }
0x1b2e   :  { %v2962_v1 = vadd.f32 %v2961_v42, %v2960_v52  ;;  %v4561_v52 = vld [vmem:[#allocation11 + $0x8] sm:$0xff]  ;;  %v4562_v42 = vld [vmem:[#allocation11] sm:$0xff] }
0x1b30   :  { %v2963_v5 = vrot.slane %v2962_v1, 1 }
0x1b32   :  { %v2964_v19 = vadd.f32 %v2963_v5, %v2962_v1  ;;  %v3837_v1 = vld [vmem:[#allocation15 + $0x10] sm:$0xff]  ;;  %v3836_v5 = vld [vmem:[#allocation15 + $0x8] sm:$0xff] }
0x1b33   :  { %3858 = vmatpush.msrb.mxu2 %v3837_v1 }
0x1b34   :  { %v2967_v48 = vsel %vm666_vm9, %v2964_v19, %v2957_v51  ;;  %v3835_v51 = vld [vmem:[#allocation15] sm:$0xff] }
0x1b35   :  { %4219 = vmatmul.msk.f32.vlgmr.msra.gmra.mxu0 %vm274_vm10, %v2967_v48  ;;  %3859 = vmatpush.msrb.mxu2 %v3836_v5 }
0x1b36   :  { %3410 = vmatpush.msra.mxu0 %v5742_v38  ;;  %v4555_v38 = vld [vmem:[%s6035_s9 + $0x10] sm:$0xff] }
0x1b37   :  { %3860 = vmatpush.msrb.mxu2 %v3835_v51 }
0x1b38   :  { %3411 = vmatpush.msra.mxu0 %v5748_v63  ;;  %v4556_v63 = vld [vmem:[%s6035_s9 + $0x8] sm:$0xff] }
0x1b3a   :  { %3412 = vmatpush.msra.mxu0 %v5754_v29  ;;  %v4557_v29 = vld [vmem:[%s6035_s9] sm:$0xff]  ;;  %s4802_s9 = smov 122  }
0x1b3c   :  { %3413 = vmatpush.msra.mxu0 %v5760_v54  ;;  %v3010_v54 = vpop.f32.mrf.mxu2 }
0x1bb2   :  { %v2987_v12 = vpop.f32.mrf.mxu0 }
0x1bb3   :  { %2992 = vst.msk [vmem:[#allocation3 + $0xa] sm:$0x3] %vm1080_vm15, %v2987_v12  ;;  %4221 = vmatmul.msk.f32.vlgmr.msrb.gmra.mxu1 %vm274_vm10, %v2987_v12 }
0x1bb4   :  { %3476 = vmatpush.msrb.mxu1 %v4554_v46  ;;  %v3113_v46 = vld.sshfl [vmem:[#allocation1] sm:$0xff pattern:$0x73625140] }
0x1bb6   :  { %3477 = vmatpush.msrb.mxu1 %v4555_v38 }
0x1bb8   :  { %3478 = vmatpush.msrb.mxu1 %v4556_v63 }
0x1bba   :  { %3479 = vmatpush.msrb.mxu1 %v4557_v29  ;;  %v3120_v29 = vld.sshfl [vmem:[#allocation1 + $0x20] sm:$0xff pattern:$0x73625140] }
0x1c30   :  { %v3033_v58 = vpop.f32.mrf.mxu1 }
0x1c31   :  { %v3034_v21 = vadd.f32 %v3033_v58, %v3010_v54 }
0x1c33   :  { %v3038_v30 = vadd.f32 %v3036_v56, %v3034_v21 }
0x1c35   :  { %v3039_v45 = vadd.f32 %v5836_v39, %v3038_v30 }
0x1c37   :  { %4445 = vtanh.f32 %v3039_v45  ;;  %v4222_v44 = vmul.f32 -1.442695, %v3039_v45 }
0x1c39   :  { %4447 = vpow2.f32 %v4222_v44 }
0x1c3d   :  { %v4446_v43 = vpop.eup %4445 }
0x1c3e   :  { %3062 = vrot.lane.b32.xlu0 %v4446_v43, %s4800_s17  ;;  %v6105_v43 = vld [vmem:[#allocation28_spill] sm:$0xff] }
0x1c3f   :  { %v4448_v28 = vpop.eup %4447 }
0x1c40   :  { %v3043_v40 = vadd.f32 1.0, %v4448_v28  ;;  %v6106_v28 = vld [vmem:[#allocation27_spill] sm:$0xff] }
0x1c42   :  { %4449 = vrcp.f32 %v3043_v40  ;;  %v3055_v61 = vand.u32 2147483648, %v3043_v40  ;;  %vm3049_vm12 = vweird.f32 %v3043_v40  ;;  %v3053_v62 = vand.u32 2147483647, %v3043_v40 }
0x1c44   :  { %v3056_v10 = vor.u32 1.1754944e-38, %v3055_v61  ;;  %vm3054_vm14 = vcmp.eq.f32.partialorder %v3053_v62, 8.507059e+37 }
0x1c48   :  { %v4450_v9 = vpop.eup %4449 }
0x1c49   :  { %v3045_v4 = vmul.f32 %v4450_v9, %v3043_v40  ;;  %vm3050_vm11 = vweird.f32 %v4450_v9  ;;  %v5862_v40 = vld [vmem:[#allocation3] sm:$0xff] }
0x1c4a   :  { %vm3051_vm13 = vmor %vm3049_vm12, %vm3050_vm11 }
0x1c4b   :  { %v3046_v32 = vsub.f32 1.0, %v3045_v4 }
0x1c4d   :  { %v3047_v50 = vmul.f32 %v4450_v9, %v3046_v32 }
0x1c4f   :  { %v3048_v24 = vadd.f32 %v4450_v9, %v3047_v50 }
0x1c51   :  { %v3052_v55 = vsel %vm3051_vm13, %v4450_v9, %v3048_v24 }
0x1c52   :  { %v3057_v8 = vsel %vm3054_vm14, %v3056_v10, %v3052_v55 }
0x1c53   :  { %v3060_v49 = vmul.f32 %v3057_v8, %v5774_v41  ;;  %v4559_v41 = vld [vmem:[#allocation11 + $0x18] sm:$0xff] }
0x1cb0   :  { %v3063_v14 = vpop.permute.xlu0 %3062 }
0x1cb1   :  { %v3065_v7 = vmul.f32 %v3063_v14, %v3057_v8 }
0x1cb3   :  { %3067 = vrot.lane.b32.xlu1 %v3065_v7, %s4799_s25 }
0x1d25   :  { %v3068_v22 = vpop.permute.xlu1 %3067 }
0x1d26   :  { %v5842_v23 = vadd.f32 %v3068_v22, %v3060_v49 }
0x1d28   :  { %4451 = vtanh.f32 %v5842_v23 }
0x1d2e   :  { %v4452_v2 = vpop.eup %4451 }
0x1d2f   :  { %3073 = vrot.lane.b32.xlu2 %v4452_v2, %s4800_s17 }
0x1d89   :  { %v3074_v33 = vpop.permute.xlu2 %3073 }
0x1d8a   :  { %v3076_v27 = vmul.f32 %v3074_v33, %v3057_v8 }
0x1d8c   :  { %3078 = vrot.lane.b32.xlu0 %v3076_v27, %s4799_s25 }
0x1dfe   :  { %v3079_v17 = vpop.permute.xlu0 %3078 }
0x1dff   :  { %3373 = vst.msk [vmem:[#allocation2 + $0xc] sm:$0x3] %vm1080_vm15, %v3079_v17  ;;  %4223 = vmatmul.msk.f32.vlgmr.msrb.gmra.mxu0 %vm274_vm10, %v3079_v17  ;;  %4227 = vmatmul.msk.f32.vlgmr.msra.gmra.mxu3 %vm274_vm10, %v3079_v17 }
0x1e00   :  { %3746 = vmatpush.msrb.mxu0 %v4559_v41 }
0x1e02   :  { %3747 = vmatpush.msrb.mxu0 %v4560_v59 }
0x1e04   :  { %3748 = vmatpush.msrb.mxu0 %v4561_v52 }
0x1e06   :  { %3749 = vmatpush.msrb.mxu0 %v4562_v42 }
0x1e7c   :  { %v3099_v19 = vpop.f32.mrf.mxu0 }
0x1e7d   :  { %v3103_v48 = vrot.slane %v3099_v19, 1  ;;  %v3104_v12 = vperm.slane %v3099_v19, 0 }
0x1e7f   :  { %v3105_v38 = vperm.slane %v3103_v48, 0  ;;  %v3123_v63 = vmul.f32 %v3113_v46, %v3104_v12 }
0x1e81   :  { %v3124_v54 = vmul.f32 %v3120_v29, %v3105_v38  ;;  %v3127_v58 = vrot.slane %v3123_v63, 2  ;;  %v3128_v21 = vrot.slane %v3123_v63, 4  ;;  %3131 = vst [vmem:[#allocation1] ss:$4 sm:$0xff] %v3123_v63 }
0x1e83   :  { %v3129_v56 = vrot.slane %v3124_v54, 2  ;;  %v3130_v30 = vrot.slane %v3124_v54, 4  ;;  %3133 = vst [vmem:[#allocation1 + $0x1] ss:$4 sm:$0xff] %v3127_v58 }
0x1e84   :  { %3135 = vst [vmem:[#allocation1 + $0x2] ss:$4 sm:$0xff] %v3128_v21 }
0x1e85   :  { %3137 = vst [vmem:[#allocation1 + $0x3] ss:$4 sm:$0xff] %v3124_v54 }
0x1e86   :  { %3139 = vst [vmem:[#allocation1 + $0x20] ss:$4 sm:$0xff] %v3129_v56 }
0x1e87   :  { %3141 = vst [vmem:[#allocation1 + $0x21] ss:$4 sm:$0xff] %v3130_v30 }
0x1e8c   :  { %v3142_v45 = vld.sshfl [vmem:[#allocation1] sm:$0xff pattern:$0x73625140] }
0x1e8d   :  { %4224 = vmatmul.msk.f32.vlgmr.msra.gmra.mxu2 %vm274_vm10, %v3142_v45  ;;  %3144 = vst [vmem:[#allocation1] ss:$4 sm:$0xff] %v5139_v34 }
0x1e8e   :  { %3146 = vst [vmem:[#allocation1 + $0x1] ss:$4 sm:$0xff] %v5142_v35  ;;  %4244 = vmatpush.xpose.msk.msra.mxu2 %vm274_vm10, %v6105_v43  ;;  %v3143_v44 = vld.sshfl [vmem:[#allocation1 + $0x20] sm:$0xff pattern:$0x73625140] }
0x1e8f   :  { %3148 = vst [vmem:[#allocation1 + $0x2] ss:$4 sm:$0xff] %v5145_v36 }
0x1e90   :  { %3150 = vst [vmem:[#allocation1 + $0x3] ss:$4 sm:$0xff] %v5147_v37 }
0x1e91   :  { %3152 = vst [vmem:[#allocation1 + $0x20] ss:$4 sm:$0xff] %v6101_v6 }
0x1e92   :  { %4245 = vmatpush.xpose.msk.msra.mxu2 %vm274_vm10, %v6106_v28  ;;  %3154 = vst [vmem:[#allocation1 + $0x21] ss:$4 sm:$0xff] %v6102_v60 }
0x1e95   :  { %4225 = vmatmul.msk.f32.gmra.mxu2 %vm274_vm10, %v3143_v44 }
0x1e97   :  { %v3155_v9 = vld.sshfl [vmem:[#allocation1] sm:$0xff pattern:$0x73625140] }
0x1e99   :  { %v3156_v62 = vld.sshfl [vmem:[#allocation1 + $0x20] sm:$0xff pattern:$0x73625140] }
0x1e9d   :  { %4236 = vmatmul.msk.f32.vlgmr.msrb.gmra.mxu2 %vm274_vm10, %v5862_v40 }
0x1f10   :  { %v3180_v4 = vpop.f32.mrf.mxu2 }
0x1f11   :  { %v3181_v32 = vadd.f32 %v3180_v4, %v3155_v9 }
0x1f13   :  { %v3188_v50 = vrot.slane %v3181_v32, 2  ;;  %v3189_v24 = vrot.slane %v3181_v32, 4  ;;  %v3190_v61 = vrot.slane %v3181_v32, 6  ;;  %3196 = vst [vmem:[#allocation1] ss:$4 sm:$0xff] %v3181_v32 }
0x1f15   :  { %3198 = vst [vmem:[#allocation1 + $0x1] ss:$4 sm:$0xff] %v3188_v50 }
0x1f16   :  { %3200 = vst [vmem:[#allocation1 + $0x2] ss:$4 sm:$0xff] %v3189_v24 }
0x1f17   :  { %3203 = vst [vmem:[#allocation1 + $0x20] ss:$4 sm:$0xff] %v3190_v61 }
0x1f18   :  { %v3183_v55 = vpop.f32.mrf.mxu2 }
0x1f19   :  { %v3184_v10 = vadd.f32 %v3183_v55, %v3156_v62 }
0x1f1b   :  { %v3191_v14 = vrot.slane %v3184_v10, 2  ;;  %3205 = vst [vmem:[#allocation1 + $0x21] ss:$4 sm:$0xff] %v3184_v10 }
0x1f1d   :  { %v3201_v8 = vld.sshfl [vmem:[#allocation1] sm:$0xff pattern:$0x73625140]  ;;  %3207 = vst [vmem:[#allocation1 + $0x22] ss:$4 sm:$0xff] %v3191_v14 }
0x1f1e   :  { %v3211_v7 = vsel %vm524_vm0, %v3201_v8, -inf }
0x1f1f   :  { %v3212_v49 = vrot.slane %v3211_v7, 4 }
0x1f21   :  { %v3213_v22 = vmax.f32 %v3211_v7, %v3212_v49 }
0x1f23   :  { %v3214_v2 = vrot.slane %v3213_v22, 2 }
0x1f24   :  { %v3208_v33 = vld.sshfl [vmem:[#allocation1 + $0x20] sm:$0xff pattern:$0x73625140] }
0x1f25   :  { %v3215_v27 = vmax.f32 %v3213_v22, %v3214_v2  ;;  %v3218_v17 = vsel %vm524_vm0, %v3208_v33, -inf }
0x1f26   :  { %v3219_v41 = vrot.slane %v3218_v17, 4 }
0x1f27   :  { %v3216_v59 = vrot.slane %v3215_v27, 1 }
0x1f28   :  { %v3220_v52 = vmax.f32 %v3218_v17, %v3219_v41 }
0x1f29   :  { %v3217_v42 = vmax.f32 %v3215_v27, %v3216_v59 }
0x1f2a   :  { %v3221_v3 = vrot.slane %v3220_v52, 2 }
0x1f2b   :  { %v3227_v1 = vrot.slane %v3217_v42, 2  ;;  %v3228_v5 = vrot.slane %v3217_v42, 4  ;;  %v3235_v51 = vsub.f32 %v3181_v32, %v3217_v42 }
0x1f2c   :  { %v3222_v19 = vmax.f32 %v3220_v52, %v3221_v3 }
0x1f2d   :  { %v3236_v48 = vsub.f32 %v3188_v50, %v3227_v1  ;;  %v3237_v12 = vsub.f32 %v3189_v24, %v3228_v5  ;;  %v3241_v46 = vmul.f32 1.442695, %v3235_v51 }
0x1f2e   :  { %v3223_v38 = vrot.slane %v3222_v19, 1 }
0x1f2f   :  { %4453 = vpow2.f32 %v3241_v46  ;;  %v3243_v63 = vmul.f32 1.442695, %v3236_v48  ;;  %v3245_v29 = vmul.f32 1.442695, %v3237_v12 }
0x1f30   :  { %v3224_v54 = vmax.f32 %v3222_v19, %v3223_v38 }
0x1f31   :  { %4455 = vpow2.f32 %v3243_v63 }
0x1f32   :  { %4457 = vpow2.f32 %v3245_v29  ;;  %v3229_v58 = vrot.slane %v3224_v54, 2  ;;  %v3230_v21 = vrot.slane %v3224_v54, 4  ;;  %v3238_v56 = vsub.f32 %v3190_v61, %v3224_v54 }
0x1f34   :  { %v3239_v30 = vsub.f32 %v3184_v10, %v3229_v58  ;;  %v3240_v45 = vsub.f32 %v3191_v14, %v3230_v21  ;;  %v3247_v43 = vmul.f32 1.442695, %v3238_v56 }
0x1f35   :  { %v4454_v44 = vpop.eup %4453 }
0x1f36   :  { %3259 = vst [vmem:[#allocation1] ss:$4 sm:$0xff] %v4454_v44  ;;  %4459 = vpow2.f32 %v3247_v43  ;;  %v3249_v28 = vmul.f32 1.442695, %v3239_v30  ;;  %v3251_v9 = vmul.f32 1.442695, %v3240_v45 }
0x1f37   :  { %v4456_v4 = vpop.eup %4455 }
0x1f38   :  { %v4458_v32 = vpop.eup %4457  ;;  %3261 = vst [vmem:[#allocation1 + $0x1] ss:$4 sm:$0xff] %v4456_v4  ;;  %4461 = vpow2.f32 %v3249_v28 }
0x1f39   :  { %3263 = vst [vmem:[#allocation1 + $0x2] ss:$4 sm:$0xff] %v4458_v32  ;;  %4463 = vpow2.f32 %v3251_v9 }
0x1f3c   :  { %v4460_v50 = vpop.eup %4459 }
0x1f3d   :  { %3266 = vst [vmem:[#allocation1 + $0x20] ss:$4 sm:$0xff] %v4460_v50 }
0x1f3e   :  { %v4462_v24 = vpop.eup %4461 }
0x1f3f   :  { %v4464_v62 = vpop.eup %4463  ;;  %3268 = vst [vmem:[#allocation1 + $0x21] ss:$4 sm:$0xff] %v4462_v24 }
0x1f40   :  { %v3264_v61 = vld.sshfl [vmem:[#allocation1] sm:$0xff pattern:$0x73625140]  ;;  %3270 = vst [vmem:[#allocation1 + $0x22] ss:$4 sm:$0xff] %v4464_v62 }
0x1f41   :  { %v3274_v55 = vsel %vm524_vm0, %v3264_v61, 0.0 }
0x1f42   :  { %v3275_v10 = vrot.slane %v3274_v55, 4 }
0x1f44   :  { %v3276_v14 = vadd.f32 %v3275_v10, %v3274_v55 }
0x1f46   :  { %v3277_v8 = vrot.slane %v3276_v14, 2 }
0x1f47   :  { %v3271_v7 = vld.sshfl [vmem:[#allocation1 + $0x20] sm:$0xff pattern:$0x73625140] }
0x1f48   :  { %v3278_v49 = vadd.f32 %v3277_v8, %v3276_v14  ;;  %v3281_v22 = vsel %vm524_vm0, %v3271_v7, 0.0 }
0x1f49   :  { %v3282_v2 = vrot.slane %v3281_v22, 4 }
0x1f4a   :  { %v3279_v33 = vrot.slane %v3278_v49, 1 }
0x1f4b   :  { %v3283_v27 = vadd.f32 %v3282_v2, %v3281_v22  ;;  %v3418_v22 = vrot.slane %v5094_v0, 6 }
0x1f4c   :  { %v3280_v17 = vadd.f32 %v3279_v33, %v3278_v49 }
0x1f4d   :  { %v3284_v41 = vrot.slane %v3283_v27, 2 }
0x1f4e   :  { %4465 = vrcp.f32 %v3280_v17 }
0x1f4f   :  { %v3285_v59 = vadd.f32 %v3284_v41, %v3283_v27 }
0x1f51   :  { %v3286_v52 = vrot.slane %v3285_v59, 1 }
0x1f53   :  { %v3287_v42 = vadd.f32 %v3286_v52, %v3285_v59 }
0x1f54   :  { %v4466_v3 = vpop.eup %4465 }
0x1f55   :  { %v3292_v1 = vrot.slane %v4466_v3, 2  ;;  %v3293_v5 = vrot.slane %v4466_v3, 4  ;;  %v3300_v51 = vmul.f32 %v4466_v3, %v4454_v44  ;;  %4467 = vrcp.f32 %v3287_v42 }
0x1f57   :  { %v3301_v19 = vmul.f32 %v4456_v4, %v3292_v1  ;;  %v3302_v48 = vmul.f32 %v4458_v32, %v3293_v5  ;;  %v3306_v12 = vmul.f32 %v3300_v51, %v5354_v25 }
0x1f59   :  { %v3307_v46 = vmul.f32 %v3301_v19, %v5363_v53  ;;  %v3308_v38 = vmul.f32 %v3302_v48, %v5368_v47  ;;  %3318 = vst [vmem:[#allocation1] ss:$4 sm:$0xff] %v3306_v12 }
0x1f5b   :  { %v4468_v63 = vpop.eup %4467  ;;  %3320 = vst [vmem:[#allocation1 + $0x1] ss:$4 sm:$0xff] %v3307_v46 }
0x1f5c   :  { %3322 = vst [vmem:[#allocation1 + $0x2] ss:$4 sm:$0xff] %v3308_v38  ;;  %v3294_v29 = vrot.slane %v4468_v63, 2  ;;  %v3295_v54 = vrot.slane %v4468_v63, 4  ;;  %v3303_v58 = vmul.f32 %v4468_v63, %v4460_v50 }
0x1f5e   :  { %v3304_v21 = vmul.f32 %v4462_v24, %v3294_v29  ;;  %v3305_v56 = vmul.f32 %v4464_v62, %v3295_v54  ;;  %v3309_v30 = vmul.f32 %v3303_v58, %v5384_v31 }
0x1f60   :  { %v3310_v45 = vmul.f32 %v3304_v21, %v5379_v57  ;;  %v3311_v43 = vmul.f32 %v3305_v56, %v5388_v26  ;;  %3325 = vst [vmem:[#allocation1 + $0x20] ss:$4 sm:$0xff] %v3309_v30  ;;  %v3834_v56 = vld [vmem:[#allocation14 + $0x18] sm:$0xff]  ;;  %v3833_v30 = vld [vmem:[#allocation14 + $0x10] sm:$0xff] }
0x1f62   :  { %3327 = vst [vmem:[#allocation1 + $0x21] ss:$4 sm:$0xff] %v3310_v45  ;;  %v3832_v45 = vld [vmem:[#allocation14 + $0x8] sm:$0xff] }
0x1f63   :  { %3329 = vst [vmem:[#allocation1 + $0x22] ss:$4 sm:$0xff] %v3311_v43  ;;  %v3323_v44 = vld.sshfl [vmem:[#allocation1] sm:$0xff pattern:$0x73625140]  ;;  %v3831_v43 = vld [vmem:[#allocation14] sm:$0xff] }
0x1f64   :  { %v3333_v28 = vsel %vm524_vm0, %v3323_v44, 0.0  ;;  %3490 = vst [vmem:[#allocation1] ss:$4 sm:$0xff] %v5247_v15 }
0x1f65   :  { %v3334_v9 = vrot.slane %v3333_v28, 4  ;;  %3492 = vst [vmem:[#allocation1 + $0x1] ss:$4 sm:$0xff] %v5250_v11 }
0x1f66   :  { %3494 = vst [vmem:[#allocation1 + $0x2] ss:$4 sm:$0xff] %v5253_v13 }
0x1f67   :  { %v3335_v4 = vadd.f32 %v3334_v9, %v3333_v28  ;;  %v3941_v9 = vld [vmem:[#allocation17 + $0x18] sm:$0xff] }
0x1f68   :  { %3981 = vmatpush.msra.mxu3 %v3941_v9 }
0x1f69   :  { %v3336_v50 = vrot.slane %v3335_v4, 2 }
0x1f6a   :  { %v3330_v32 = vld.sshfl [vmem:[#allocation1 + $0x20] sm:$0xff pattern:$0x73625140] }
0x1f6b   :  { %v3340_v24 = vsel %vm524_vm0, %v3330_v32, 0.0  ;;  %3497 = vst [vmem:[#allocation1 + $0x20] ss:$4 sm:$0xff] %v5256_v16  ;;  %v3337_v61 = vadd.f32 %v3336_v50, %v3335_v4  ;;  %v3392_v16 = vpop.f32.mrf.mxu3  ;;  %v3940_v4 = vld [vmem:[#allocation17 + $0x10] sm:$0xff]  ;;  %v3939_v32 = vld [vmem:[#allocation17 + $0x8] sm:$0xff]  ;;  %v3938_v50 = vld [vmem:[#allocation17] sm:$0xff] }
0x1f6c   :  { %v3341_v62 = vrot.slane %v3340_v24, 4  ;;  %3499 = vst [vmem:[#allocation1 + $0x21] ss:$4 sm:$0xff] %v5262_v18  ;;  %3982 = vmatpush.msra.mxu3 %v3940_v4 }
0x1f6d   :  { %3501 = vst [vmem:[#allocation1 + $0x22] ss:$4 sm:$0xff] %v5265_v20  ;;  %v3338_v10 = vrot.slane %v3337_v61, 1 }
0x1f6e   :  { %v3342_v55 = vadd.f32 %v3341_v62, %v3340_v24  ;;  %3983 = vmatpush.msra.mxu3 %v3939_v32 }
0x1f6f   :  { %v3339_v8 = vadd.f32 %v3338_v10, %v3337_v61 }
0x1f70   :  { %v3343_v15 = vrot.slane %v3342_v55, 2  ;;  %3984 = vmatpush.msra.mxu3 %v3938_v50 }
0x1f72   :  { %v3344_v14 = vadd.f32 %v3343_v15, %v3342_v55  ;;  %v3495_v55 = vld.sshfl [vmem:[#allocation1] sm:$0xff pattern:$0x73625140] }
0x1f74   :  { %v3345_v11 = vrot.slane %v3344_v14, 1 }
0x1f76   :  { %v3346_v13 = vadd.f32 %v3345_v11, %v3344_v14  ;;  %v3502_v14 = vld.sshfl [vmem:[#allocation1 + $0x20] sm:$0xff pattern:$0x73625140] }
0x1f78   :  { %v3349_v7 = vsel %vm666_vm9, %v3346_v13, %v3339_v8 }
0x1f79   :  { %4226 = vmatmul.msk.f32.vlgmr.msra.gmra.mxu1 %vm274_vm10, %v3349_v7 }
0x1f7a   :  { %3886 = vmatpush.msra.mxu1 %v3834_v56 }
0x1f7c   :  { %3887 = vmatpush.msra.mxu1 %v3833_v30 }
0x1f7e   :  { %3888 = vmatpush.msra.mxu1 %v3832_v45 }
0x1f80   :  { %3889 = vmatpush.msra.mxu1 %v3831_v43 }
0x1ff6   :  { %v3369_v49 = vpop.f32.mrf.mxu1 }
0x1ff7   :  { %3374 = vst.msk [vmem:[#allocation3 + $0xc] sm:$0x3] %vm1080_vm15, %v3369_v49  ;;  %4228 = vmatmul.msk.f32.vlgmr.msra.gmra.mxu0 %vm274_vm10, %v3369_v49 }
0x2074   :  { %v3415_v18 = vpop.f32.mrf.mxu0 }
0x2075   :  { %v3416_v20 = vadd.f32 %v3415_v18, %v3392_v16 }
0x2077   :  { %v3420_v2 = vadd.f32 %v3418_v22, %v3416_v20 }
0x2079   :  { %v3421_v33 = vadd.f32 %v5836_v39, %v3420_v2 }
0x207b   :  { %4469 = vtanh.f32 %v3421_v33  ;;  %v4229_v17 = vmul.f32 -1.442695, %v3421_v33 }
0x207d   :  { %4471 = vpow2.f32 %v4229_v17 }
0x2081   :  { %v4470_v27 = vpop.eup %4469 }
0x2082   :  { %3444 = vrot.lane.b32.xlu1 %v4470_v27, %s4800_s17 }
0x2083   :  { %v4472_v41 = vpop.eup %4471 }
0x2084   :  { %v3425_v59 = vadd.f32 1.0, %v4472_v41 }
0x2086   :  { %4473 = vrcp.f32 %v3425_v59  ;;  %v3437_v51 = vand.u32 2147483648, %v3425_v59  ;;  %vm3431_vm2 = vweird.f32 %v3425_v59  ;;  %v3435_v0 = vand.u32 2147483647, %v3425_v59 }
0x2088   :  { %v3438_v19 = vor.u32 1.1754944e-38, %v3437_v51  ;;  %vm3436_vm4 = vcmp.eq.f32.partialorder %v3435_v0, 8.507059e+37 }
0x208c   :  { %v4474_v52 = vpop.eup %4473 }
0x208d   :  { %v3427_v42 = vmul.f32 %v4474_v52, %v3425_v59  ;;  %vm3432_vm1 = vweird.f32 %v4474_v52 }
0x208e   :  { %vm3433_vm3 = vmor %vm3431_vm2, %vm3432_vm1 }
0x208f   :  { %v3428_v3 = vsub.f32 1.0, %v3427_v42 }
0x2091   :  { %v3429_v1 = vmul.f32 %v4474_v52, %v3428_v3 }
0x2093   :  { %v3430_v5 = vadd.f32 %v4474_v52, %v3429_v1 }
0x2095   :  { %v3434_v39 = vsel %vm3433_vm3, %v4474_v52, %v3430_v5 }
0x2096   :  { %v3439_v12 = vsel %vm3436_vm4, %v3438_v19, %v3434_v39 }
0x2097   :  { %v3442_v38 = vmul.f32 %v3439_v12, %v5842_v23  ;;  %v5897_v23 = vld [vmem:[#allocation2] sm:$0xff] }
0x20f4   :  { %v3445_v48 = vpop.permute.xlu1 %3444 }
0x20f5   :  { %v3447_v46 = vmul.f32 %v3445_v48, %v3439_v12 }
0x20f7   :  { %3449 = vrot.lane.b32.xlu2 %v3447_v46, %s4799_s25 }
0x2151   :  { %v3450_v63 = vpop.permute.xlu2 %3449 }
0x2152   :  { %v3452_v29 = vadd.f32 %v3450_v63, %v3442_v38 }
0x2154   :  { %4475 = vtanh.f32 %v3452_v29 }
0x215a   :  { %v4476_v54 = vpop.eup %4475 }
0x215b   :  { %3455 = vrot.lane.b32.xlu0 %v4476_v54, %s4800_s17 }
0x21cd   :  { %v3456_v58 = vpop.permute.xlu0 %3455 }
0x21ce   :  { %v3458_v21 = vmul.f32 %v3456_v58, %v3439_v12 }
0x21d0   :  { %3460 = vrot.lane.b32.xlu1 %v3458_v21, %s4799_s25 }
0x2242   :  { %v3461_v44 = vpop.permute.xlu1 %3460 }
0x2243   :  { %3755 = vst.msk [vmem:[#allocation2 + $0xe] sm:$0x3] %vm1080_vm15, %v3461_v44  ;;  %4230 = vmatmul.msk.f32.vlgmr.msrb.gmra.mxu1 %vm274_vm10, %v3461_v44 }
0x224a   :  { %v5901_v28 = vld [vmem:[#allocation2 + $0x8] sm:$0xff] }
0x224b   :  { %4238 = vmatmul.msk.f32.vlgmr.msra.gmra.mxu1 %vm274_vm10, %v5897_v23 }
0x2253   :  { %4239 = vmatmul.msk.f32.gmra.mxu1 %vm274_vm10, %v5901_v28 }
0x22c0   :  { %v3481_v24 = vpop.f32.mrf.mxu1 }
0x22c1   :  { %v3485_v62 = vrot.slane %v3481_v24, 1  ;;  %v3486_v61 = vperm.slane %v3481_v24, 0 }
0x22c3   :  { %v3487_v15 = vperm.slane %v3485_v62, 0  ;;  %v3505_v10 = vmul.f32 %v3495_v55, %v3486_v61 }
0x22c5   :  { %v3506_v11 = vmul.f32 %v3502_v14, %v3487_v15  ;;  %v3509_v8 = vrot.slane %v3505_v10, 2  ;;  %v3510_v13 = vrot.slane %v3505_v10, 4  ;;  %3513 = vst [vmem:[#allocation1] ss:$4 sm:$0xff] %v3505_v10 }
0x22c7   :  { %v3511_v7 = vrot.slane %v3506_v11, 2  ;;  %v3512_v49 = vrot.slane %v3506_v11, 4  ;;  %3515 = vst [vmem:[#allocation1 + $0x1] ss:$4 sm:$0xff] %v3509_v8 }
0x22c8   :  { %3517 = vst [vmem:[#allocation1 + $0x2] ss:$4 sm:$0xff] %v3510_v13 }
0x22c9   :  { %3519 = vst [vmem:[#allocation1 + $0x3] ss:$4 sm:$0xff] %v3506_v11 }
0x22ca   :  { %3521 = vst [vmem:[#allocation1 + $0x20] ss:$4 sm:$0xff] %v3511_v7 }
0x22cb   :  { %3523 = vst [vmem:[#allocation1 + $0x21] ss:$4 sm:$0xff] %v3512_v49 }
0x22d0   :  { %v3524_v16 = vld.sshfl [vmem:[#allocation1] sm:$0xff pattern:$0x73625140] }
0x22d1   :  { %4231 = vmatmul.msk.f32.vlgmr.msrb.gmra.mxu3 %vm274_vm10, %v3524_v16  ;;  %3526 = vst [vmem:[#allocation1] ss:$4 sm:$0xff] %v5139_v34 }
0x22d2   :  { %3528 = vst [vmem:[#allocation1 + $0x1] ss:$4 sm:$0xff] %v5142_v35  ;;  %v3525_v18 = vld.sshfl [vmem:[#allocation1 + $0x20] sm:$0xff pattern:$0x73625140] }
0x22d3   :  { %3530 = vst [vmem:[#allocation1 + $0x2] ss:$4 sm:$0xff] %v5145_v36 }
0x22d4   :  { %3532 = vst [vmem:[#allocation1 + $0x3] ss:$4 sm:$0xff] %v5147_v37 }
0x22d5   :  { %3534 = vst [vmem:[#allocation1 + $0x20] ss:$4 sm:$0xff] %v6101_v6 }
0x22d6   :  { %3536 = vst [vmem:[#allocation1 + $0x21] ss:$4 sm:$0xff] %v6102_v60 }
0x22d9   :  { %4232 = vmatmul.msk.f32.gmra.mxu3 %vm274_vm10, %v3525_v18 }
0x22db   :  { %v3537_v34 = vld.sshfl [vmem:[#allocation1] sm:$0xff pattern:$0x73625140] }
0x22dd   :  { %v3538_v37 = vld.sshfl [vmem:[#allocation1 + $0x20] sm:$0xff pattern:$0x73625140] }
0x22e1   :  { %4242 = vmatmul.msk.f32.vlgmr.msra.gmra.mxu3 %vm274_vm10, %v5897_v23 }
0x22e9   :  { %4243 = vmatmul.msk.f32.gmra.mxu3 %vm274_vm10, %v5901_v28 }
0x2354   :  { %v3562_v20 = vpop.f32.mrf.mxu3 }
0x2355   :  { %v3563_v35 = vadd.f32 %v3562_v20, %v3537_v34 }
0x2357   :  { %v3570_v22 = vrot.slane %v3563_v35, 2  ;;  %v3571_v2 = vrot.slane %v3563_v35, 4  ;;  %v3572_v36 = vrot.slane %v3563_v35, 6  ;;  %3578 = vst [vmem:[#allocation1] ss:$4 sm:$0xff] %v3563_v35 }
0x2359   :  { %3580 = vst [vmem:[#allocation1 + $0x1] ss:$4 sm:$0xff] %v3570_v22 }
0x235a   :  { %3582 = vst [vmem:[#allocation1 + $0x2] ss:$4 sm:$0xff] %v3571_v2 }
0x235b   :  { %3585 = vst [vmem:[#allocation1 + $0x20] ss:$4 sm:$0xff] %v3572_v36 }
0x235c   :  { %v3565_v6 = vpop.f32.mrf.mxu3 }
0x235d   :  { %v3566_v60 = vadd.f32 %v3565_v6, %v3538_v37 }
0x235f   :  { %v3573_v33 = vrot.slane %v3566_v60, 2  ;;  %3587 = vst [vmem:[#allocation1 + $0x21] ss:$4 sm:$0xff] %v3566_v60 }
0x2361   :  { %v3583_v27 = vld.sshfl [vmem:[#allocation1] sm:$0xff pattern:$0x73625140]  ;;  %3589 = vst [vmem:[#allocation1 + $0x22] ss:$4 sm:$0xff] %v3573_v33 }
0x2362   :  { %v3593_v17 = vsel %vm524_vm0, %v3583_v27, -inf }
0x2363   :  { %v3594_v41 = vrot.slane %v3593_v17, 4 }
0x2365   :  { %v3595_v59 = vmax.f32 %v3593_v17, %v3594_v41 }
0x2367   :  { %v3596_v52 = vrot.slane %v3595_v59, 2 }
0x2368   :  { %v3590_v42 = vld.sshfl [vmem:[#allocation1 + $0x20] sm:$0xff pattern:$0x73625140] }
0x2369   :  { %v3597_v3 = vmax.f32 %v3595_v59, %v3596_v52  ;;  %v3600_v1 = vsel %vm524_vm0, %v3590_v42, -inf }
0x236a   :  { %v3601_v5 = vrot.slane %v3600_v1, 4 }
0x236b   :  { %v3598_v51 = vrot.slane %v3597_v3, 1 }
0x236c   :  { %v3602_v0 = vmax.f32 %v3600_v1, %v3601_v5  ;;  %v3945_v5 = vld [vmem:[#allocation18 + $0x18] sm:$0xff] }
0x236d   :  { %v3599_v39 = vmax.f32 %v3597_v3, %v3598_v51  ;;  %v3944_v51 = vld [vmem:[#allocation18 + $0x10] sm:$0xff]  ;;  %3958 = vmatpush.msra.mxu0 %v3945_v5 }
0x236e   :  { %v3603_v19 = vrot.slane %v3602_v0, 2  ;;  %v4294_v5 = vld [vmem:[%s6045_s19] ss:$0 sm:$0xff] }
0x236f   :  { %v3609_v48 = vrot.slane %v3599_v39, 2  ;;  %v3610_v12 = vrot.slane %v3599_v39, 4  ;;  %v3617_v46 = vsub.f32 %v3563_v35, %v3599_v39  ;;  %v3943_v39 = vld [vmem:[#allocation18 + $0x8] sm:$0xff]  ;;  %3959 = vmatpush.msra.mxu0 %v3944_v51 }
0x2370   :  { %v3604_v38 = vmax.f32 %v3602_v0, %v3603_v19 }
0x2371   :  { %v3618_v63 = vsub.f32 %v3570_v22, %v3609_v48  ;;  %v3619_v29 = vsub.f32 %v3571_v2, %v3610_v12  ;;  %v3623_v54 = vmul.f32 1.442695, %v3617_v46  ;;  %v3942_v46 = vld [vmem:[#allocation18] sm:$0xff]  ;;  %3960 = vmatpush.msra.mxu0 %v3943_v39 }
0x2372   :  { %v3605_v58 = vrot.slane %v3604_v38, 1 }
0x2373   :  { %4477 = vpow2.f32 %v3623_v54  ;;  %v3625_v21 = vmul.f32 1.442695, %v3618_v63  ;;  %v3627_v56 = vmul.f32 1.442695, %v3619_v29  ;;  %3961 = vmatpush.msra.mxu0 %v3942_v46 }
0x2374   :  { %v3606_v30 = vmax.f32 %v3604_v38, %v3605_v58 }
0x2375   :  { %4479 = vpow2.f32 %v3625_v21 }
0x2376   :  { %4481 = vpow2.f32 %v3627_v56  ;;  %v3611_v45 = vrot.slane %v3606_v30, 2  ;;  %v3612_v43 = vrot.slane %v3606_v30, 4  ;;  %v3620_v44 = vsub.f32 %v3572_v36, %v3606_v30 }
0x2378   :  { %v3621_v9 = vsub.f32 %v3566_v60, %v3611_v45  ;;  %v3622_v4 = vsub.f32 %v3573_v33, %v3612_v43  ;;  %v3629_v32 = vmul.f32 1.442695, %v3620_v44 }
0x2379   :  { %v4478_v50 = vpop.eup %4477 }
0x237a   :  { %3641 = vst [vmem:[#allocation1] ss:$4 sm:$0xff] %v4478_v50  ;;  %4483 = vpow2.f32 %v3629_v32  ;;  %v3631_v24 = vmul.f32 1.442695, %v3621_v9  ;;  %v3633_v62 = vmul.f32 1.442695, %v3622_v4 }
0x237b   :  { %v4480_v61 = vpop.eup %4479 }
0x237c   :  { %v4482_v55 = vpop.eup %4481  ;;  %3643 = vst [vmem:[#allocation1 + $0x1] ss:$4 sm:$0xff] %v4480_v61  ;;  %4485 = vpow2.f32 %v3631_v24 }
0x237d   :  { %3645 = vst [vmem:[#allocation1 + $0x2] ss:$4 sm:$0xff] %v4482_v55  ;;  %4487 = vpow2.f32 %v3633_v62 }
0x2380   :  { %v4484_v15 = vpop.eup %4483 }
0x2381   :  { %3648 = vst [vmem:[#allocation1 + $0x20] ss:$4 sm:$0xff] %v4484_v15 }
0x2382   :  { %v4486_v10 = vpop.eup %4485 }
0x2383   :  { %v4488_v14 = vpop.eup %4487  ;;  %3650 = vst [vmem:[#allocation1 + $0x21] ss:$4 sm:$0xff] %v4486_v10 }
0x2384   :  { %v3646_v11 = vld.sshfl [vmem:[#allocation1] sm:$0xff pattern:$0x73625140]  ;;  %3652 = vst [vmem:[#allocation1 + $0x22] ss:$4 sm:$0xff] %v4488_v14 }
0x2385   :  { %v3656_v8 = vsel %vm524_vm0, %v3646_v11, 0.0 }
0x2386   :  { %v3657_v13 = vrot.slane %v3656_v8, 4 }
0x2388   :  { %v3658_v7 = vadd.f32 %v3657_v13, %v3656_v8 }
0x238a   :  { %v3659_v49 = vrot.slane %v3658_v7, 2 }
0x238b   :  { %v3653_v16 = vld.sshfl [vmem:[#allocation1 + $0x20] sm:$0xff pattern:$0x73625140] }
0x238c   :  { %v3660_v18 = vadd.f32 %v3659_v49, %v3658_v7  ;;  %v3663_v34 = vsel %vm524_vm0, %v3653_v16, 0.0  ;;  %v6107_v16 = vld [vmem:[#allocation29_spill] sm:$0xff] }
0x238d   :  { %v3664_v20 = vrot.slane %v3663_v34, 4  ;;  %v4021_v39 = vadd.s32 8, %v6107_v16 }
0x238e   :  { %v3661_v35 = vrot.slane %v3660_v18, 1 }
0x238f   :  { %v3665_v22 = vadd.f32 %v3664_v20, %v3663_v34 }
0x2390   :  { %v3662_v2 = vadd.f32 %v3661_v35, %v3660_v18  ;;  %v4026_v18 = vand.u32 1, %v6107_v16 }
0x2391   :  { %v3666_v36 = vrot.slane %v3665_v22, 2 }
0x2392   :  { %4489 = vrcp.f32 %v3662_v2  ;;  %v4293_v2 = vld [vmem:[%s6040_s14] ss:$0 sm:$0xff] }
0x2393   :  { %v3667_v37 = vadd.f32 %v3666_v36, %v3665_v22  ;;  %v3766_v36 = vmul.f32 %v4293_v2, %v5901_v28 }
0x2395   :  { %v3668_v6 = vrot.slane %v3667_v37, 1 }
0x2397   :  { %v3669_v60 = vadd.f32 %v3668_v6, %v3667_v37  ;;  %v3770_v37 = vsel %vm274_vm10, %v3766_v36, 0.0  ;;  %v3765_v6 = vmul.f32 %v4293_v2, %v5897_v23 }
0x2398   :  { %v4490_v33 = vpop.eup %4489 }
0x2399   :  { %v3674_v27 = vrot.slane %v4490_v33, 2  ;;  %v3675_v17 = vrot.slane %v4490_v33, 4  ;;  %v3682_v41 = vmul.f32 %v4490_v33, %v4478_v50  ;;  %4491 = vrcp.f32 %v3669_v60  ;;  %v3891_v33 = vpop.f32.mrf.mxu1 }
0x239a   :  { %v3767_v60 = vsel %vm274_vm10, %v3765_v6, 0.0 }
0x239b   :  { %v3683_v59 = vmul.f32 %v4480_v61, %v3674_v27  ;;  %v3684_v52 = vmul.f32 %v4482_v55, %v3675_v17  ;;  %v3688_v42 = vmul.f32 %v3682_v41, %v5354_v25  ;;  %v6110_v27 = vld [vmem:[#allocation30_spill] sm:$0xff]  ;;  %v6111_v41 = vld [vmem:[#allocation31_spill] sm:$0xff] }
0x239d   :  { %v3689_v3 = vmul.f32 %v3683_v59, %v5363_v53  ;;  %v3690_v1 = vmul.f32 %v3684_v52, %v5368_v47  ;;  %3700 = vst [vmem:[#allocation1] ss:$4 sm:$0xff] %v3688_v42  ;;  %v6112_v52 = vld [vmem:[#allocation26_spill] sm:$0xff] }
0x239f   :  { %v4492_v0 = vpop.eup %4491  ;;  %3702 = vst [vmem:[#allocation1 + $0x1] ss:$4 sm:$0xff] %v3689_v3 }
0x23a0   :  { %3704 = vst [vmem:[#allocation1 + $0x2] ss:$4 sm:$0xff] %v3690_v1  ;;  %v3676_v19 = vrot.slane %v4492_v0, 2  ;;  %v3677_v48 = vrot.slane %v4492_v0, 4  ;;  %v3685_v12 = vmul.f32 %v4492_v0, %v4484_v15  ;;  %v3986_v15 = vpop.f32.mrf.mxu3 }
0x23a1   :  { %v3894_v42 = vpop.f32.mrf.mxu1 }
0x23a2   :  { %v3686_v38 = vmul.f32 %v4486_v10, %v3676_v19  ;;  %v3687_v63 = vmul.f32 %v4488_v14, %v3677_v48  ;;  %v3691_v25 = vmul.f32 %v3685_v12, %v5384_v31  ;;  %v3862_v14 = vpop.f32.mrf.mxu2  ;;  %v4033_v19 = vand.u32 1, %v4021_v39 }
0x23a4   :  { %v3692_v53 = vmul.f32 %v3686_v38, %v5379_v57  ;;  %v3693_v47 = vmul.f32 %v3687_v63, %v5388_v26  ;;  %3707 = vst [vmem:[#allocation1 + $0x20] ss:$4 sm:$0xff] %v3691_v25  ;;  %vm5967_vm7 = vcmp.eq.s32.totalorder %v4033_v19, 1  ;;  %v4295_v38 = vld [vmem:[%s6041_s15] ss:$0 sm:$0xff]  ;;  %vm4059_vm8 = vcmp.eq.s32.totalorder %v4033_v19, 0 }
0x23a5   :  { %v3777_v63 = vmul.f32 %v4295_v38, %v5862_v40 }
0x23a6   :  { %3709 = vst [vmem:[#allocation1 + $0x21] ss:$4 sm:$0xff] %v3692_v53 }
0x23a7   :  { %3711 = vst [vmem:[#allocation1 + $0x22] ss:$4 sm:$0xff] %v3693_v47  ;;  %v3705_v29 = vld.sshfl [vmem:[#allocation1] sm:$0xff pattern:$0x73625140]  ;;  %v3779_v25 = vsel %vm274_vm10, %v3777_v63, 0.0  ;;  %v3892_v47 = vadd.f32 %v3891_v33, %v3862_v14 }
0x23a8   :  { %v3715_v54 = vsel %vm524_vm0, %v3705_v29, 0.0  ;;  %v3989_v11 = vpop.f32.mrf.mxu3 }
0x23a9   :  { %v3716_v58 = vrot.slane %v3715_v54, 4 }
0x23ab   :  { %v3717_v21 = vadd.f32 %v3716_v58, %v3715_v54  ;;  %v3901_v54 = vadd.f32 %v4294_v5, %v3892_v47 }
0x23ad   :  { %v3718_v30 = vrot.slane %v3717_v21, 2  ;;  %v3904_v58 = vsel %vm3903_vm6, %v3901_v54, -inf }
0x23ae   :  { %v3712_v56 = vld.sshfl [vmem:[#allocation1 + $0x20] sm:$0xff pattern:$0x73625140] }
0x23af   :  { %v3722_v45 = vsel %vm524_vm0, %v3712_v56, 0.0  ;;  %v3719_v31 = vadd.f32 %v3718_v30, %v3717_v21  ;;  %vm5939_vm0 = vcmp.eq.s32.totalorder %v4026_v18, 1  ;;  %v4061_v56 = vsel %vm4059_vm8, %v6110_v27, 0 }
0x23b0   :  { %v3723_v43 = vrot.slane %v3722_v45, 4 }
0x23b1   :  { %v3720_v57 = vrot.slane %v3719_v31, 1 }
0x23b2   :  { %v3724_v44 = vadd.f32 %v3723_v43, %v3722_v45 }
0x23b3   :  { %v3721_v32 = vadd.f32 %v3720_v57, %v3719_v31 }
0x23b4   :  { %v3725_v9 = vrot.slane %v3724_v44, 2 }
0x23b6   :  { %v3726_v4 = vadd.f32 %v3725_v9, %v3724_v44 }
0x23b8   :  { %v3727_v26 = vrot.slane %v3726_v4, 1 }
0x23ba   :  { %v3728_v50 = vadd.f32 %v3727_v26, %v3726_v4  ;;  %v4296_v26 = vld [vmem:[#allocation4] ss:$0 sm:$0xff] }
0x23bc   :  { %v3731_v24 = vsel %vm666_vm9, %v3728_v50, %v3721_v32  ;;  %vm4058_vm9 = vcmp.eq.s32.totalorder %v4026_v18, 0 }
0x23bd   :  { %4233 = vmatmul.msk.f32.vlgmr.msrb.gmra.mxu0 %vm274_vm10, %v3731_v24  ;;  %v4060_v17 = vsel %vm4058_vm9, %v6110_v27, 0 }
0x23be   :  { %v4062_v59 = vsel %vm5939_vm0, %v6111_v41, %v4060_v17 }
0x23c5   :  { %4240 = vmatmul.msk.f32.vlgmr.msra.gmra.mxu0 %vm274_vm10, %v5862_v40  ;;  %v4063_v40 = vsel %vm5967_vm7, %v6111_v41, %v4061_v56 }
0x23c6   :  { %vm4065_vm11 = vcmp.lt.s32.totalorder %v6112_v52, %v4063_v40 }
0x243a   :  { %v3751_v62 = vpop.f32.mrf.mxu0 }
0x243b   :  { %3756 = vst.msk [vmem:[#allocation3 + $0xe] sm:$0x3] %vm1080_vm15, %v3751_v62  ;;  %vm4064_vm15 = vcmp.lt.s32.totalorder %v6112_v52, %v4062_v59 }
0x2442   :  { %v3760_v61 = vld [vmem:[#allocation3 + $0x8] sm:$0xff]  ;;  %v3963_v55 = vpop.f32.mrf.mxu0 }
0x2443   :  { %4237 = vmatmul.msk.f32.gmra.mxu2 %vm274_vm10, %v3760_v61  ;;  %4241 = vmatmul.msk.f32.gmra.mxu0 %vm274_vm10, %v3760_v61  ;;  %v3987_v10 = vadd.f32 %v3986_v15, %v3963_v55  ;;  %v3778_v53 = vmul.f32 %v4295_v38, %v3760_v61 }
0x2445   :  { %v3782_v29 = vsel %vm274_vm10, %v3778_v53, 0.0 }
0x244b   :  { %4246 = vmatmul.msk.f32.vlgmr.msra.gmra.mxu2 %vm274_vm10, %v3987_v10 }
0x24c0   :  { %v3966_v8 = vpop.f32.mrf.mxu0 }
0x24c1   :  { %v3990_v13 = vadd.f32 %v3989_v11, %v3966_v8 }
0x24c3   :  { %4247 = vmatmul.msk.f32.gmra.mxu2 %vm274_vm10, %v3990_v13 }
0x24c6   :  { %v3865_v7 = vpop.f32.mrf.mxu2 }
0x24c7   :  { %v3895_v1 = vadd.f32 %v3894_v42, %v3865_v7 }
0x24c9   :  { %v5962_v51 = vadd.f32 %v4294_v5, %v3895_v1 }
0x24cb   :  { %v3907_v0 = vsel %vm3903_vm6, %v5962_v51, -inf }
0x24ce   :  { %v4015_v49 = vpop.f32.mrf.mxu2 }
0x24cf   :  { %4050 = vrot.lane.b32.xlu2 %v4015_v49, %s4801_s8 }
0x2529   :  { %v4051_v20 = vpop.permute.xlu2 %4050 }
0x252a   :  { %v4056_v35 = vsel %vm5939_vm0, %v4015_v49, %v4051_v20  ;;  %vm4135_vm0 = vcmask 376128  }
0x252b   :  { %4068 = vrot.lane.b32.xlu1 %v4056_v35, %s4802_s9 }
0x2546   :  { %v4018_v22 = vpop.f32.mrf.mxu2 }
0x2547   :  { %4052 = vrot.lane.b32.xlu0 %v4018_v22, %s4801_s8 }
0x2555   :  { %3771 = vadd.xlane.f32.xlu1 %v3770_v37 }
0x2571   :  { %3768 = vadd.xlane.f32.xlu0 %v3767_v60 }
0x259d   :  { %v4069_v28 = vpop.permute.xlu1 %4068 }
0x259e   :  { %v4074_v3 = vsel %vm4064_vm15, %v4069_v28, -1e+09 }
0x259f   :  { %v4077_v23 = vsel %vm4076_vm5, %v4074_v3, -inf }
0x25a0   :  { %4078 = vmax.xlane.f32.xlu0 %v4077_v23 }
0x25a8   :  { %3908 = vmax.xlane.f32.xlu0 %v3907_v0 }
0x25b9   :  { %v4053_v12 = vpop.permute.xlu0 %4052 }
0x25ba   :  { %v4057_v46 = vsel %vm5967_vm7, %v4018_v22, %v4053_v12 }
0x25bb   :  { %4070 = vrot.lane.b32.xlu2 %v4057_v46, %s4802_s9 }
0x25c8   :  { %v3772_v61 = vpop.xlane.xlu1 %3771 }
0x25e4   :  { %3780 = vadd.xlane.f32.xlu2 %v3779_v25  ;;  %v3769_v21 = vpop.xlane.xlu0 %3768 }
0x25ec   :  { %3783 = vadd.xlane.f32.xlu2 %v3782_v29 }
0x25f4   :  { %3905 = vmax.xlane.f32.xlu2 %v3904_v58 }
0x2613   :  { %v4079_v30 = vpop.xlane.xlu0 %4078 }
0x2614   :  { %v4083_v45 = vsub.f32 %v4074_v3, %v4079_v30 }
0x2615   :  { %v4071_v43 = vpop.permute.xlu2 %4070 }
0x2616   :  { %v4085_v31 = vmul.f32 1.442695, %v4083_v45  ;;  %v5986_v44 = vsel %vm4065_vm11, %v4071_v43, -1e+09 }
0x2617   :  { %v4080_v9 = vsel %vm4076_vm5, %v5986_v44, -inf }
0x2618   :  { %4493 = vpow2.f32 %v4085_v31  ;;  %4081 = vmax.xlane.f32.xlu1 %v4080_v9 }
0x261b   :  { %v3909_v48 = vpop.xlane.xlu0 %3908 }
0x261c   :  { %v3911_v38 = vsub.f32 %v5962_v51, %v3909_v48 }
0x261e   :  { %v5990_v57 = vpop.eup %4493  ;;  %v3914_v25 = vmul.f32 1.442695, %v3911_v38 }
0x261f   :  { %v4091_v4 = vsel %vm4076_vm5, %v5990_v57, 0.0 }
0x2620   :  { %4092 = vadd.xlane.f32.xlu1 %v4091_v4 }
0x2657   :  { %v3781_v32 = vpop.xlane.xlu2 %3780 }
0x2658   :  { %v3785_v50 = vadd.f32 %v3781_v32, %v3769_v21 }
0x265a   :  { %v3791_v24 = vadd.f32 %v4296_v26, %v3785_v50 }
0x265c   :  { %v4234_v62 = vmul.f32 -1.442695, %v3791_v24 }
0x265e   :  { %4495 = vpow2.f32 %v4234_v62 }
0x265f   :  { %v3784_v55 = vpop.xlane.xlu2 %3783 }
0x2660   :  { %v3786_v15 = vadd.f32 %v3784_v55, %v3772_v61 }
0x2662   :  { %v3792_v10 = vadd.f32 %v4296_v26, %v3786_v15 }
0x2664   :  { %v4496_v14 = vpop.eup %4495  ;;  %v4235_v11 = vmul.f32 -1.442695, %v3792_v10 }
0x2665   :  { %v3799_v8 = vadd.f32 1.0, %v4496_v14 }
0x2666   :  { %4497 = vpow2.f32 %v4235_v11 }
0x2667   :  { %4499 = vrcp.f32 %v3799_v8  ;;  %v3906_v13 = vpop.xlane.xlu2 %3905  ;;  %v3812_v22 = vand.u32 2147483648, %v3799_v8  ;;  %v3810_v37 = vand.u32 2147483647, %v3799_v8  ;;  %vm3806_vm12 = vweird.f32 %v3799_v8 }
0x2668   :  { %v3910_v7 = vsub.f32 %v3901_v54, %v3906_v13 }
0x2669   :  { %v3813_v27 = vor.u32 1.1754944e-38, %v3812_v22  ;;  %vm3811_vm14 = vcmp.eq.f32.partialorder %v3810_v37, 8.507059e+37 }
0x266a   :  { %v3912_v49 = vmul.f32 1.442695, %v3910_v7 }
0x266c   :  { %v4498_v16 = vpop.eup %4497  ;;  %4501 = vpow2.f32 %v3912_v49 }
0x266d   :  { %v4500_v18 = vpop.eup %4499  ;;  %v3800_v34 = vadd.f32 1.0, %v4498_v16 }
0x266e   :  { %v3802_v20 = vmul.f32 %v4500_v18, %v3799_v8  ;;  %vm3807_vm10 = vweird.f32 %v4500_v18 }
0x266f   :  { %4503 = vrcp.f32 %v3800_v34  ;;  %vm3808_vm13 = vmor %vm3806_vm12, %vm3807_vm10  ;;  %v3827_v42 = vand.u32 2147483648, %v3800_v34  ;;  %v3825_v1 = vand.u32 2147483647, %v3800_v34  ;;  %vm3821_vm2 = vweird.f32 %v3800_v34 }
0x2670   :  { %v3803_v35 = vsub.f32 1.0, %v3802_v20 }
0x2671   :  { %v3828_v5 = vor.u32 1.1754944e-38, %v3827_v42  ;;  %vm3826_vm4 = vcmp.eq.f32.partialorder %v3825_v1, 8.507059e+37 }
0x2672   :  { %v5994_v2 = vpop.eup %4501  ;;  %v3804_v36 = vmul.f32 %v4500_v18, %v3803_v35 }
0x2673   :  { %v3916_v6 = vsel %vm3903_vm6, %v5994_v2, 0.0 }
0x2674   :  { %3917 = vadd.xlane.f32.xlu2 %v3916_v6  ;;  %v3805_v60 = vadd.f32 %v4500_v18, %v3804_v36 }
0x2675   :  { %v4504_v33 = vpop.eup %4503 }
0x2676   :  { %v3809_v17 = vsel %vm3808_vm13, %v4500_v18, %v3805_v60  ;;  %v3817_v41 = vmul.f32 %v4504_v33, %v3800_v34  ;;  %vm3822_vm1 = vweird.f32 %v4504_v33 }
0x2677   :  { %v3814_v59 = vsel %vm3811_vm14, %v3813_v27, %v3809_v17  ;;  %vm3823_vm3 = vmor %vm3821_vm2, %vm3822_vm1 }
0x2678   :  { %v4089_v52 = vsub.f32 1.0, %v3814_v59  ;;  %v3818_v28 = vsub.f32 1.0, %v3817_v41 }
0x267a   :  { %4103 = vperm.xlu0 %4289, %v4089_v52   ;;  %v3819_v3 = vmul.f32 %v4504_v33, %v3818_v28 }
0x267c   :  { %v3820_v23 = vadd.f32 %v4504_v33, %v3819_v3 }
0x267e   :  { %v3824_v0 = vsel %vm3823_vm3, %v4504_v33, %v3820_v23 }
0x267f   :  { %v3829_v39 = vsel %vm3826_vm4, %v3828_v5, %v3824_v0 }
0x2680   :  { %v4090_v19 = vsub.f32 1.0, %v3829_v39 }
0x2682   :  { %4108 = vperm.xlu1 %4290, %v4090_v19  }
0x268a   :  { %3933 = vperm.xlu1 %4290, %v3829_v39  }
0x268b   :  { %v4082_v12 = vpop.xlane.xlu1 %4081 }
0x268c   :  { %v4084_v46 = vsub.f32 %v5986_v44, %v4082_v12 }
0x268e   :  { %v4087_v63 = vmul.f32 1.442695, %v4084_v46 }
0x2690   :  { %4505 = vpow2.f32 %v4087_v63 }
0x2691   :  { %4507 = vpow2.f32 %v3914_v25 }
0x2693   :  { %v4093_v58 = vpop.xlane.xlu1 %4092 }
0x2694   :  { %4509 = vrcp.f32 %v4093_v58 }
0x2696   :  { %v4506_v53 = vpop.eup %4505 }
0x2697   :  { %v4094_v47 = vsel %vm4076_vm5, %v4506_v53, 0.0  ;;  %v4508_v29 = vpop.eup %4507 }
0x2698   :  { %4095 = vadd.xlane.f32.xlu2 %v4094_v47  ;;  %v3919_v54 = vsel %vm3903_vm6, %v4508_v29, 0.0 }
0x269a   :  { %v4510_v21 = vpop.eup %4509 }
0x269b   :  { %v4099_v56 = vmul.f32 %v4510_v21, %v5990_v57 }
0x26a0   :  { %3920 = vadd.xlane.f32.xlu2 %v3919_v54 }
0x26b8   :  { %3928 = vperm.xlu2 %4291, %v3814_v59  }
0x26e7   :  { %v3918_v31 = vpop.xlane.xlu2 %3917 }
0x26ec   :  { %v4104_v40 = vpop.permute.xlu0 %4103 }
0x26ed   :  { %v4111_v51 = vmul.f32 %v4104_v40, %v4099_v56 }
0x26ef   :  { %v4121_v30 = vadd.f32 1e-06, %v4111_v51  ;;  %4138 = vst.msk [vmem:[%s6049_s23] sm:$0xff] %vm4076_vm5, %v4111_v51 }
0x26f1   :  { %4511 = vlog2.f32 %v4121_v30 }
0x26f4   :  { %v4109_v4 = vpop.permute.xlu1 %4108 }
0x26f7   :  { %v4512_v45 = vpop.eup %4511 }
0x26f8   :  { %v4124_v43 = vmul.f32 0.6931472, %v4512_v45 }
0x26fa   :  { %4129 = vrot.lane.b32.xlu1 %v4124_v43, %s4803_s13 }
0x26fc   :  { %v3934_v10 = vpop.permute.xlu1 %3933 }
0x270b   :  { %v4096_v44 = vpop.xlane.xlu2 %4095 }
0x270c   :  { %4513 = vrcp.f32 %v4096_v44 }
0x270d   :  { %4515 = vrcp.f32 %v3918_v31 }
0x2712   :  { %v4514_v9 = vpop.eup %4513 }
0x2713   :  { %v4100_v57 = vmul.f32 %v4514_v9, %v4506_v53  ;;  %v3921_v26 = vpop.xlane.xlu2 %3920  ;;  %v4516_v50 = vpop.eup %4515 }
0x2714   :  { %4517 = vrcp.f32 %v3921_v26  ;;  %v3924_v61 = vmul.f32 %v4516_v50, %v5994_v2 }
0x2715   :  { %v4112_v32 = vmul.f32 %v4109_v4, %v4100_v57 }
0x2717   :  { %v4122_v24 = vadd.f32 1e-06, %v4112_v32  ;;  %4139 = vst.msk [vmem:[%s6049_s23 + $0x8] sm:$0xff] %vm4076_vm5, %v4112_v32 }
0x2719   :  { %4519 = vlog2.f32 %v4122_v24 }
0x271a   :  { %v4518_v62 = vpop.eup %4517 }
0x271b   :  { %v3925_v55 = vmul.f32 %v4518_v62, %v4508_v29  ;;  %v3929_v15 = vpop.permute.xlu2 %3928 }
0x271c   :  { %v3936_v14 = vmul.f32 %v3929_v15, %v3924_v61 }
0x271d   :  { %v3937_v11 = vmul.f32 %v3934_v10, %v3925_v55 }
0x271e   :  { %v4113_v8 = vadd.f32 1e-06, %v3936_v14 }
0x271f   :  { %v4520_v13 = vpop.eup %4519  ;;  %v4114_v7 = vadd.f32 1e-06, %v3937_v11 }
0x2720   :  { %4521 = vlog2.f32 %v4113_v8  ;;  %v4126_v49 = vmul.f32 0.6931472, %v4520_v13 }
0x2721   :  { %4523 = vlog2.f32 %v4114_v7 }
0x2722   :  { %4131 = vrot.lane.b32.xlu0 %v4126_v49, %s4803_s13 }
0x2726   :  { %v4522_v16 = vpop.eup %4521 }
0x2727   :  { %v4524_v18 = vpop.eup %4523  ;;  %v4116_v34 = vmul.f32 0.6931472, %v4522_v16 }
0x2728   :  { %v4118_v20 = vmul.f32 0.6931472, %v4524_v18 }
0x2729   :  { %4119 = vst.msk [vmem:[%s6048_s22] sm:$0xff] %vm3903_vm6, %v4116_v34 }
0x272a   :  { %4120 = vst.msk [vmem:[%s6048_s22 + $0x8] sm:$0xff] %vm3903_vm6, %v4118_v20 }
0x276c   :  { %v4130_v35 = vpop.permute.xlu1 %4129 }
0x276d   :  { %4136 = vst.msk [vmem:[%s6048_s22] sm:$0xff] %vm4135_vm0, %v4130_v35 }
0x2794   :  { %v4132_v22 = vpop.permute.xlu0 %4131 }
0x2795   :  { %4137 = vst.msk [vmem:[%s6048_s22 + $0x8] sm:$0xff] %vm4135_vm0, %v4132_v22 }
0x2796   :  { %4148 = vsyncpa [#allocation6], 1 }
0x2797   :  { %4149 = vsyncpa [#allocation10], 1 }
0x2798   :  { %4150 = vsyncpa [#allocation13], 1 }
0x2799   :  { %4151 = vsyncpa [#allocation16], 1 }
0x279a   :  { %4152 = vsyncpa [#allocation19], 1 }
0x279b   :  { %4153 = vsyncpa [#allocation7], 1 }

</bundles_post_ra>
